<compile_context>
chip_gen: v7x
topology: tpu7x:2x2x1
jax: 0.10.0
libtpu: 0.0.40
codegen_flags: <defaults>
</compile_context>

<pallas_src>
import functools
import math

import jax
import jax.numpy as jnp
from jax import lax
from jax.experimental import pallas as pl
from jax.experimental.pallas import tpu as pltpu


def qkv_proj_kernel(x_ref, w_ref, b_ref, q_ref, k_ref, v_ref, *, dim):
    """q|k|v = x @ [Wq^T*scale | Wk^T | Wv^T] + [bq*scale | bk | bv] — one bf16 MXU pass."""
    r = jnp.dot(x_ref[...], w_ref[...], preferred_element_type=jnp.float32) + b_ref[...]
    q_ref[...] = r[:, 0 * dim:1 * dim].astype(q_ref.dtype)
    k_ref[...] = r[:, 1 * dim:2 * dim].astype(k_ref.dtype)
    v_ref[...] = r[:, 2 * dim:3 * dim].astype(v_ref.dtype)


def _flash_attn_body(q_ref, k_ref, v_ref, mask_ref, wo_ref, bo_ref, out_ref,
                     m_sc, l_sc, acc_sc, *, causal, tq, tk, heads_per_group):
    """Grouped-head flash attention + fused output projection.

    grid = (B, n_q_tiles, n_head_groups, n_kv_tiles); head-group & kv axes accumulate.
    """
    qi, hg, ki = pl.program_id(1), pl.program_id(2), pl.program_id(3)
    nk = pl.num_programs(3)

    @pl.when((hg == 0) & (ki == 0))
    def _():                      # first visit of this output block: start from the bias
        out_ref[...] = jnp.broadcast_to(bo_ref[...], out_ref.shape).astype(out_ref.dtype)

    @pl.when(ki == 0)
    def _():                      # new head group: reset online-softmax state
        m_sc[...] = jnp.full_like(m_sc, -jnp.inf)
        l_sc[...] = jnp.zeros_like(l_sc)
        acc_sc[...] = jnp.zeros_like(acc_sc)

    def compute():
        # (G, tq, tk) scores; bf16 operands, f32 accumulation; 1/sqrt(dim) is pre-folded
        # into the q projection, so no per-step scale multiply here.
        s = jnp.einsum('gqd,gkd->gqk', q_ref[...], k_ref[...],
                       preferred_element_type=jnp.float32)
        if causal:                # masked_fill(mask == 0, -1000.0) generated in-kernel
            row = qi * tq + lax.broadcasted_iota(jnp.int32, (tq, tk), 0)
            col = ki * tk + lax.broadcasted_iota(jnp.int32, (tq, tk), 1)
            s = jnp.where((col <= row)[None, :, :], s, -1000.0)
        else:                     # arbitrary mask: single bf16 plane, exact masked_fill
            s = jnp.where((mask_ref[...] != 0)[None, :, :], s, -1000.0)
        m_prev = m_sc[...]
        m_new = jnp.maximum(m_prev, jnp.max(s, axis=-1, keepdims=True))
        alpha = jnp.exp(m_prev - m_new)
        p = jnp.exp(s - m_new)
        l_sc[...] = alpha * l_sc[...] + jnp.sum(p, axis=-1, keepdims=True)
        acc_sc[...] = alpha * acc_sc[...] + jnp.einsum(
            'gqk,gkd->gqd', p.astype(v_ref.dtype), v_ref[...],
            preferred_element_type=jnp.float32)
        m_sc[...] = m_new

    if causal:
        # Fully-masked kv tiles: compute skipped here; their DMA is also skipped
        # because the kv index_map clamps ki to qi (block index unchanged -> no fetch).
        pl.when(ki <= qi)(compute)
    else:
        compute()

    @pl.when(ki == nk - 1)
    def _():                      # head group done: fold into the fused out-projection
        o = acc_sc[...] * pl.reciprocal(l_sc[...], approx=True)      # (G, tq, hd) f32
        proj = jnp.zeros(out_ref.shape, jnp.float32)
        for g in range(heads_per_group):                              # static unroll
            proj = proj + jnp.dot(o[g].astype(wo_ref.dtype), wo_ref[g],
                                  preferred_element_type=jnp.float32)
        # TODO(synk): if the output dtype is ever narrower than f32, keep an f32 scratch
        # accumulator instead of accumulating directly into out_ref.
        out_ref[...] += proj.astype(out_ref.dtype)


def _make_flash_kernel(causal, tq, tk, heads_per_group):
    if causal:
        def kernel(q_ref, k_ref, v_ref, wo_ref, bo_ref, out_ref, m_sc, l_sc, acc_sc):
            _flash_attn_body(q_ref, k_ref, v_ref, None, wo_ref, bo_ref, out_ref,
                             m_sc, l_sc, acc_sc, causal=True, tq=tq, tk=tk,
                             heads_per_group=heads_per_group)
    else:
        def kernel(q_ref, k_ref, v_ref, mask_ref, wo_ref, bo_ref, out_ref,
                   m_sc, l_sc, acc_sc):
            _flash_attn_body(q_ref, k_ref, v_ref, mask_ref, wo_ref, bo_ref, out_ref,
                             m_sc, l_sc, acc_sc, causal=False, tq=tq, tk=tk,
                             heads_per_group=heads_per_group)
    return kernel


def _largest_tile(n, candidates, min_blocks=1):
    for t in candidates:
        if n % t == 0 and n // t >= min_blocks:
            return t
    for t in candidates:
        if n % t == 0:
            return t
    # TODO(synk): pad/mask ragged final tiles (pl.cdiv grid) instead of a full-extent block.
    return n


def multi_head_self_atten(x, mask, wqkv, bqkv, wout, bout, *, head, causal=False):
    """Pallas MultiHeadSelfAtten.forward (past_keys/past_values = None path).

    causal=True : mask is assumed to be the standard lower-triangular GPT mask; it is
                  generated in-kernel and fully-masked kv tiles are skipped.
    causal=False: the (S, S) mask is streamed as a single bf16 plane.
    """
    # TODO(synk): past_keys/past_values KV-cache concat path not implemented (None case only).
    B, S, dim = x.shape
    hd = dim // head
    bf16, f32 = jnp.bfloat16, jnp.float32
    scale = 1.0 / math.sqrt(dim)   # PyTorch module scales by sqrt(dim), not sqrt(head_dim)

    # --- one-time wrapper-side prep: transposes, weight fusion, scale folding, bf16 ---
    wq_t = wqkv[0 * dim:1 * dim].T
    wk_t = wqkv[1 * dim:2 * dim].T
    wv_t = wqkv[2 * dim:3 * dim].T
    b3 = bqkv.reshape(3 * dim)
    # Fold 1/sqrt(dim) into the q columns only (returned k/v stay identical to PyTorch).
    w_fused = jnp.concatenate([wq_t * scale, wk_t, wv_t], axis=1).astype(bf16)  # (dim, 3dim)
    b_fused = jnp.concatenate([b3[:dim] * scale, b3[dim:]]).reshape(1, 3 * dim).astype(f32)
    wo_g = wout.T.reshape(head, hd, dim).astype(bf16)     # (head, hd, dim): out = o @ Wout^T
    bo2 = bout.reshape(1, dim).astype(f32)

    # ---------------- kernel 1: fused QKV projection over flattened tokens -----------
    M = B * S
    x2 = x.reshape(M, dim).astype(bf16)
    # >= 2 blocks keeps both v7x TensorCores busy on the parallel axis.
    tm = _largest_tile(M, (512, 256, 128, 64, 32, 16, 8), min_blocks=2)
    # TODO(synk): for model-scale dim, add N/K grid axes so the (dim, 3*dim) weight is
    # streamed in tiles instead of fully resident (v7x has only 64 MiB VMEM).
    q2, k2, v2 = pl.pallas_call(
        functools.partial(qkv_proj_kernel, dim=dim),
        out_shape=(jax.ShapeDtypeStruct((M, dim), bf16),      # q: internal-only -> bf16
                   jax.ShapeDtypeStruct((M, dim), x.dtype),   # k, v: returned -> input dtype
                   jax.ShapeDtypeStruct((M, dim), x.dtype)),
        grid=(M // tm,),
        in_specs=[pl.BlockSpec((tm, dim), lambda i: (i, 0)),
                  pl.BlockSpec((dim, 3 * dim), lambda i: (0, 0)),
                  pl.BlockSpec((1, 3 * dim), lambda i: (0, 0))],
        out_specs=(pl.BlockSpec((tm, dim), lambda i: (i, 0)),) * 3,
        compiler_params=pltpu.CompilerParams(
            dimension_semantics=("parallel",), vmem_limit_bytes=32 * 1024 * 1024),
    )(x2, w_fused, b_fused)

    def to_heads(t):
        return t.reshape(B, S, head, hd).transpose(0, 2, 1, 3)

    q4 = to_heads(q2)                         # bf16, attention input only
    k4, v4 = to_heads(k2), to_heads(v2)       # f32, returned exactly like the module
    k4b, v4b = k4.astype(bf16), v4.astype(bf16)

    # ------------- kernel 2: grouped-head flash attention + fused out-proj -----------
    # Group G heads per grid step so the out-proj contraction is G*hd wide and the
    # per-step overhead / Wout tile are amortized across heads.
    G = 1
    for g in range(head, 0, -1):
        if head % g == 0 and g * hd <= 128:
            G = g
            break
    HG = head // G
    tq = tk = _largest_tile(S, (256, 128))
    nq, nkv = S // tq, S // tk

    if causal:
        # Clamp the kv block index: fully-masked tiles re-use the previous block, so
        # their DMA is skipped along with their compute (pl.when(ki <= qi) in-kernel).
        kv_idx = lambda b, qi, hg, ki: (b, hg, jnp.minimum(ki, qi), 0)
    else:
        kv_idx = lambda b, qi, hg, ki: (b, hg, ki, 0)

    in_specs = [
        pl.BlockSpec((pl.Squeezed(), G, tq, hd), lambda b, qi, hg, ki: (b, hg, qi, 0)),  # q
        pl.BlockSpec((pl.Squeezed(), G, tk, hd), kv_idx),                                # k
        pl.BlockSpec((pl.Squeezed(), G, tk, hd), kv_idx),                                # v
    ]
    inputs = [q4, k4b, v4b]
    if not causal:
        in_specs.append(pl.BlockSpec((tq, tk), lambda b, qi, hg, ki: (qi, ki)))          # mask
        inputs.append((mask != 0).astype(bf16))
    in_specs += [
        pl.BlockSpec((G, hd, dim), lambda b, qi, hg, ki: (hg, 0, 0)),                    # Wout^T
        pl.BlockSpec((1, dim), lambda b, qi, hg, ki: (0, 0)),                            # bout
    ]
    inputs += [wo_g, bo2]

    out = pl.pallas_call(
        _make_flash_kernel(causal, tq, tk, G),
        out_shape=jax.ShapeDtypeStruct((B, S, dim), x.dtype),
        grid=(B, nq, HG, nkv),
        in_specs=in_specs,
        out_specs=pl.BlockSpec((pl.Squeezed(), tq, dim), lambda b, qi, hg, ki: (b, qi, 0)),
        scratch_shapes=[
            pltpu.VMEM((G, tq, 1), f32),      # m: running max
            pltpu.VMEM((G, tq, 1), f32),      # l: running denominator
            pltpu.VMEM((G, tq, hd), f32),     # per-group attention accumulator
        ],
        compiler_params=pltpu.CompilerParams(
            dimension_semantics=("parallel", "parallel", "arbitrary", "arbitrary"),
            vmem_limit_bytes=32 * 1024 * 1024),
    )(*inputs)

    return out, k4, v4


if __name__ == "__main__":
    # Lane/sublane-aligned small shapes that exercise multi-block token tiles, multiple
    # q/kv tiles (online softmax + causal tile skipping) and >1 head group
    # (dim=256, head=8 -> head_dim=32, two groups of 4 heads).
    B, S, dim, head = 2, 512, 256, 8

    key = jax.random.PRNGKey(0)
    kx, kw1, kb1, kw2, kb2 = jax.random.split(key, 5)

    # Deterministic parameter init (PyTorch Linear-style uniform bound 1/sqrt(fan_in)).
    bound = 1.0 / math.sqrt(dim)
    wqkv = jax.random.uniform(kw1, (3 * dim, dim), jnp.float32, -bound, bound)
    bqkv = jax.random.uniform(kb1, (3 * dim,), jnp.float32, -bound, bound)
    wout = jax.random.uniform(kw2, (dim, dim), jnp.float32, -bound, bound)
    bout = jax.random.uniform(kb2, (dim,), jnp.float32, -bound, bound)

    x = jax.random.normal(kx, (B, S, dim), jnp.float32)
    mask = jnp.tril(jnp.ones((S, S), jnp.int32))   # 1 = attend, 0 = masked_fill(-1000.0)

    # Causal path (what GPT uses): mask generated in-kernel, masked kv tiles skipped.
    out_c, k_c, v_c = multi_head_self_atten(x, mask, wqkv, bqkv, wout, bout,
                                            head=head, causal=True)
    # General-mask path: single bf16 mask plane streamed.
    out_m, k_m, v_m = multi_head_self_atten(x, mask, wqkv, bqkv, wout, bout,
                                            head=head, causal=False)
    jax.block_until_ready((out_c, k_c, v_c, out_m, k_m, v_m))

    hd = dim // head
    assert out_c.shape == (B, S, dim) and out_m.shape == (B, S, dim)
    assert k_c.shape == (B, head, S, hd) and v_c.shape == (B, head, S, hd)

    # Pure-JAX fp32 reference with the PyTorch forward semantics (loose tolerance: the
    # kernels use bf16 MXU operands and the approximate EUP reciprocal).
    def ref_forward(x, mask):
        qkv = jnp.einsum('bsd,ed->bse', x, wqkv) + bqkv
        q_, k_, v_ = jnp.split(qkv, 3, axis=-1)

        def rs(t):
            return t.reshape(B, S, head, hd).transpose(0, 2, 1, 3)

        q_, k_, v_ = rs(q_), rs(k_), rs(v_)
        s = jnp.einsum('bhqd,bhkd->bhqk', q_, k_) / math.sqrt(dim)
        s = jnp.where(mask[None, None] == 0, -1000.0, s)
        a = jax.nn.softmax(s, axis=-1)
        o = jnp.einsum('bhqk,bhkd->bhqd', a, v_)
        o = o.transpose(0, 2, 1, 3).reshape(B, S, dim)
        return jnp.einsum('bsd,ed->bse', o, wout) + bout, k_, v_

    ref_out, ref_k, ref_v = ref_forward(x, mask)
    checks = (("out(causal)", out_c, ref_out), ("k(causal)", k_c, ref_k),
              ("v(causal)", v_c, ref_v), ("out(mask)", out_m, ref_out),
              ("k(mask)", k_m, ref_k), ("v(mask)", v_m, ref_v))
    for name, got, want in checks:
        assert jnp.allclose(got, want, rtol=5e-2, atol=2e-2), f"{name} mismatch vs reference"

    print("KERNEL_OK")
</pallas_src>

<mosaic_0001>
module attributes {stable_mosaic.version = 11 : i64} {
  func.func @qkv_proj_kernel(%arg0: i32, %arg1: memref<512x256xbf16, #tpu.memory_space<vmem>>, %arg2: memref<256x768xbf16, #tpu.memory_space<vmem>>, %arg3: memref<1x768xf32, #tpu.memory_space<vmem>>, %arg4: memref<512x256xbf16, #tpu.memory_space<vmem>>, %arg5: memref<512x256xf32, #tpu.memory_space<vmem>>, %arg6: memref<512x256xf32, #tpu.memory_space<vmem>>) attributes {dimension_semantics = [#tpu.dimension_semantics<parallel>], iteration_bounds = array<i64: 2>, scalar_prefetch = 0 : i64, scratch_operands = 0 : i64, tpu.core_type = #tpu.core_type<tc>, window_params = [{transform_indices = @transform_0, window_bounds = array<i64: 512, 256>}, {pipeline_mode = #tpu.pipeline_mode<synchronous>, transform_indices = @transform_1, window_bounds = array<i64: 256, 768>}, {pipeline_mode = #tpu.pipeline_mode<synchronous>, transform_indices = @transform_2, window_bounds = array<i64: 1, 768>}, {transform_indices = @transform_3, window_bounds = array<i64: 512, 256>}, {transform_indices = @transform_4, window_bounds = array<i64: 512, 256>}, {transform_indices = @transform_5, window_bounds = array<i64: 512, 256>}]} {
    %c0 = arith.constant 0 : index
    %c0_0 = arith.constant 0 : index
    %0 = vector.load %arg1[%c0, %c0_0] : memref<512x256xbf16, #tpu.memory_space<vmem>>, vector<512x256xbf16>
    %c0_1 = arith.constant 0 : index
    %c0_2 = arith.constant 0 : index
    %1 = vector.load %arg2[%c0_1, %c0_2] : memref<256x768xbf16, #tpu.memory_space<vmem>>, vector<256x768xbf16>
    %cst = arith.constant dense<0.000000e+00> : vector<512x768xf32>
    %2 = tpu.matmul %0, %1, %cst {dimension_numbers = #tpu.dot_dimension_numbers<[1], [0], [0], [1], [0, 0, 1, 1], [], []>} : vector<512x256xbf16>, vector<256x768xbf16>, vector<512x768xf32> -> vector<512x768xf32>
    %c0_3 = arith.constant 0 : index
    %c0_4 = arith.constant 0 : index
    %3 = vector.load %arg3[%c0_3, %c0_4] : memref<1x768xf32, #tpu.memory_space<vmem>>, vector<1x768xf32>
    %4 = vector.broadcast %3 : vector<1x768xf32> to vector<512x768xf32>
    %5 = arith.addf %2, %4 : vector<512x768xf32>
    %6 = vector.extract_strided_slice %5 {offsets = [0, 0], sizes = [512, 256], strides = [1, 1]} : vector<512x768xf32> to vector<512x256xf32>
    %7 = arith.truncf %6 : vector<512x256xf32> to vector<512x256xbf16>
    %c0_5 = arith.constant 0 : index
    %c0_6 = arith.constant 0 : index
    %8 = vector.load %arg4[%c0_5, %c0_6] : memref<512x256xbf16, #tpu.memory_space<vmem>>, vector<512x256xbf16>
    tpu.vector_store %arg4[%c0_5, %c0_6], %7 {strides = array<i32>} : memref<512x256xbf16, #tpu.memory_space<vmem>>, vector<512x256xbf16>,
    %9 = vector.extract_strided_slice %5 {offsets = [0, 256], sizes = [512, 256], strides = [1, 1]} : vector<512x768xf32> to vector<512x256xf32>
    %c0_7 = arith.constant 0 : index
    %c0_8 = arith.constant 0 : index
    %10 = vector.load %arg5[%c0_7, %c0_8] : memref<512x256xf32, #tpu.memory_space<vmem>>, vector<512x256xf32>
    tpu.vector_store %arg5[%c0_7, %c0_8], %9 {strides = array<i32>} : memref<512x256xf32, #tpu.memory_space<vmem>>, vector<512x256xf32>,
    %11 = vector.extract_strided_slice %5 {offsets = [0, 512], sizes = [512, 256], strides = [1, 1]} : vector<512x768xf32> to vector<512x256xf32>
    %c0_9 = arith.constant 0 : index
    %c0_10 = arith.constant 0 : index
    %12 = vector.load %arg6[%c0_9, %c0_10] : memref<512x256xf32, #tpu.memory_space<vmem>>, vector<512x256xf32>
    tpu.vector_store %arg6[%c0_9, %c0_10], %11 {strides = array<i32>} : memref<512x256xf32, #tpu.memory_space<vmem>>, vector<512x256xf32>,
    return
  }
  func.func @transform_0(%arg0: i32) -> (i32, i32) {
    %c0_i32 = arith.constant 0 : i32
    %c0_i32_0 = arith.constant 0 : i32
    return %arg0, %c0_i32 : i32, i32
  }
  func.func @transform_1(%arg0: i32) -> (i32, i32) {
    %c0_i32 = arith.constant 0 : i32
    %c0_i32_0 = arith.constant 0 : i32
    %c0_i32_1 = arith.constant 0 : i32
    return %c0_i32, %c0_i32_0 : i32, i32
  }
  func.func @transform_2(%arg0: i32) -> (i32, i32) {
    %c0_i32 = arith.constant 0 : i32
    %c0_i32_0 = arith.constant 0 : i32
    %c0_i32_1 = arith.constant 0 : i32
    return %c0_i32, %c0_i32_0 : i32, i32
  }
  func.func @transform_3(%arg0: i32) -> (i32, i32) {
    %c0_i32 = arith.constant 0 : i32
    %c0_i32_0 = arith.constant 0 : i32
    return %arg0, %c0_i32 : i32, i32
  }
  func.func @transform_4(%arg0: i32) -> (i32, i32) {
    %c0_i32 = arith.constant 0 : i32
    %c0_i32_0 = arith.constant 0 : i32
    return %arg0, %c0_i32 : i32, i32
  }
  func.func @transform_5(%arg0: i32) -> (i32, i32) {
    %c0_i32 = arith.constant 0 : i32
    %c0_i32_0 = arith.constant 0 : i32
    return %arg0, %c0_i32 : i32, i32
  }
}

</mosaic_0001>

<bundles_post_ra>
// kernel: tpu_custom_call.1
= control target key start
LH: loop header
LB: loop body
LE: loop exit
PB: predicated region body
PF: predicated region fallthrough
CT: control target
= control target key end

     0   :  { %11 = vsyncpa [#allocation3], 0  ;;  %s5490_s0 = inlined_call_operand.hbm [shape: bf16[1024,256], index: 0, kind: input, shape index: {}]   ;;  %s5491_s1 = inlined_call_operand.hbm [shape: bf16[256,768], index: 1, kind: input, shape index: {}]   ;;  %s5492_s2 = inlined_call_operand.vmem [shape: f32[1,768], index: 2, kind: input, shape index: {}]   ;;  %s5493_s3 = inlined_call_operand.hbm [shape: bf16[1024,256], index: 3, kind: output, shape index: {0}]   ;;  %s5494_s4 = inlined_call_operand.hbm [shape: f32[1024,256], index: 4, kind: output, shape index: {1}]   ;;  %s5495_s5 = inlined_call_operand.hbm [shape: f32[1024,256], index: 5, kind: output, shape index: {2}]  }
   0x1   :  { %13 = vsyncpa [#allocation3 + $0x1], 0 }
   0x2   :  { %14 = vsyncpa [#allocation6], 0 }
   0x3   :  { %15 = vsyncpa [#allocation4], 0 }
   0x4   :  { %17 = vsyncpa [#allocation4 + $0x1], 0 }
   0x5   :  { %18 = vsyncpa [#allocation9], 0 }
   0x6   :  { %20 = vsyncpa [#allocation9 + $0x1], 0  ;;  %s4164_s18 = smov 0   ;;  %s4166_s19 = smov 0  }
   0x7   :  { %s4168_s20 = smov 0   ;;  %s4170_s21 = smov 0  }
   0x8 LB: > { %s4185_s22 = sadd.s32 4294967295, %s4119_s21   ;;  %s3239_s23 = sadd.s32 4294967294, %s4119_s21   ;;  %s4119_s21 = sphi %s4170_s21, %s5515_s21   ;;  %s4115_s20 = sphi %s4168_s20, %s5514_s20   ;;  %s4111_s19 = sphi %s4166_s19, %s5513_s19   ;;  %s4107_s18 = sphi %s4164_s18, %s5512_s18  }
   0x9   : > { %p46_p0 = scmp.ne.s32.totalorder %s4111_s19, %s4107_s18  ;;  %p5496_p1 = scmp.eq.s32.totalorder %s4185_s22, 0 }
   0xa   : > { %p118_p3 = scmp.eq.s32.totalorder %s3239_s23, 1  ;;  %p3240_p5 = scmp.ge.s32.totalorder %s4119_s21, 1 }
   0xb   : > { %p4196_p4 = por %p5496_p1, %p46_p0  ;;  %p177_p7 = scmp.lt.s32.totalorder %s4119_s21, 3 }
   0xc   : > { %p4201_p6 = por %p118_p3, %p46_p0  ;;  %s4121_s27 = smov [#allocation5]  }
   0xd   : > { %s5499_s24 = scalar_select %p4196_p4, 1, 0 }
   0xe   : > { %s5500_s25 = scalar_select %p4201_p6, 1, 0 }
   0xf   : > { %p4206_p8 = pnand %p3240_p5, %p177_p7  ;;  %s189_s28 = sshll.u32 %s4121_s27, 4  ;;  %s4210_s28 = int_to_ptr.vmem [resolvable:$true] %s189_s28 }
  0x10   : > { %s4222_s30 = sadd.s32 1, %s4119_s21   ;;  %s33_s6 = sadd.s32 1, %s4115_s20 }
  0x11   : > { %s5501_s26 = scalar_select %p4206_p8, 1, 0 }
  0x12   : > { %p3607_p9 = pneg %p4206_p8  ;;  %s30_s7 = ssub.s32 %s4119_s21, %s4222_s30 }
  0x13   : > { %s3931_s10 = scalar_lea.hbm %s5491_s1, 12288 }
  0x14   : > { %p4217_p11 = pnand %p3607_p9, %p5496_p1  ;;  %p3932_p12 = scmp.ne.s32.totalorder %s5491_s1, %s3931_s10 }
  0x15   : > { %p3938_p5 = scmp.lt.u32.totalorder %s3931_s10, %s5491_s1 }
  0x16   : > { %p3933_p13 = pneg %p4217_p11 }
  0x18   : > { %p3934_p0 = pnand %p3933_p13, %p3932_p12 }
  0x1a   : > { %p3935_p3 = pneg %p3934_p0 }
  0x1c   : > { %p3940_p7 = pnand %p3938_p5, %p3935_p3 }
  0x1e   : > { %3943 = shalt.err (!%p3940_p7)
}
  0x1f   : > { %s3944_s15 = scalar_lea.vmem %s4210_s28, 12288  ;;  %p3952_p2 = scmp.lt.s32.totalorder %s4210_s28, %s4210_s28 }
  0x20   : > { %p3945_p9 = scmp.ne.s32.totalorder %s4210_s28, %s3944_s15  ;;  %p3953_p6 = scmp.lt.s32.totalorder %s3944_s15, %s3944_s15 }
  0x22   : > { %p3947_p10 = pnand %p3945_p9, %p3933_p13  ;;  %p3954_p4 = por %p3953_p6, %p3952_p2 }
  0x24   : > { %p3948_p1 = pneg %p3947_p10 }
  0x26   : > { %p3955_p8 = pnand %p3954_p4, %p3948_p1 }
  0x28   : > { %3958 = shalt.err (!%p3955_p8)
}
  0x29   : > { %s4122_s16 = smov 384   ;;  %s4123_s17 = smov 24  }
  0x2a   : > { %3610 = dma.hbm_to_vmem [thread:$0]  (!%p4217_p11), %s5491_s1, 12288, %s4210_s28, [#allocation6], %s4122_s16, %s4122_s16, %s4123_s17  }
  0x2b   : > { %p31_p2 = scmp.eq.s32.totalorder %s30_s7, 0  ;;  %p40_p1 = scmp.ne.s32.totalorder %s4115_s20, %s4111_s19 }
  0x2c   : > { %p41_p4 = scmp.eq.s32.totalorder %s4119_s21, 0  ;;  %p3626_p6 = scmp.lt.s32.totalorder %s4119_s21, 2 }
  0x2d   : > { %s4253_s9 = scalar_select %p31_p2, %s4115_s20, %s33_s6  }
  0x2e   : > { %p42_p8 = por %p41_p4, %p40_p1  ;;  %p5503_p10 = scmp.eq.s32.totalorder %s4185_s22, 1 }
  0x2f   : > { %s206_s11 = sand.u32 1, %s4115_s20   ;;  %s3492_s12 = sshll.u32 %s4119_s21, 13 }
  0x30   : > { %p4257_p12 = por %p5503_p10, %p40_p1  ;;  %s3243_s13 = sshll.u32 %s206_s11, 9 }
  0x31   : > { %s4266_s15 = scalar_lea.hbm %s5490_s0, %s3492_s12  ;;  %s210_s28 = scalar_lea.vmem [#allocation2], %s3243_s13 }
  0x32   : > { %s218_s6 = sshll.u32 %s210_s28, 4  ;;  %p4268_p11 = pnand %p3626_p6, %p42_p8  ;;  %s4272_s6 = int_to_ptr.vmem [resolvable:$true] %s218_s6 }
  0x33   : > { %s4274_s16 = scalar_lea.sflag [#allocation3], %s206_s11  ;;  %s3959_s17 = scalar_lea.hbm %s4266_s15, 8192 }
  0x34   : > { %p3960_p13 = scmp.ne.s32.totalorder %s4266_s15, %s3959_s17  ;;  %p3961_p0 = pneg %p4268_p11 }
  0x35   : > { %s3964_s12 = scalar_lea.hbm %s5490_s0, 16384  ;;  %p3965_p7 = scmp.lt.u32.totalorder %s4266_s15, %s5490_s0 }
  0x36   : > { %p3962_p3 = pnand %p3961_p0, %p3960_p13  ;;  %p3966_p9 = scmp.lt.u32.totalorder %s3964_s12, %s3959_s17 }
  0x37   : > { %p3968_p1 = scmp.lt.u32.totalorder %s3959_s17, %s4266_s15 }
  0x38   : > { %p3963_p5 = pneg %p3962_p3  ;;  %p3967_p2 = por %p3966_p9, %p3965_p7 }
  0x3a   : > { %p3969_p4 = por %p3968_p1, %p3967_p2 }
  0x3c   : > { %p3970_p6 = pnand %p3969_p4, %p3963_p5 }
  0x3e   : > { %3973 = shalt.err (!%p3970_p6)
}
  0x3f   : > { %s3974_s11 = scalar_lea.vmem %s4272_s6, 8192  ;;  %s4124_s14 = smov [#allocation2]  }
  0x40   : > { %p3975_p8 = scmp.ne.s32.totalorder %s4272_s6, %s3974_s11  ;;  %s3979_s28 = sshll.u32 %s4124_s14, 4  ;;  %s3980_s28 = int_to_ptr.vmem [resolvable:$false] %s3979_s28 }
  0x41   : > { %s3981_s27 = scalar_lea.vmem %s3980_s28, 16384  ;;  %p3982_p3 = scmp.lt.s32.totalorder %s4272_s6, %s3980_s28 }
  0x42   : > { %p3977_p10 = pnand %p3975_p8, %p3961_p0  ;;  %p3983_p7 = scmp.lt.s32.totalorder %s3981_s27, %s3974_s11 }
  0x44   : > { %p3978_p13 = pneg %p3977_p10  ;;  %p3984_p9 = por %p3983_p7, %p3982_p3 }
  0x46   : > { %p3985_p2 = pnand %p3984_p9, %p3978_p13 }
  0x48   : > { %3988 = shalt.err (!%p3985_p2)
}
  0x49   : > { %s4125_s17 = smov 128   ;;  %s4126_s8 = smov 8  }
  0x4a   : > { %3614 = dma.hbm_to_vmem [thread:$0]  (!%p4268_p11), %s4266_s15, 8192, %s4272_s6, %s4274_s16, %s4125_s17, %s4125_s17, %s4126_s8  }
  0x4b   : > { %p5506_p0 = scmp.ne.s32.totalorder %s5501_s26, 0 }
  0x4c   : > { %s4305_s12 = sand.u32 (!%p5506_p0), 1, %s4111_s19   ;;  %p5507_p5 = scmp.ne.s32.totalorder (!%p5506_p0), %s5499_s24, 0 }
  0x4d   : > { %230 = sbr.rel (%p5506_p0) target bundleno = 783 (0x30f), region = 32  ;;  %s3248_s13 = sshll.u32 (!%p5506_p0), %s4305_s12, 9 }
  0x4e   : > { %s233_s29 = scalar_lea.sflag (!%p5506_p0), [#allocation3], %s4305_s12  ;;  %s4311_s11 = scalar_lea.vmem (!%p5506_p0), [#allocation2], %s3248_s13 }
  0x54   : > { %4090 = dma.done.wait (%p5507_p5), %s233_s29, 8192  }
  0x55   : > { %4092 = vsyncadd (%p5507_p5), %s233_s29, 4294959104  ;;  %p5508_p11 = scmp.eq.s32.totalorder %s4185_s22, 0 }
  0x57   : > { %4094 = dma.done.wait (%p5508_p11), [#allocation6], 12288   ;;  %p5509_p1 = pmov %p5508_p11 }
  0x58   : > { %v3670_v0 = vld [vmem:[#allocation5 + $0x4] ss:$24 sps:$4 sm:$0xff]   ;;  %v3672_v1 = vld [vmem:[#allocation5] ss:$24 sps:$4 sm:$0xff]   ;;  %v3673_v2 = vld [vmem:[#allocation5 + $0x34] ss:$24 sps:$4 sm:$0xff]  }
  0x59   : > { %4096 = vsyncadd (%p5509_p1), [#allocation6], 4294955008  ;;  %1273 = vmatprep.subr.bf16.mxu0 %v3670_v0  ;;  %3563 = vmatprep.subr.bf16.mxu1 %v3670_v0  ;;  %v3675_v3 = vld [vmem:[#allocation5 + $0x30] ss:$24 sps:$4 sm:$0xff]   ;;  %v3676_v4 = vld [vmem:[#allocation5 + $0x64] ss:$24 sps:$4 sm:$0xff]  }
  0x5a   : > { %1274 = vmatpush1.bf16.msra.mxu0 %v3672_v1  ;;  %3579 = vmatpush1.bf16.msra.mxu1 %v3672_v1  ;;  %v3678_v5 = vld [vmem:[#allocation5 + $0x60] ss:$24 sps:$4 sm:$0xff]   ;;  %v3679_v6 = vld [vmem:[#allocation5 + $0x94] ss:$24 sps:$4 sm:$0xff]   ;;  %v3681_v7 = vld [vmem:[#allocation5 + $0x90] ss:$24 sps:$4 sm:$0xff]  }
  0x5b   : > { %1275 = vmatprep.subr.bf16.mxu0 %v3673_v2  ;;  %3564 = vmatprep.subr.bf16.mxu1 %v3673_v2  ;;  %v3682_v8 = vld [vmem:[#allocation5 + $0xc4] ss:$24 sps:$4 sm:$0xff]   ;;  %v3684_v9 = vld [vmem:[#allocation5 + $0xc0] ss:$24 sps:$4 sm:$0xff]   ;;  %v3685_v10 = vld [vmem:[#allocation5 + $0xf4] ss:$24 sps:$4 sm:$0xff]  }
  0x5c   : > { %v3687_v11 = vld [vmem:[#allocation5 + $0xf0] ss:$24 sps:$4 sm:$0xff]   ;;  %v3688_v12 = vld [vmem:[#allocation5 + $0x124] ss:$24 sps:$4 sm:$0xff]   ;;  %v3690_v14 = vld [vmem:[#allocation5 + $0x120] ss:$24 sps:$4 sm:$0xff]  }
  0x5d   : > { %v4322_v13 = vld [vmem:[%s4311_s11 + $0x4] ss:$8 sps:$4 sm:$0xff]   ;;  %v3693_v17 = vld [vmem:[#allocation5 + $0x150] ss:$24 sps:$4 sm:$0xff]   ;;  %v3696_v19 = vld [vmem:[#allocation5 + $0x180] ss:$24 sps:$4 sm:$0xff]  }
  0x5e   : > { %1276 = vmatpush1.bf16.msra.mxu0 %v3675_v3  ;;  %3580 = vmatpush1.bf16.msra.mxu1 %v3675_v3  ;;  %v3720_v15 = vld [vmem:[%s4311_s11 + $0x104] ss:$8 sps:$4 sm:$0xff]   ;;  %v3699_v21 = vld [vmem:[#allocation5 + $0x1b0] ss:$24 sps:$4 sm:$0xff]   ;;  %v3702_v23 = vld [vmem:[#allocation5 + $0x1e0] ss:$24 sps:$4 sm:$0xff]  }
  0x5f   : > { %1277 = vmatprep.subr.bf16.mxu0 %v3676_v4  ;;  %3565 = vmatprep.subr.bf16.mxu1 %v3676_v4  ;;  %v3691_v16 = vld [vmem:[#allocation5 + $0x154] ss:$24 sps:$4 sm:$0xff]   ;;  %v3694_v18 = vld [vmem:[#allocation5 + $0x184] ss:$24 sps:$4 sm:$0xff]   ;;  %v3705_v25 = vld [vmem:[#allocation5 + $0x210] ss:$24 sps:$4 sm:$0xff]  }
  0x60   : > { %1305 = vmatprep.mubr.bf16.mxu0 %v4322_v13  ;;  %1465 = vmatprep.mubr.bf16.mxu1 %v3720_v15  ;;  %v3697_v20 = vld [vmem:[#allocation5 + $0x1b4] ss:$24 sps:$4 sm:$0xff]   ;;  %v3700_v22 = vld [vmem:[#allocation5 + $0x1e4] ss:$24 sps:$4 sm:$0xff]   ;;  %v3708_v27 = vld [vmem:[#allocation5 + $0x240] ss:$24 sps:$4 sm:$0xff]  }
  0x61   : > { %v3703_v24 = vld [vmem:[#allocation5 + $0x214] ss:$24 sps:$4 sm:$0xff]   ;;  %v3706_v26 = vld [vmem:[#allocation5 + $0x244] ss:$24 sps:$4 sm:$0xff]   ;;  %v3711_v29 = vld [vmem:[#allocation5 + $0x270] ss:$24 sps:$4 sm:$0xff]  }
  0x62   : > { %1278 = vmatpush1.bf16.msra.mxu0 %v3678_v5  ;;  %3581 = vmatpush1.bf16.msra.mxu1 %v3678_v5  ;;  %v3709_v28 = vld [vmem:[#allocation5 + $0x274] ss:$24 sps:$4 sm:$0xff]   ;;  %v3712_v30 = vld [vmem:[#allocation5 + $0x2a4] ss:$24 sps:$4 sm:$0xff]   ;;  %v3714_v31 = vld [vmem:[#allocation5 + $0x2a0] ss:$24 sps:$4 sm:$0xff]  }
  0x63   : > { %1279 = vmatprep.subr.bf16.mxu0 %v3679_v6  ;;  %3566 = vmatprep.subr.bf16.mxu1 %v3679_v6  ;;  %v3715_v32 = vld [vmem:[#allocation5 + $0x2d4] ss:$24 sps:$4 sm:$0xff]   ;;  %v3717_v33 = vld [vmem:[#allocation5 + $0x2d0] ss:$24 sps:$4 sm:$0xff]   ;;  %v3741_v43 = vld [vmem:[#allocation5 + $0x44] ss:$24 sps:$4 sm:$0xff]  }
  0x64   : > { %v4327_v34 = vld [vmem:[%s4311_s11] ss:$8 sps:$4 sm:$0xff]   ;;  %v3726_v35 = vld [vmem:[#allocation5 + $0xc] ss:$24 sps:$4 sm:$0xff]   ;;  %v4331_v40 = vld [vmem:[%s4311_s11 + $0x14] ss:$8 sps:$4 sm:$0xff]  }
  0x65   : > { %v3729_v36 = vld [vmem:[#allocation5 + $0x14] ss:$24 sps:$4 sm:$0xff]   ;;  %v3723_v37 = vld [vmem:[%s4311_s11 + $0x100] ss:$8 sps:$4 sm:$0xff]   ;;  %v3736_v44 = vld [vmem:[#allocation5 + $0x38] ss:$24 sps:$4 sm:$0xff]  }
  0x66   : > { %1280 = vmatpush1.bf16.msra.mxu0 %v3681_v7  ;;  %3582 = vmatpush1.bf16.msra.mxu1 %v3681_v7  ;;  %v3724_v38 = vld [vmem:[#allocation5 + $0x8] ss:$24 sps:$4 sm:$0xff]   ;;  %v3732_v41 = vld [vmem:[%s4311_s11 + $0x114] ss:$8 sps:$4 sm:$0xff]   ;;  %v3750_v46 = vld [vmem:[#allocation5 + $0x6c] ss:$24 sps:$4 sm:$0xff]  }
  0x67   : > { %1281 = vmatprep.subr.bf16.mxu0 %v3682_v8  ;;  %3567 = vmatprep.subr.bf16.mxu1 %v3682_v8  ;;  %v3727_v39 = vld [vmem:[#allocation5 + $0x10] ss:$24 sps:$4 sm:$0xff]   ;;  %v3738_v42 = vld [vmem:[#allocation5 + $0x3c] ss:$24 sps:$4 sm:$0xff]   ;;  %v3739_v45 = vld [vmem:[#allocation5 + $0x40] ss:$24 sps:$4 sm:$0xff]  }
  0x68   : > { %v4337_v47 = vld [vmem:[%s4311_s11 + $0x10] ss:$8 sps:$4 sm:$0xff]   ;;  %v3753_v48 = vld [vmem:[#allocation5 + $0x74] ss:$24 sps:$4 sm:$0xff]   ;;  %v3748_v52 = vld [vmem:[#allocation5 + $0x68] ss:$24 sps:$4 sm:$0xff]  }
  0x69   : > { %v3735_v49 = vld [vmem:[%s4311_s11 + $0x110] ss:$8 sps:$4 sm:$0xff]   ;;  %v4341_v50 = vld [vmem:[%s4311_s11 + $0x24] ss:$8 sps:$4 sm:$0xff]   ;;  %v3762_v54 = vld [vmem:[#allocation5 + $0x9c] ss:$24 sps:$4 sm:$0xff]  }
  0x6a   : > { %1282 = vmatpush1.bf16.msra.mxu0 %v3684_v9  ;;  %3583 = vmatpush1.bf16.msra.mxu1 %v3684_v9  ;;  %v3744_v51 = vld [vmem:[%s4311_s11 + $0x124] ss:$8 sps:$4 sm:$0xff]   ;;  %v3751_v53 = vld [vmem:[#allocation5 + $0x70] ss:$24 sps:$4 sm:$0xff]   ;;  %v3763_v59 = vld [vmem:[#allocation5 + $0xa0] ss:$24 sps:$4 sm:$0xff]  }
  0x6b   : > { %1283 = vmatprep.subr.bf16.mxu0 %v3685_v10  ;;  %3568 = vmatprep.subr.bf16.mxu1 %v3685_v10  ;;  %v3765_v55 = vld [vmem:[#allocation5 + $0xa4] ss:$24 sps:$4 sm:$0xff]   ;;  %v3760_v56 = vld [vmem:[#allocation5 + $0x98] ss:$24 sps:$4 sm:$0xff]   ;;  %v4347_v57 = vld [vmem:[%s4311_s11 + $0x20] ss:$8 sps:$4 sm:$0xff]  }
  0x6c   : > { %v3747_v58 = vld [vmem:[%s4311_s11 + $0x120] ss:$8 sps:$4 sm:$0xff]   ;;  %v3774_v60 = vld [vmem:[#allocation5 + $0xcc] ss:$24 sps:$4 sm:$0xff]   ;;  %v4351_v62 = vld [vmem:[%s4311_s11 + $0x34] ss:$8 sps:$4 sm:$0xff]  }
  0x6d   : > { %v3777_v61 = vld [vmem:[#allocation5 + $0xd4] ss:$24 sps:$4 sm:$0xff]   ;;  %v3772_v0 = vld [vmem:[#allocation5 + $0xc8] ss:$24 sps:$4 sm:$0xff]   ;;  %v3789_v3 = vld [vmem:[#allocation5 + $0x104] ss:$24 sps:$4 sm:$0xff]  }
  0x6e   : > { %1284 = vmatpush1.bf16.msra.mxu0 %v3687_v11  ;;  %3584 = vmatpush1.bf16.msra.mxu1 %v3687_v11  ;;  %v3756_v63 = vld [vmem:[%s4311_s11 + $0x134] ss:$8 sps:$4 sm:$0xff]   ;;  %v3775_v1 = vld [vmem:[#allocation5 + $0xd0] ss:$24 sps:$4 sm:$0xff]   ;;  %v3787_v5 = vld [vmem:[#allocation5 + $0x100] ss:$24 sps:$4 sm:$0xff]  }
  0x6f   : > { %1285 = vmatprep.subr.bf16.mxu0 %v3688_v12  ;;  %3569 = vmatprep.subr.bf16.mxu1 %v3688_v12  ;;  %v3786_v2 = vld [vmem:[#allocation5 + $0xfc] ss:$24 sps:$4 sm:$0xff]   ;;  %v3784_v4 = vld [vmem:[#allocation5 + $0xf8] ss:$24 sps:$4 sm:$0xff]   ;;  %v3798_v8 = vld [vmem:[#allocation5 + $0x12c] ss:$24 sps:$4 sm:$0xff]  }
  0x70   : > { %v4357_v6 = vld [vmem:[%s4311_s11 + $0x30] ss:$8 sps:$4 sm:$0xff]   ;;  %v3801_v9 = vld [vmem:[#allocation5 + $0x134] ss:$24 sps:$4 sm:$0xff]   ;;  %v3796_v12 = vld [vmem:[#allocation5 + $0x128] ss:$24 sps:$4 sm:$0xff]  }
  0x71   : > { %v3759_v7 = vld [vmem:[%s4311_s11 + $0x130] ss:$8 sps:$4 sm:$0xff]   ;;  %v4361_v10 = vld [vmem:[%s4311_s11 + $0x44] ss:$8 sps:$4 sm:$0xff]   ;;  %v3810_v15 = vld [vmem:[#allocation5 + $0x15c] ss:$24 sps:$4 sm:$0xff]  }
  0x72   : > { %1286 = vmatpush1.bf16.msra.mxu0 %v3690_v14  ;;  %3585 = vmatpush1.bf16.msra.mxu1 %v3690_v14  ;;  %v4364_v11 = vld [vmem:[%s4311_s11 + $0x144] ss:$8 sps:$4 sm:$0xff]   ;;  %v3799_v14 = vld [vmem:[#allocation5 + $0x130] ss:$24 sps:$4 sm:$0xff]   ;;  %s4587_s15 = scalar_lea.vmem [#allocation7], %s3248_s13  ;;  %s3251_s6 = sshll.u32 %s4305_s12, 10 }
  0x73   : > { %1287 = vmatprep.subr.bf16.mxu0 %v3691_v16  ;;  %3570 = vmatprep.subr.bf16.mxu1 %v3691_v16  ;;  %v3813_v16 = vld [vmem:[#allocation5 + $0x164] ss:$24 sps:$4 sm:$0xff]   ;;  %s4844_s7 = scalar_lea.vmem [#allocation8], %s3251_s6  ;;  %s4847_s16 = scalar_lea.vmem [#allocation10], %s3251_s6 }
  0x74   : > { %s3558_s14 = sshll.u32 %s4185_s22, 13  ;;  %s3061_s28 = sshll.u32 %s4587_s15, 4  ;;  %s5124_s28 = int_to_ptr.vmem [resolvable:$true] %s3061_s28 }
  0x75   : > { %s5122_s8 = scalar_lea.hbm %s5493_s3, %s3558_s14  ;;  %s3037_s13 = scalar_lea.sflag [#allocation4], %s4305_s12 }
  0x76   : > { %1288 = vmatpush1.bf16.msra.mxu0 %v3693_v17  ;;  %3586 = vmatpush1.bf16.msra.mxu1 %v3693_v17  ;;  %v3808_v17 = vld [vmem:[#allocation5 + $0x158] ss:$24 sps:$4 sm:$0xff]   ;;  %s3989_s29 = scalar_lea.vmem %s5124_s28, 8192 }
  0x77   : > { %1289 = vmatprep.subr.bf16.mxu0 %v3694_v18  ;;  %3571 = vmatprep.subr.bf16.mxu1 %v3694_v18  ;;  %v4370_v18 = vld [vmem:[%s4311_s11 + $0x40] ss:$8 sps:$4 sm:$0xff]   ;;  %p3990_p4 = scmp.ne.s32.totalorder %s5124_s28, %s3989_s29 }
  0x79   : > { %p3991_p6 = pnand %p3990_p4, %p4257_p12 }
  0x7a   : > { %1290 = vmatpush1.bf16.msra.mxu0 %v3696_v19  ;;  %3587 = vmatpush1.bf16.msra.mxu1 %v3696_v19  ;;  %v4373_v19 = vld [vmem:[%s4311_s11 + $0x140] ss:$8 sps:$4 sm:$0xff]  }
  0x7b   : > { %1291 = vmatprep.subr.bf16.mxu0 %v3697_v20  ;;  %3572 = vmatprep.subr.bf16.mxu1 %v3697_v20  ;;  %v3811_v20 = vld [vmem:[#allocation5 + $0x160] ss:$24 sps:$4 sm:$0xff]   ;;  %p3992_p8 = pneg %p3991_p6 }
  0x7e   : > { %1292 = vmatpush1.bf16.msra.mxu0 %v3699_v21  ;;  %3588 = vmatpush1.bf16.msra.mxu1 %v3699_v21  ;;  %v3822_v21 = vld [vmem:[#allocation5 + $0x18c] ss:$24 sps:$4 sm:$0xff]  }
  0x7f   : > { %1293 = vmatprep.subr.bf16.mxu0 %v3700_v22  ;;  %3573 = vmatprep.subr.bf16.mxu1 %v3700_v22  ;;  %v3825_v22 = vld [vmem:[#allocation5 + $0x194] ss:$24 sps:$4 sm:$0xff]  }
  0x82   : > { %1294 = vmatpush1.bf16.msra.mxu0 %v3702_v23  ;;  %3589 = vmatpush1.bf16.msra.mxu1 %v3702_v23  ;;  %v4376_v23 = vld [vmem:[%s4311_s11 + $0x54] ss:$8 sps:$4 sm:$0xff]  }
  0x83   : > { %1295 = vmatprep.subr.bf16.mxu0 %v3703_v24  ;;  %3574 = vmatprep.subr.bf16.mxu1 %v3703_v24  ;;  %v4379_v24 = vld [vmem:[%s4311_s11 + $0x154] ss:$8 sps:$4 sm:$0xff]  }
  0x86   : > { %1296 = vmatpush1.bf16.msra.mxu0 %v3705_v25  ;;  %3590 = vmatpush1.bf16.msra.mxu1 %v3705_v25  ;;  %v3820_v25 = vld [vmem:[#allocation5 + $0x188] ss:$24 sps:$4 sm:$0xff]  }
  0x87   : > { %1297 = vmatprep.subr.bf16.mxu0 %v3706_v26  ;;  %3575 = vmatprep.subr.bf16.mxu1 %v3706_v26  ;;  %v3823_v26 = vld [vmem:[#allocation5 + $0x190] ss:$24 sps:$4 sm:$0xff]  }
  0x8a   : > { %1298 = vmatpush1.bf16.msra.mxu0 %v3708_v27  ;;  %3591 = vmatpush1.bf16.msra.mxu1 %v3708_v27  ;;  %v3834_v27 = vld [vmem:[#allocation5 + $0x1bc] ss:$24 sps:$4 sm:$0xff]  }
  0x8b   : > { %1299 = vmatprep.subr.bf16.mxu0 %v3709_v28  ;;  %3576 = vmatprep.subr.bf16.mxu1 %v3709_v28  ;;  %v3837_v28 = vld [vmem:[#allocation5 + $0x1c4] ss:$24 sps:$4 sm:$0xff]  }
  0x8e   : > { %1300 = vmatpush1.bf16.msra.mxu0 %v3711_v29  ;;  %3592 = vmatpush1.bf16.msra.mxu1 %v3711_v29  ;;  %v3832_v29 = vld [vmem:[#allocation5 + $0x1b8] ss:$24 sps:$4 sm:$0xff]  }
  0x8f   : > { %1301 = vmatprep.subr.bf16.mxu0 %v3712_v30  ;;  %3577 = vmatprep.subr.bf16.mxu1 %v3712_v30  ;;  %v3835_v30 = vld [vmem:[#allocation5 + $0x1c0] ss:$24 sps:$4 sm:$0xff]  }
  0x92   : > { %1302 = vmatpush1.bf16.msra.mxu0 %v3714_v31  ;;  %3593 = vmatpush1.bf16.msra.mxu1 %v3714_v31  ;;  %v4386_v31 = vld [vmem:[%s4311_s11 + $0x50] ss:$8 sps:$4 sm:$0xff]  }
  0x93   : > { %1303 = vmatprep.subr.bf16.mxu0 %v3715_v32  ;;  %3578 = vmatprep.subr.bf16.mxu1 %v3715_v32  ;;  %v4389_v32 = vld [vmem:[%s4311_s11 + $0x150] ss:$8 sps:$4 sm:$0xff]  }
  0x96   : > { %1304 = vmatpush1.bf16.msra.mxu0 %v3717_v33  ;;  %3594 = vmatpush1.bf16.msra.mxu1 %v3717_v33  ;;  %v3846_v33 = vld [vmem:[#allocation5 + $0x1ec] ss:$24 sps:$4 sm:$0xff]  }
  0x97   : > { %1626 = vmatprep.subr.bf16.mxu1 %v3726_v35  ;;  %1979 = vmatprep.subr.bf16.mxu0 %v3729_v36  ;;  %v3849_v35 = vld [vmem:[#allocation5 + $0x1f4] ss:$24 sps:$4 sm:$0xff]  }
  0x98   : > { %v4392_v36 = vld [vmem:[%s4311_s11 + $0x64] ss:$8 sps:$4 sm:$0xff]  }
  0x99   : > { %1306 = vmatmul.mubr.bf16.vlgmr.msra.gmra.mrb[0].mxu0 %v4327_v34  ;;  %1466 = vmatmul.mubr.bf16.vlgmr.msra.gmra.mrb[0].mxu1 %v3723_v37  ;;  %v4395_v37 = vld [vmem:[%s4311_s11 + $0x164] ss:$8 sps:$4 sm:$0xff]  }
  0x9a   : > { %1627 = vmatpush1.bf16.msra.mxu1 %v3724_v38  ;;  %1980 = vmatpush1.bf16.msra.mxu0 %v3727_v39  ;;  %v3844_v38 = vld [vmem:[#allocation5 + $0x1e8] ss:$24 sps:$4 sm:$0xff]  }
  0x9b   : > { %1315 = vmatprep.mubr.bf16.mxu0 %v4331_v40  ;;  %1475 = vmatprep.mubr.bf16.mxu1 %v3732_v41  ;;  %v3847_v39 = vld [vmem:[#allocation5 + $0x1f0] ss:$24 sps:$4 sm:$0xff]   ;;  %v3858_v41 = vld [vmem:[#allocation5 + $0x21c] ss:$24 sps:$4 sm:$0xff]  }
  0x9c   : > { %1628 = vmatprep.subr.bf16.mxu1 %v3738_v42  ;;  %1981 = vmatprep.subr.bf16.mxu0 %v3741_v43  ;;  %v3861_v42 = vld [vmem:[#allocation5 + $0x224] ss:$24 sps:$4 sm:$0xff]   ;;  %v3856_v43 = vld [vmem:[#allocation5 + $0x218] ss:$24 sps:$4 sm:$0xff]  }
  0x9e   : > { %1629 = vmatpush1.bf16.msra.mxu1 %v3736_v44  ;;  %1982 = vmatpush1.bf16.msra.mxu0 %v3739_v45  ;;  %v3859_v44 = vld [vmem:[#allocation5 + $0x220] ss:$24 sps:$4 sm:$0xff]   ;;  %v3870_v45 = vld [vmem:[#allocation5 + $0x24c] ss:$24 sps:$4 sm:$0xff]  }
  0x9f   : > { %1630 = vmatprep.subr.bf16.mxu1 %v3750_v46  ;;  %1983 = vmatprep.subr.bf16.mxu0 %v3753_v48  ;;  %v3873_v46 = vld [vmem:[#allocation5 + $0x254] ss:$24 sps:$4 sm:$0xff]   ;;  %v4402_v48 = vld [vmem:[%s4311_s11 + $0x60] ss:$8 sps:$4 sm:$0xff]  }
  0xa1   : > { %1316 = vmatmul.mubr.bf16.gmra.mrb[4].mxu0 %v4337_v47  ;;  %1476 = vmatmul.mubr.bf16.gmra.mrb[4].mxu1 %v3735_v49  ;;  %v4405_v49 = vld [vmem:[%s4311_s11 + $0x160] ss:$8 sps:$4 sm:$0xff]  }
  0xa2   : > { %1325 = vmatprep.mubr.bf16.mxu0 %v4341_v50  ;;  %1485 = vmatprep.mubr.bf16.mxu1 %v3744_v51  ;;  %v4408_v51 = vld [vmem:[%s4311_s11 + $0x74] ss:$8 sps:$4 sm:$0xff]  }
  0xa3   : > { %1631 = vmatpush1.bf16.msra.mxu1 %v3748_v52  ;;  %1984 = vmatpush1.bf16.msra.mxu0 %v3751_v53  ;;  %v4411_v52 = vld [vmem:[%s4311_s11 + $0x174] ss:$8 sps:$4 sm:$0xff]   ;;  %v3868_v53 = vld [vmem:[#allocation5 + $0x248] ss:$24 sps:$4 sm:$0xff]  }
  0xa4   : > { %1632 = vmatprep.subr.bf16.mxu1 %v3762_v54  ;;  %1985 = vmatprep.subr.bf16.mxu0 %v3765_v55  ;;  %v3871_v54 = vld [vmem:[#allocation5 + $0x250] ss:$24 sps:$4 sm:$0xff]   ;;  %v3882_v55 = vld [vmem:[#allocation5 + $0x27c] ss:$24 sps:$4 sm:$0xff]  }
  0xa7   : > { %1633 = vmatpush1.bf16.msra.mxu1 %v3760_v56  ;;  %1986 = vmatpush1.bf16.msra.mxu0 %v3763_v59  ;;  %v3885_v56 = vld [vmem:[#allocation5 + $0x284] ss:$24 sps:$4 sm:$0xff]   ;;  %v3883_v59 = vld [vmem:[#allocation5 + $0x280] ss:$24 sps:$4 sm:$0xff]  }
  0xa8   : > { %1634 = vmatprep.subr.bf16.mxu1 %v3774_v60  ;;  %1987 = vmatprep.subr.bf16.mxu0 %v3777_v61  ;;  %v3894_v60 = vld [vmem:[#allocation5 + $0x2ac] ss:$24 sps:$4 sm:$0xff]  }
  0xa9   : > { %1326 = vmatmul.mubr.bf16.gmra.mrb[8].mxu0 %v4347_v57  ;;  %1486 = vmatmul.mubr.bf16.gmra.mrb[8].mxu1 %v3747_v58  ;;  %v3880_v58 = vld [vmem:[#allocation5 + $0x278] ss:$24 sps:$4 sm:$0xff]   ;;  %v3897_v61 = vld [vmem:[#allocation5 + $0x2b4] ss:$24 sps:$4 sm:$0xff]  }
  0xaa   : > { %1335 = vmatprep.mubr.bf16.mxu0 %v4351_v62  ;;  %1495 = vmatprep.mubr.bf16.mxu1 %v3756_v63  ;;  %v4418_v63 = vld [vmem:[%s4311_s11 + $0x70] ss:$8 sps:$4 sm:$0xff]  }
  0xab   : > { %1635 = vmatpush1.bf16.msra.mxu1 %v3772_v0  ;;  %1988 = vmatpush1.bf16.msra.mxu0 %v3775_v1  ;;  %v4421_v0 = vld [vmem:[%s4311_s11 + $0x170] ss:$8 sps:$4 sm:$0xff]   ;;  %v4424_v1 = vld [vmem:[%s4311_s11 + $0x84] ss:$8 sps:$4 sm:$0xff]  }
  0xac   : > { %1636 = vmatprep.subr.bf16.mxu1 %v3786_v2  ;;  %1989 = vmatprep.subr.bf16.mxu0 %v3789_v3  ;;  %v4427_v2 = vld [vmem:[%s4311_s11 + $0x184] ss:$8 sps:$4 sm:$0xff]   ;;  %v3892_v3 = vld [vmem:[#allocation5 + $0x2a8] ss:$24 sps:$4 sm:$0xff]  }
  0xaf   : > { %1637 = vmatpush1.bf16.msra.mxu1 %v3784_v4  ;;  %1990 = vmatpush1.bf16.msra.mxu0 %v3787_v5  ;;  %v3895_v4 = vld [vmem:[#allocation5 + $0x2b0] ss:$24 sps:$4 sm:$0xff]   ;;  %v3906_v5 = vld [vmem:[#allocation5 + $0x2dc] ss:$24 sps:$4 sm:$0xff]  }
  0xb0   : > { %1638 = vmatprep.subr.bf16.mxu1 %v3798_v8  ;;  %1991 = vmatprep.subr.bf16.mxu0 %v3801_v9  ;;  %v3904_v8 = vld [vmem:[#allocation5 + $0x2d8] ss:$24 sps:$4 sm:$0xff]  }
  0xb1   : > { %1336 = vmatmul.mubr.bf16.gmra.mrb[12].mxu0 %v4357_v6  ;;  %1496 = vmatmul.mubr.bf16.gmra.mrb[12].mxu1 %v3759_v7  ;;  %v3909_v7 = vld [vmem:[#allocation5 + $0x2e4] ss:$24 sps:$4 sm:$0xff]   ;;  %v3907_v9 = vld [vmem:[#allocation5 + $0x2e0] ss:$24 sps:$4 sm:$0xff]  }
  0xb2   : > { %1345 = vmatprep.mubr.bf16.mxu0 %v4361_v10  ;;  %1505 = vmatprep.mubr.bf16.mxu1 %v4364_v11 }
  0xb3   : > { %1639 = vmatpush1.bf16.msra.mxu1 %v3796_v12  ;;  %1992 = vmatpush1.bf16.msra.mxu0 %v3799_v14  ;;  %v4434_v12 = vld [vmem:[%s4311_s11 + $0x80] ss:$8 sps:$4 sm:$0xff]  }
  0xb4   : > { %1640 = vmatprep.subr.bf16.mxu1 %v3810_v15  ;;  %1993 = vmatprep.subr.bf16.mxu0 %v3813_v16  ;;  %v4437_v14 = vld [vmem:[%s4311_s11 + $0x180] ss:$8 sps:$4 sm:$0xff]   ;;  %v4440_v15 = vld [vmem:[%s4311_s11 + $0x94] ss:$8 sps:$4 sm:$0xff]  }
  0xb5   : > { %v4443_v16 = vld [vmem:[%s4311_s11 + $0x194] ss:$8 sps:$4 sm:$0xff]  }
  0xb7   : > { %1641 = vmatpush1.bf16.msra.mxu1 %v3808_v17  ;;  %1994 = vmatpush1.bf16.msra.mxu0 %v3811_v20  ;;  %v4450_v17 = vld [vmem:[%s4311_s11 + $0x90] ss:$8 sps:$4 sm:$0xff]  }
  0xb8   : > { %1642 = vmatprep.subr.bf16.mxu1 %v3822_v21  ;;  %1995 = vmatprep.subr.bf16.mxu0 %v3825_v22  ;;  %v3831_v20 = vld [vmem:[%s4311_s11 + $0x190] ss:$8 sps:$4 sm:$0xff]   ;;  %v4454_v21 = vld [vmem:[%s4311_s11 + $0xa4] ss:$8 sps:$4 sm:$0xff]  }
  0xb9   : > { %1346 = vmatmul.mubr.bf16.gmra.mrb[16].mxu0 %v4370_v18  ;;  %1506 = vmatmul.mubr.bf16.gmra.mrb[16].mxu1 %v4373_v19  ;;  %v3840_v22 = vld [vmem:[%s4311_s11 + $0x1a4] ss:$8 sps:$4 sm:$0xff]  }
  0xba   : > { %1355 = vmatprep.mubr.bf16.mxu0 %v4376_v23  ;;  %1515 = vmatprep.mubr.bf16.mxu1 %v4379_v24 }
  0xbb   : > { %1643 = vmatpush1.bf16.msra.mxu1 %v3820_v25  ;;  %1996 = vmatpush1.bf16.msra.mxu0 %v3823_v26  ;;  %v4460_v25 = vld [vmem:[%s4311_s11 + $0xa0] ss:$8 sps:$4 sm:$0xff]  }
  0xbc   : > { %1644 = vmatprep.subr.bf16.mxu1 %v3834_v27  ;;  %1997 = vmatprep.subr.bf16.mxu0 %v3837_v28  ;;  %v3843_v26 = vld [vmem:[%s4311_s11 + $0x1a0] ss:$8 sps:$4 sm:$0xff]   ;;  %v4464_v27 = vld [vmem:[%s4311_s11 + $0xb4] ss:$8 sps:$4 sm:$0xff]  }
  0xbd   : > { %v3852_v28 = vld [vmem:[%s4311_s11 + $0x1b4] ss:$8 sps:$4 sm:$0xff]  }
  0xbf   : > { %1645 = vmatpush1.bf16.msra.mxu1 %v3832_v29  ;;  %1998 = vmatpush1.bf16.msra.mxu0 %v3835_v30  ;;  %v4470_v29 = vld [vmem:[%s4311_s11 + $0xb0] ss:$8 sps:$4 sm:$0xff]  }
  0xc0   : > { %1646 = vmatprep.subr.bf16.mxu1 %v3846_v33  ;;  %1999 = vmatprep.subr.bf16.mxu0 %v3849_v35  ;;  %v3855_v30 = vld [vmem:[%s4311_s11 + $0x1b0] ss:$8 sps:$4 sm:$0xff]   ;;  %v4474_v33 = vld [vmem:[%s4311_s11 + $0xc4] ss:$8 sps:$4 sm:$0xff]  }
  0xc1   : > { %1356 = vmatmul.mubr.bf16.gmra.mrb[20].mxu0 %v4386_v31  ;;  %1516 = vmatmul.mubr.bf16.gmra.mrb[20].mxu1 %v4389_v32  ;;  %v3864_v35 = vld [vmem:[%s4311_s11 + $0x1c4] ss:$8 sps:$4 sm:$0xff]  }
  0xc2   : > { %1365 = vmatprep.mubr.bf16.mxu0 %v4392_v36  ;;  %1525 = vmatprep.mubr.bf16.mxu1 %v4395_v37 }
  0xc3   : > { %1647 = vmatpush1.bf16.msra.mxu1 %v3844_v38  ;;  %2000 = vmatpush1.bf16.msra.mxu0 %v3847_v39  ;;  %v4480_v38 = vld [vmem:[%s4311_s11 + $0xc0] ss:$8 sps:$4 sm:$0xff]  }
  0xc4   : > { %1648 = vmatprep.subr.bf16.mxu1 %v3858_v41  ;;  %2001 = vmatprep.subr.bf16.mxu0 %v3861_v42  ;;  %v3867_v39 = vld [vmem:[%s4311_s11 + $0x1c0] ss:$8 sps:$4 sm:$0xff]   ;;  %v4484_v41 = vld [vmem:[%s4311_s11 + $0xd4] ss:$8 sps:$4 sm:$0xff]  }
  0xc5   : > { %v3876_v42 = vld [vmem:[%s4311_s11 + $0x1d4] ss:$8 sps:$4 sm:$0xff]  }
  0xc7   : > { %1649 = vmatpush1.bf16.msra.mxu1 %v3856_v43  ;;  %2002 = vmatpush1.bf16.msra.mxu0 %v3859_v44  ;;  %v4490_v43 = vld [vmem:[%s4311_s11 + $0xd0] ss:$8 sps:$4 sm:$0xff]  }
  0xc8   : > { %1650 = vmatprep.subr.bf16.mxu1 %v3870_v45  ;;  %2003 = vmatprep.subr.bf16.mxu0 %v3873_v46  ;;  %v3879_v44 = vld [vmem:[%s4311_s11 + $0x1d0] ss:$8 sps:$4 sm:$0xff]   ;;  %v4494_v45 = vld [vmem:[%s4311_s11 + $0xe4] ss:$8 sps:$4 sm:$0xff]  }
  0xc9   : > { %1366 = vmatmul.mubr.bf16.gmra.mrb[24].mxu0 %v4402_v48  ;;  %1526 = vmatmul.mubr.bf16.gmra.mrb[24].mxu1 %v4405_v49  ;;  %v3888_v46 = vld [vmem:[%s4311_s11 + $0x1e4] ss:$8 sps:$4 sm:$0xff]  }
  0xca   : > { %1375 = vmatprep.mubr.bf16.mxu0 %v4408_v51  ;;  %1535 = vmatprep.mubr.bf16.mxu1 %v4411_v52 }
  0xcb   : > { %1651 = vmatpush1.bf16.msra.mxu1 %v3868_v53  ;;  %2004 = vmatpush1.bf16.msra.mxu0 %v3871_v54  ;;  %v4500_v53 = vld [vmem:[%s4311_s11 + $0xe0] ss:$8 sps:$4 sm:$0xff]  }
  0xcc   : > { %1652 = vmatprep.subr.bf16.mxu1 %v3882_v55  ;;  %2005 = vmatprep.subr.bf16.mxu0 %v3885_v56  ;;  %v3891_v54 = vld [vmem:[%s4311_s11 + $0x1e0] ss:$8 sps:$4 sm:$0xff]   ;;  %v4504_v55 = vld [vmem:[%s4311_s11 + $0xf4] ss:$8 sps:$4 sm:$0xff]  }
  0xcd   : > { %v3900_v56 = vld [vmem:[%s4311_s11 + $0x1f4] ss:$8 sps:$4 sm:$0xff]  }
  0xcf   : > { %1653 = vmatpush1.bf16.msra.mxu1 %v3880_v58  ;;  %2006 = vmatpush1.bf16.msra.mxu0 %v3883_v59  ;;  %v4510_v58 = vld [vmem:[%s4311_s11 + $0xf0] ss:$8 sps:$4 sm:$0xff]  }
  0xd0   : > { %1654 = vmatprep.subr.bf16.mxu1 %v3894_v60  ;;  %2007 = vmatprep.subr.bf16.mxu0 %v3897_v61  ;;  %v3903_v59 = vld [vmem:[%s4311_s11 + $0x1f0] ss:$8 sps:$4 sm:$0xff]  }
  0xd1   : > { %1376 = vmatmul.mubr.bf16.gmra.mrb[28].mxu0 %v4418_v63  ;;  %1536 = vmatmul.mubr.bf16.gmra.mrb[28].mxu1 %v4421_v0 }
  0xd2   : > { %1385 = vmatprep.mubr.bf16.mxu0 %v4424_v1  ;;  %1545 = vmatprep.mubr.bf16.mxu1 %v4427_v2 }
  0xd3   : > { %1655 = vmatpush1.bf16.msra.mxu1 %v3892_v3  ;;  %2008 = vmatpush1.bf16.msra.mxu0 %v3895_v4 }
  0xd4   : > { %1656 = vmatprep.subr.bf16.mxu1 %v3906_v5  ;;  %2009 = vmatprep.subr.bf16.mxu0 %v3909_v7 }
  0xd7   : > { %1657 = vmatpush1.bf16.msra.mxu1 %v3904_v8  ;;  %2010 = vmatpush1.bf16.msra.mxu0 %v3907_v9 }
  0xd9   : > { %1386 = vmatmul.mubr.bf16.gmra.mrb[32].mxu0 %v4434_v12  ;;  %1546 = vmatmul.mubr.bf16.gmra.mrb[32].mxu1 %v4437_v14 }
  0xda   : > { %1395 = vmatprep.mubr.bf16.mxu0 %v4440_v15  ;;  %1555 = vmatprep.mubr.bf16.mxu1 %v4443_v16 }
  0xe1   : > { %1396 = vmatmul.mubr.bf16.gmra.mrb[36].mxu0 %v4450_v17  ;;  %1556 = vmatmul.mubr.bf16.gmra.mrb[36].mxu1 %v3831_v20 }
  0xe2   : > { %1405 = vmatprep.mubr.bf16.mxu0 %v4454_v21  ;;  %1565 = vmatprep.mubr.bf16.mxu1 %v3840_v22 }
  0xe9   : > { %1406 = vmatmul.mubr.bf16.gmra.mrb[40].mxu0 %v4460_v25  ;;  %1566 = vmatmul.mubr.bf16.gmra.mrb[40].mxu1 %v3843_v26 }
  0xea   : > { %1415 = vmatprep.mubr.bf16.mxu0 %v4464_v27  ;;  %1575 = vmatprep.mubr.bf16.mxu1 %v3852_v28 }
  0xf1   : > { %1416 = vmatmul.mubr.bf16.gmra.mrb[44].mxu0 %v4470_v29  ;;  %1576 = vmatmul.mubr.bf16.gmra.mrb[44].mxu1 %v3855_v30 }
  0xf2   : > { %1425 = vmatprep.mubr.bf16.mxu0 %v4474_v33  ;;  %1585 = vmatprep.mubr.bf16.mxu1 %v3864_v35 }
  0xf9   : > { %1426 = vmatmul.mubr.bf16.gmra.mrb[48].mxu0 %v4480_v38  ;;  %1586 = vmatmul.mubr.bf16.gmra.mrb[48].mxu1 %v3867_v39 }
  0xfa   : > { %1435 = vmatprep.mubr.bf16.mxu0 %v4484_v41  ;;  %1595 = vmatprep.mubr.bf16.mxu1 %v3876_v42 }
 0x101   : > { %1436 = vmatmul.mubr.bf16.gmra.mrb[52].mxu0 %v4490_v43  ;;  %1596 = vmatmul.mubr.bf16.gmra.mrb[52].mxu1 %v3879_v44 }
 0x102   : > { %1445 = vmatprep.mubr.bf16.mxu0 %v4494_v45  ;;  %1605 = vmatprep.mubr.bf16.mxu1 %v3888_v46 }
 0x109   : > { %1446 = vmatmul.mubr.bf16.gmra.mrb[56].mxu0 %v4500_v53  ;;  %1606 = vmatmul.mubr.bf16.gmra.mrb[56].mxu1 %v3891_v54 }
 0x10a   : > { %1455 = vmatprep.mubr.bf16.mxu0 %v4504_v55  ;;  %1615 = vmatprep.mubr.bf16.mxu1 %v3900_v56 }
 0x111   : > { %1456 = vmatmul.mubr.bf16.gmra.mrb[60].mxu0 %v4510_v58  ;;  %1616 = vmatmul.mubr.bf16.gmra.mrb[60].mxu1 %v3903_v59 }
 0x112   : > { %1658 = vmatprep.mubr.bf16.mxu1 %v4322_v13  ;;  %2011 = vmatprep.mubr.bf16.mxu0 %v4322_v13  ;;  %v443_v13 = vlaneseq }
 0x119   : > { %1659 = vmatmul.mubr.bf16.vlgmr.msra.gmra.mrb[64].mxu1 %v4327_v34  ;;  %2012 = vmatmul.mubr.bf16.vlgmr.msra.gmra.mrb[64].mxu0 %v4327_v34  ;;  %v4554_v34 = vshrl.u32 %v443_v13, 7 }
 0x11a   : > { %1668 = vmatprep.mubr.bf16.mxu1 %v4331_v40  ;;  %2021 = vmatprep.mubr.bf16.mxu0 %v4331_v40 }
 0x11b   : > { %v445_v40 = vsub.s32 0, %v4554_v34 }
 0x121   : > { %1669 = vmatmul.mubr.bf16.gmra.mrb[68].mxu1 %v4337_v47  ;;  %2022 = vmatmul.mubr.bf16.gmra.mrb[68].mxu0 %v4337_v47  ;;  %v4562_v47 = vld [vmem:[%s5492_s2] sm:$0x3f] }
 0x122   : > { %1678 = vmatprep.mubr.bf16.mxu1 %v4341_v50  ;;  %2031 = vmatprep.mubr.bf16.mxu0 %v4341_v50  ;;  %v449_v50 = vsub.s32 1, %v4554_v34 }
 0x129   : > { %1679 = vmatmul.mubr.bf16.gmra.mrb[72].mxu1 %v4347_v57  ;;  %2032 = vmatmul.mubr.bf16.gmra.mrb[72].mxu0 %v4347_v57  ;;  %v4568_v57 = vrot.slane %v4562_v47, %v445_v40 }
 0x12a   : > { %1688 = vmatprep.mubr.bf16.mxu1 %v4351_v62  ;;  %2041 = vmatprep.mubr.bf16.mxu0 %v4351_v62  ;;  %v4571_v62 = vrot.slane %v4562_v47, %v449_v50 }
 0x131   : > { %1689 = vmatmul.mubr.bf16.gmra.mrb[76].mxu1 %v4357_v6  ;;  %2042 = vmatmul.mubr.bf16.gmra.mrb[76].mxu0 %v4357_v6 }
 0x132   : > { %1698 = vmatprep.mubr.bf16.mxu1 %v4361_v10  ;;  %2051 = vmatprep.mubr.bf16.mxu0 %v4361_v10 }
 0x139   : > { %1699 = vmatmul.mubr.bf16.gmra.mrb[80].mxu1 %v4370_v18  ;;  %2052 = vmatmul.mubr.bf16.gmra.mrb[80].mxu0 %v4370_v18 }
 0x13a   : > { %1708 = vmatprep.mubr.bf16.mxu1 %v4376_v23  ;;  %2061 = vmatprep.mubr.bf16.mxu0 %v4376_v23 }
 0x141   : > { %1709 = vmatmul.mubr.bf16.gmra.mrb[84].mxu1 %v4386_v31  ;;  %2062 = vmatmul.mubr.bf16.gmra.mrb[84].mxu0 %v4386_v31 }
 0x142   : > { %1718 = vmatprep.mubr.bf16.mxu1 %v4392_v36  ;;  %2071 = vmatprep.mubr.bf16.mxu0 %v4392_v36 }
 0x149   : > { %1719 = vmatmul.mubr.bf16.gmra.mrb[88].mxu1 %v4402_v48  ;;  %2072 = vmatmul.mubr.bf16.gmra.mrb[88].mxu0 %v4402_v48 }
 0x14a   : > { %1728 = vmatprep.mubr.bf16.mxu1 %v4408_v51  ;;  %2081 = vmatprep.mubr.bf16.mxu0 %v4408_v51 }
 0x151   : > { %1729 = vmatmul.mubr.bf16.gmra.mrb[92].mxu1 %v4418_v63  ;;  %2082 = vmatmul.mubr.bf16.gmra.mrb[92].mxu0 %v4418_v63 }
 0x152   : > { %1738 = vmatprep.mubr.bf16.mxu1 %v4424_v1  ;;  %2091 = vmatprep.mubr.bf16.mxu0 %v4424_v1 }
 0x159   : > { %1739 = vmatmul.mubr.bf16.gmra.mrb[96].mxu1 %v4434_v12  ;;  %2092 = vmatmul.mubr.bf16.gmra.mrb[96].mxu0 %v4434_v12 }
 0x15a   : > { %1748 = vmatprep.mubr.bf16.mxu1 %v4440_v15  ;;  %2101 = vmatprep.mubr.bf16.mxu0 %v4440_v15 }
 0x161   : > { %1749 = vmatmul.mubr.bf16.gmra.mrb[100].mxu1 %v4450_v17  ;;  %2102 = vmatmul.mubr.bf16.gmra.mrb[100].mxu0 %v4450_v17 }
 0x162   : > { %1758 = vmatprep.mubr.bf16.mxu1 %v4454_v21  ;;  %2111 = vmatprep.mubr.bf16.mxu0 %v4454_v21 }
 0x169   : > { %1759 = vmatmul.mubr.bf16.gmra.mrb[104].mxu1 %v4460_v25  ;;  %2112 = vmatmul.mubr.bf16.gmra.mrb[104].mxu0 %v4460_v25 }
 0x16a   : > { %1768 = vmatprep.mubr.bf16.mxu1 %v4464_v27  ;;  %2121 = vmatprep.mubr.bf16.mxu0 %v4464_v27 }
 0x16c   : > { %v1307_v6 = vpop.f32.mrb[0].mxu0  ;;  %v1467_v10 = vpop.f32.mrb[0].mxu1 }
 0x16d   : > { %v1308_v18 = vadd.f32 %v1307_v6, %v4568_v57  ;;  %v1468_v23 = vadd.f32 %v1467_v10, %v4568_v57  ;;  %v1309_v31 = vpop.f32.mrb[1].mxu0  ;;  %v1469_v36 = vpop.f32.mrb[1].mxu1 }
 0x16e   : > { %v1310_v48 = vadd.f32 %v1309_v31, %v4571_v62  ;;  %v1470_v51 = vadd.f32 %v1469_v36, %v4571_v62  ;;  %v1311_v60 = vpop.f32.mrb[2].mxu0  ;;  %v1471_v61 = vpop.f32.mrb[2].mxu1 }
 0x16f   : > { %v1312_v63 = vadd.f32 %v1311_v60, %v4568_v57  ;;  %v1472_v1 = vadd.f32 %v1471_v61, %v4568_v57  ;;  %v1313_v3 = vpop.f32.mrb[3].mxu0  ;;  %v1473_v4 = vpop.f32.mrb[3].mxu1 }
 0x170   : > { %v3493_v5 = vpack.c.bf16 %v1310_v48, %v1308_v18  ;;  %v3525_v7 = vpack.c.bf16 %v1470_v51, %v1468_v23  ;;  %v1314_v8 = vadd.f32 %v1313_v3, %v4571_v62  ;;  %v1474_v9 = vadd.f32 %v1473_v4, %v4571_v62 }
 0x171   : > { %1769 = vmatmul.mubr.bf16.gmra.mrb[108].mxu1 %v4470_v29  ;;  %2122 = vmatmul.mubr.bf16.gmra.mrb[108].mxu0 %v4470_v29 }
 0x172   : > { %2716 = vst [vmem:[%s4587_s15] sm:$0xff] %v3493_v5  ;;  %2748 = vst [vmem:[%s4587_s15 + $0x100] sm:$0xff] %v3525_v7  ;;  %v3494_v12 = vpack.c.bf16 %v1314_v8, %v1312_v63  ;;  %v3526_v15 = vpack.c.bf16 %v1474_v9, %v1472_v1  ;;  %1778 = vmatprep.mubr.bf16.mxu1 %v4474_v33  ;;  %2131 = vmatprep.mubr.bf16.mxu0 %v4474_v33 }
 0x174   : > { %2717 = vst [vmem:[%s4587_s15 + $0x8] sm:$0xff] %v3494_v12  ;;  %2749 = vst [vmem:[%s4587_s15 + $0x108] sm:$0xff] %v3526_v15  ;;  %v1317_v17 = vpop.f32.mrb[4].mxu0  ;;  %v1477_v20 = vpop.f32.mrb[4].mxu1 }
 0x175   : > { %v1318_v21 = vadd.f32 %v1317_v17, %v4568_v57  ;;  %v1478_v22 = vadd.f32 %v1477_v20, %v4568_v57  ;;  %v1319_v25 = vpop.f32.mrb[5].mxu0  ;;  %v1479_v26 = vpop.f32.mrb[5].mxu1 }
 0x176   : > { %v1320_v27 = vadd.f32 %v1319_v25, %v4571_v62  ;;  %v1480_v28 = vadd.f32 %v1479_v26, %v4571_v62  ;;  %v1321_v29 = vpop.f32.mrb[6].mxu0  ;;  %v1481_v30 = vpop.f32.mrb[6].mxu1 }
 0x177   : > { %v1322_v33 = vadd.f32 %v1321_v29, %v4568_v57  ;;  %v1482_v35 = vadd.f32 %v1481_v30, %v4568_v57  ;;  %v1323_v39 = vpop.f32.mrb[7].mxu0  ;;  %v1483_v42 = vpop.f32.mrb[7].mxu1 }
 0x178   : > { %v3495_v44 = vpack.c.bf16 %v1320_v27, %v1318_v21  ;;  %v3527_v46 = vpack.c.bf16 %v1480_v28, %v1478_v22  ;;  %v1324_v54 = vadd.f32 %v1323_v39, %v4571_v62  ;;  %v1484_v56 = vadd.f32 %v1483_v42, %v4571_v62 }
 0x179   : > { %1779 = vmatmul.mubr.bf16.gmra.mrb[112].mxu1 %v4480_v38  ;;  %2132 = vmatmul.mubr.bf16.gmra.mrb[112].mxu0 %v4480_v38 }
 0x17a   : > { %2718 = vst [vmem:[%s4587_s15 + $0x10] sm:$0xff] %v3495_v44  ;;  %2750 = vst [vmem:[%s4587_s15 + $0x110] sm:$0xff] %v3527_v46  ;;  %v3496_v59 = vpack.c.bf16 %v1324_v54, %v1322_v33  ;;  %v3528_v13 = vpack.c.bf16 %v1484_v56, %v1482_v35  ;;  %1788 = vmatprep.mubr.bf16.mxu1 %v4484_v41  ;;  %2141 = vmatprep.mubr.bf16.mxu0 %v4484_v41 }
 0x17c   : > { %2719 = vst [vmem:[%s4587_s15 + $0x18] sm:$0xff] %v3496_v59  ;;  %2751 = vst [vmem:[%s4587_s15 + $0x118] sm:$0xff] %v3528_v13  ;;  %v1327_v40 = vpop.f32.mrb[8].mxu0  ;;  %v1487_v50 = vpop.f32.mrb[8].mxu1 }
 0x17d   : > { %v1328_v6 = vadd.f32 %v1327_v40, %v4568_v57  ;;  %v1488_v10 = vadd.f32 %v1487_v50, %v4568_v57  ;;  %v1329_v18 = vpop.f32.mrb[9].mxu0  ;;  %v1489_v23 = vpop.f32.mrb[9].mxu1 }
 0x17e   : > { %v1330_v38 = vadd.f32 %v1329_v18, %v4571_v62  ;;  %v1490_v31 = vadd.f32 %v1489_v23, %v4571_v62  ;;  %v1331_v36 = vpop.f32.mrb[10].mxu0  ;;  %v1491_v48 = vpop.f32.mrb[10].mxu1 }
 0x17f   : > { %v1332_v41 = vadd.f32 %v1331_v36, %v4568_v57  ;;  %v1492_v51 = vadd.f32 %v1491_v48, %v4568_v57  ;;  %v1333_v60 = vpop.f32.mrb[11].mxu0  ;;  %v1493_v61 = vpop.f32.mrb[11].mxu1 }
 0x180   : > { %v3497_v63 = vpack.c.bf16 %v1330_v38, %v1328_v6  ;;  %v3529_v1 = vpack.c.bf16 %v1490_v31, %v1488_v10  ;;  %v1334_v3 = vadd.f32 %v1333_v60, %v4571_v62  ;;  %v1494_v4 = vadd.f32 %v1493_v61, %v4571_v62  ;;  %v3910_v60 = vld [vmem:[%s4311_s11 + $0x104] ss:$8 sps:$4 sm:$0xff]  }
 0x181   : > { %1789 = vmatmul.mubr.bf16.gmra.mrb[116].mxu1 %v4490_v43  ;;  %2142 = vmatmul.mubr.bf16.gmra.mrb[116].mxu0 %v4490_v43 }
 0x182   : > { %2720 = vst [vmem:[%s4587_s15 + $0x20] sm:$0xff] %v3497_v63  ;;  %2752 = vst [vmem:[%s4587_s15 + $0x120] sm:$0xff] %v3529_v1  ;;  %v3498_v5 = vpack.c.bf16 %v1334_v3, %v1332_v41  ;;  %v3530_v7 = vpack.c.bf16 %v1494_v4, %v1492_v51  ;;  %1798 = vmatprep.mubr.bf16.mxu1 %v4494_v45  ;;  %2151 = vmatprep.mubr.bf16.mxu0 %v4494_v45 }
 0x184   : > { %2721 = vst [vmem:[%s4587_s15 + $0x28] sm:$0xff] %v3498_v5  ;;  %2753 = vst [vmem:[%s4587_s15 + $0x128] sm:$0xff] %v3530_v7  ;;  %v1337_v8 = vpop.f32.mrb[12].mxu0  ;;  %v1497_v9 = vpop.f32.mrb[12].mxu1 }
 0x185   : > { %v1338_v12 = vadd.f32 %v1337_v8, %v4568_v57  ;;  %v1498_v15 = vadd.f32 %v1497_v9, %v4568_v57  ;;  %v1339_v17 = vpop.f32.mrb[13].mxu0  ;;  %v1499_v20 = vpop.f32.mrb[13].mxu1 }
 0x186   : > { %v1340_v43 = vadd.f32 %v1339_v17, %v4571_v62  ;;  %v1500_v21 = vadd.f32 %v1499_v20, %v4571_v62  ;;  %v1341_v22 = vpop.f32.mrb[14].mxu0  ;;  %v1501_v25 = vpop.f32.mrb[14].mxu1 }
 0x187   : > { %v1342_v45 = vadd.f32 %v1341_v22, %v4568_v57  ;;  %v1502_v26 = vadd.f32 %v1501_v25, %v4568_v57  ;;  %v1343_v27 = vpop.f32.mrb[15].mxu0  ;;  %v1503_v28 = vpop.f32.mrb[15].mxu1 }
 0x188   : > { %v3499_v29 = vpack.c.bf16 %v1340_v43, %v1338_v12  ;;  %v3531_v30 = vpack.c.bf16 %v1500_v21, %v1498_v15  ;;  %v1344_v33 = vadd.f32 %v1343_v27, %v4571_v62  ;;  %v1504_v35 = vadd.f32 %v1503_v28, %v4571_v62  ;;  %v3912_v28 = vld [vmem:[%s4311_s11 + $0x114] ss:$8 sps:$4 sm:$0xff]  }
 0x189   : > { %1799 = vmatmul.mubr.bf16.gmra.mrb[120].mxu1 %v4500_v53  ;;  %2152 = vmatmul.mubr.bf16.gmra.mrb[120].mxu0 %v4500_v53 }
 0x18a   : > { %2722 = vst [vmem:[%s4587_s15 + $0x30] sm:$0xff] %v3499_v29  ;;  %2754 = vst [vmem:[%s4587_s15 + $0x130] sm:$0xff] %v3531_v30  ;;  %v3500_v39 = vpack.c.bf16 %v1344_v33, %v1342_v45  ;;  %v3532_v42 = vpack.c.bf16 %v1504_v35, %v1502_v26  ;;  %1808 = vmatprep.mubr.bf16.mxu1 %v4504_v55  ;;  %2161 = vmatprep.mubr.bf16.mxu0 %v4504_v55  ;;  %v3911_v45 = vld [vmem:[%s4311_s11 + $0x100] ss:$8 sps:$4 sm:$0xff]  }
 0x18c   : > { %2723 = vst [vmem:[%s4587_s15 + $0x38] sm:$0xff] %v3500_v39  ;;  %2755 = vst [vmem:[%s4587_s15 + $0x138] sm:$0xff] %v3532_v42  ;;  %v1347_v44 = vpop.f32.mrb[16].mxu0  ;;  %v1507_v46 = vpop.f32.mrb[16].mxu1 }
 0x18d   : > { %v1348_v54 = vadd.f32 %v1347_v44, %v4568_v57  ;;  %v1508_v56 = vadd.f32 %v1507_v46, %v4568_v57  ;;  %v1349_v59 = vpop.f32.mrb[17].mxu0  ;;  %v1509_v13 = vpop.f32.mrb[17].mxu1 }
 0x18e   : > { %v1350_v53 = vadd.f32 %v1349_v59, %v4571_v62  ;;  %v1510_v40 = vadd.f32 %v1509_v13, %v4571_v62  ;;  %v1351_v50 = vpop.f32.mrb[18].mxu0  ;;  %v1511_v6 = vpop.f32.mrb[18].mxu1 }
 0x18f   : > { %v1352_v55 = vadd.f32 %v1351_v50, %v4568_v57  ;;  %v1512_v10 = vadd.f32 %v1511_v6, %v4568_v57  ;;  %v1353_v18 = vpop.f32.mrb[19].mxu0  ;;  %v1513_v23 = vpop.f32.mrb[19].mxu1 }
 0x190   : > { %v3501_v38 = vpack.c.bf16 %v1350_v53, %v1348_v54  ;;  %v3533_v31 = vpack.c.bf16 %v1510_v40, %v1508_v56  ;;  %v1354_v36 = vadd.f32 %v1353_v18, %v4571_v62  ;;  %v1514_v48 = vadd.f32 %v1513_v23, %v4571_v62  ;;  %v3913_v18 = vld [vmem:[%s4311_s11 + $0x110] ss:$8 sps:$4 sm:$0xff]  }
 0x191   : > { %1809 = vmatmul.mubr.bf16.gmra.mrb[124].mxu1 %v4510_v58  ;;  %2162 = vmatmul.mubr.bf16.gmra.mrb[124].mxu0 %v4510_v58 }
 0x192   : > { %2724 = vst [vmem:[%s4587_s15 + $0x40] sm:$0xff] %v3501_v38  ;;  %2756 = vst [vmem:[%s4587_s15 + $0x140] sm:$0xff] %v3533_v31  ;;  %v3502_v41 = vpack.c.bf16 %v1354_v36, %v1352_v55  ;;  %v3534_v51 = vpack.c.bf16 %v1514_v48, %v1512_v10  ;;  %1818 = vmatprep.mubr.bf16.mxu1 %v3910_v60  ;;  %2171 = vmatprep.mubr.bf16.mxu0 %v3910_v60  ;;  %v3914_v31 = vld [vmem:[%s4311_s11 + $0x124] ss:$8 sps:$4 sm:$0xff]  }
 0x194   : > { %2725 = vst [vmem:[%s4587_s15 + $0x48] sm:$0xff] %v3502_v41  ;;  %2757 = vst [vmem:[%s4587_s15 + $0x148] sm:$0xff] %v3534_v51  ;;  %v1357_v61 = vpop.f32.mrb[20].mxu0  ;;  %v1517_v63 = vpop.f32.mrb[20].mxu1 }
 0x195   : > { %v1358_v1 = vadd.f32 %v1357_v61, %v4568_v57  ;;  %v1518_v3 = vadd.f32 %v1517_v63, %v4568_v57  ;;  %v1359_v4 = vpop.f32.mrb[21].mxu0  ;;  %v1519_v5 = vpop.f32.mrb[21].mxu1 }
 0x196   : > { %v1360_v58 = vadd.f32 %v1359_v4, %v4571_v62  ;;  %v1520_v7 = vadd.f32 %v1519_v5, %v4571_v62  ;;  %v1361_v8 = vpop.f32.mrb[22].mxu0  ;;  %v1521_v9 = vpop.f32.mrb[22].mxu1 }
 0x197   : > { %v1362_v12 = vadd.f32 %v1361_v8, %v4568_v57  ;;  %v1522_v15 = vadd.f32 %v1521_v9, %v4568_v57  ;;  %v1363_v17 = vpop.f32.mrb[23].mxu0  ;;  %v1523_v20 = vpop.f32.mrb[23].mxu1 }
 0x198   : > { %v3503_v43 = vpack.c.bf16 %v1360_v58, %v1358_v1  ;;  %v3535_v21 = vpack.c.bf16 %v1520_v7, %v1518_v3  ;;  %v1364_v22 = vadd.f32 %v1363_v17, %v4571_v62  ;;  %v1524_v25 = vadd.f32 %v1523_v20, %v4571_v62  ;;  %v3915_v20 = vld [vmem:[%s4311_s11 + $0x120] ss:$8 sps:$4 sm:$0xff]  }
 0x199   : > { %1819 = vmatmul.mubr.bf16.gmra.mrb[128].mxu1 %v3911_v45  ;;  %2172 = vmatmul.mubr.bf16.gmra.mrb[128].mxu0 %v3911_v45 }
 0x19a   : > { %2726 = vst [vmem:[%s4587_s15 + $0x50] sm:$0xff] %v3503_v43  ;;  %2758 = vst [vmem:[%s4587_s15 + $0x150] sm:$0xff] %v3535_v21  ;;  %v3504_v26 = vpack.c.bf16 %v1364_v22, %v1362_v12  ;;  %v3536_v27 = vpack.c.bf16 %v1524_v25, %v1522_v15  ;;  %1828 = vmatprep.mubr.bf16.mxu1 %v3912_v28  ;;  %2181 = vmatprep.mubr.bf16.mxu0 %v3912_v28  ;;  %v3916_v22 = vld [vmem:[%s4311_s11 + $0x134] ss:$8 sps:$4 sm:$0xff]  }
 0x19c   : > { %2727 = vst [vmem:[%s4587_s15 + $0x58] sm:$0xff] %v3504_v26  ;;  %2759 = vst [vmem:[%s4587_s15 + $0x158] sm:$0xff] %v3536_v27  ;;  %v1367_v29 = vpop.f32.mrb[24].mxu0  ;;  %v1527_v30 = vpop.f32.mrb[24].mxu1 }
 0x19d   : > { %v1368_v33 = vadd.f32 %v1367_v29, %v4568_v57  ;;  %v1528_v35 = vadd.f32 %v1527_v30, %v4568_v57  ;;  %v1369_v39 = vpop.f32.mrb[25].mxu0  ;;  %v1529_v42 = vpop.f32.mrb[25].mxu1 }
 0x19e   : > { %v1370_v44 = vadd.f32 %v1369_v39, %v4571_v62  ;;  %v1530_v46 = vadd.f32 %v1529_v42, %v4571_v62  ;;  %v1371_v54 = vpop.f32.mrb[26].mxu0  ;;  %v1531_v56 = vpop.f32.mrb[26].mxu1 }
 0x19f   : > { %v1372_v59 = vadd.f32 %v1371_v54, %v4568_v57  ;;  %v1532_v13 = vadd.f32 %v1531_v56, %v4568_v57  ;;  %v1373_v53 = vpop.f32.mrb[27].mxu0  ;;  %v1533_v40 = vpop.f32.mrb[27].mxu1 }
 0x1a0   : > { %v3505_v50 = vpack.c.bf16 %v1370_v44, %v1368_v33  ;;  %v3537_v6 = vpack.c.bf16 %v1530_v46, %v1528_v35  ;;  %v1374_v55 = vadd.f32 %v1373_v53, %v4571_v62  ;;  %v1534_v10 = vadd.f32 %v1533_v40, %v4571_v62  ;;  %v3917_v40 = vld [vmem:[%s4311_s11 + $0x130] ss:$8 sps:$4 sm:$0xff]  }
 0x1a1   : > { %1829 = vmatmul.mubr.bf16.gmra.mrb[132].mxu1 %v3913_v18  ;;  %2182 = vmatmul.mubr.bf16.gmra.mrb[132].mxu0 %v3913_v18 }
 0x1a2   : > { %2728 = vst [vmem:[%s4587_s15 + $0x60] sm:$0xff] %v3505_v50  ;;  %2760 = vst [vmem:[%s4587_s15 + $0x160] sm:$0xff] %v3537_v6  ;;  %v3506_v23 = vpack.c.bf16 %v1374_v55, %v1372_v59  ;;  %v3538_v38 = vpack.c.bf16 %v1534_v10, %v1532_v13  ;;  %1838 = vmatprep.mubr.bf16.mxu1 %v3914_v31  ;;  %2191 = vmatprep.mubr.bf16.mxu0 %v3914_v31 }
 0x1a4   : > { %2729 = vst [vmem:[%s4587_s15 + $0x68] sm:$0xff] %v3506_v23  ;;  %2761 = vst [vmem:[%s4587_s15 + $0x168] sm:$0xff] %v3538_v38  ;;  %v1377_v36 = vpop.f32.mrb[28].mxu0  ;;  %v1537_v48 = vpop.f32.mrb[28].mxu1 }
 0x1a5   : > { %v1378_v41 = vadd.f32 %v1377_v36, %v4568_v57  ;;  %v1538_v51 = vadd.f32 %v1537_v48, %v4568_v57  ;;  %v1379_v60 = vpop.f32.mrb[29].mxu0  ;;  %v1539_v61 = vpop.f32.mrb[29].mxu1 }
 0x1a6   : > { %v1380_v63 = vadd.f32 %v1379_v60, %v4571_v62  ;;  %v1540_v1 = vadd.f32 %v1539_v61, %v4571_v62  ;;  %v1381_v3 = vpop.f32.mrb[30].mxu0  ;;  %v1541_v4 = vpop.f32.mrb[30].mxu1 }
 0x1a7   : > { %v1382_v5 = vadd.f32 %v1381_v3, %v4568_v57  ;;  %v1542_v58 = vadd.f32 %v1541_v4, %v4568_v57  ;;  %v1383_v7 = vpop.f32.mrb[31].mxu0  ;;  %v1543_v8 = vpop.f32.mrb[31].mxu1 }
 0x1a8   : > { %v3507_v9 = vpack.c.bf16 %v1380_v63, %v1378_v41  ;;  %v3539_v12 = vpack.c.bf16 %v1540_v1, %v1538_v51  ;;  %v1384_v15 = vadd.f32 %v1383_v7, %v4571_v62  ;;  %v1544_v17 = vadd.f32 %v1543_v8, %v4571_v62 }
 0x1a9   : > { %1839 = vmatmul.mubr.bf16.gmra.mrb[136].mxu1 %v3915_v20  ;;  %2192 = vmatmul.mubr.bf16.gmra.mrb[136].mxu0 %v3915_v20 }
 0x1aa   : > { %2730 = vst [vmem:[%s4587_s15 + $0x70] sm:$0xff] %v3507_v9  ;;  %2762 = vst [vmem:[%s4587_s15 + $0x170] sm:$0xff] %v3539_v12  ;;  %v3508_v43 = vpack.c.bf16 %v1384_v15, %v1382_v5  ;;  %v3540_v21 = vpack.c.bf16 %v1544_v17, %v1542_v58  ;;  %1848 = vmatprep.mubr.bf16.mxu1 %v3916_v22  ;;  %2201 = vmatprep.mubr.bf16.mxu0 %v3916_v22 }
 0x1ac   : > { %2731 = vst [vmem:[%s4587_s15 + $0x78] sm:$0xff] %v3508_v43  ;;  %2763 = vst [vmem:[%s4587_s15 + $0x178] sm:$0xff] %v3540_v21  ;;  %v1387_v25 = vpop.f32.mrb[32].mxu0  ;;  %v1547_v45 = vpop.f32.mrb[32].mxu1 }
 0x1ad   : > { %v1388_v26 = vadd.f32 %v1387_v25, %v4568_v57  ;;  %v1548_v27 = vadd.f32 %v1547_v45, %v4568_v57  ;;  %v1389_v28 = vpop.f32.mrb[33].mxu0  ;;  %v1549_v29 = vpop.f32.mrb[33].mxu1 }
 0x1ae   : > { %v1390_v30 = vadd.f32 %v1389_v28, %v4571_v62  ;;  %v1550_v33 = vadd.f32 %v1549_v29, %v4571_v62  ;;  %v1391_v35 = vpop.f32.mrb[34].mxu0  ;;  %v1551_v39 = vpop.f32.mrb[34].mxu1 }
 0x1af   : > { %v1392_v42 = vadd.f32 %v1391_v35, %v4568_v57  ;;  %v1552_v44 = vadd.f32 %v1551_v39, %v4568_v57  ;;  %v1393_v46 = vpop.f32.mrb[35].mxu0  ;;  %v1553_v54 = vpop.f32.mrb[35].mxu1 }
 0x1b0   : > { %v3509_v56 = vpack.c.bf16 %v1390_v30, %v1388_v26  ;;  %v3541_v59 = vpack.c.bf16 %v1550_v33, %v1548_v27  ;;  %v1394_v13 = vadd.f32 %v1393_v46, %v4571_v62  ;;  %v1554_v53 = vadd.f32 %v1553_v54, %v4571_v62 }
 0x1b1   : > { %1849 = vmatmul.mubr.bf16.gmra.mrb[140].mxu1 %v3917_v40  ;;  %2202 = vmatmul.mubr.bf16.gmra.mrb[140].mxu0 %v3917_v40 }
 0x1b2   : > { %2732 = vst [vmem:[%s4587_s15 + $0x80] sm:$0xff] %v3509_v56  ;;  %2764 = vst [vmem:[%s4587_s15 + $0x180] sm:$0xff] %v3541_v59  ;;  %v3510_v50 = vpack.c.bf16 %v1394_v13, %v1392_v42  ;;  %v3542_v6 = vpack.c.bf16 %v1554_v53, %v1552_v44  ;;  %1858 = vmatprep.mubr.bf16.mxu1 %v4364_v11  ;;  %2211 = vmatprep.mubr.bf16.mxu0 %v4364_v11 }
 0x1b4   : > { %2733 = vst [vmem:[%s4587_s15 + $0x88] sm:$0xff] %v3510_v50  ;;  %2765 = vst [vmem:[%s4587_s15 + $0x188] sm:$0xff] %v3542_v6  ;;  %v1397_v55 = vpop.f32.mrb[36].mxu0  ;;  %v1557_v10 = vpop.f32.mrb[36].mxu1 }
 0x1b5   : > { %v1398_v18 = vadd.f32 %v1397_v55, %v4568_v57  ;;  %v1558_v23 = vadd.f32 %v1557_v10, %v4568_v57  ;;  %v1399_v38 = vpop.f32.mrb[37].mxu0  ;;  %v1559_v31 = vpop.f32.mrb[37].mxu1 }
 0x1b6   : > { %v1400_v36 = vadd.f32 %v1399_v38, %v4571_v62  ;;  %v1560_v48 = vadd.f32 %v1559_v31, %v4571_v62  ;;  %v1401_v41 = vpop.f32.mrb[38].mxu0  ;;  %v1561_v51 = vpop.f32.mrb[38].mxu1 }
 0x1b7   : > { %v1402_v11 = vadd.f32 %v1401_v41, %v4568_v57  ;;  %v1562_v60 = vadd.f32 %v1561_v51, %v4568_v57  ;;  %v1403_v61 = vpop.f32.mrb[39].mxu0  ;;  %v1563_v63 = vpop.f32.mrb[39].mxu1 }
 0x1b8   : > { %v3511_v1 = vpack.c.bf16 %v1400_v36, %v1398_v18  ;;  %v3543_v3 = vpack.c.bf16 %v1560_v48, %v1558_v23  ;;  %v1404_v4 = vadd.f32 %v1403_v61, %v4571_v62  ;;  %v1564_v5 = vadd.f32 %v1563_v63, %v4571_v62 }
 0x1b9   : > { %1859 = vmatmul.mubr.bf16.gmra.mrb[144].mxu1 %v4373_v19  ;;  %2212 = vmatmul.mubr.bf16.gmra.mrb[144].mxu0 %v4373_v19 }
 0x1ba   : > { %2734 = vst [vmem:[%s4587_s15 + $0x90] sm:$0xff] %v3511_v1  ;;  %2766 = vst [vmem:[%s4587_s15 + $0x190] sm:$0xff] %v3543_v3  ;;  %v3512_v58 = vpack.c.bf16 %v1404_v4, %v1402_v11  ;;  %v3544_v7 = vpack.c.bf16 %v1564_v5, %v1562_v60  ;;  %1868 = vmatprep.mubr.bf16.mxu1 %v4379_v24  ;;  %2221 = vmatprep.mubr.bf16.mxu0 %v4379_v24 }
 0x1bc   : > { %2735 = vst [vmem:[%s4587_s15 + $0x98] sm:$0xff] %v3512_v58  ;;  %2767 = vst [vmem:[%s4587_s15 + $0x198] sm:$0xff] %v3544_v7  ;;  %v1407_v8 = vpop.f32.mrb[40].mxu0  ;;  %v1567_v9 = vpop.f32.mrb[40].mxu1 }
 0x1bd   : > { %v1408_v12 = vadd.f32 %v1407_v8, %v4568_v57  ;;  %v1568_v15 = vadd.f32 %v1567_v9, %v4568_v57  ;;  %v1409_v17 = vpop.f32.mrb[41].mxu0  ;;  %v1569_v20 = vpop.f32.mrb[41].mxu1 }
 0x1be   : > { %v1410_v19 = vadd.f32 %v1409_v17, %v4571_v62  ;;  %v1570_v43 = vadd.f32 %v1569_v20, %v4571_v62  ;;  %v1411_v21 = vpop.f32.mrb[42].mxu0  ;;  %v1571_v22 = vpop.f32.mrb[42].mxu1 }
 0x1bf   : > { %v1412_v24 = vadd.f32 %v1411_v21, %v4568_v57  ;;  %v1572_v25 = vadd.f32 %v1571_v22, %v4568_v57  ;;  %v1413_v45 = vpop.f32.mrb[43].mxu0  ;;  %v1573_v26 = vpop.f32.mrb[43].mxu1 }
 0x1c0   : > { %v3513_v27 = vpack.c.bf16 %v1410_v19, %v1408_v12  ;;  %v3545_v28 = vpack.c.bf16 %v1570_v43, %v1568_v15  ;;  %v1414_v29 = vadd.f32 %v1413_v45, %v4571_v62  ;;  %v1574_v30 = vadd.f32 %v1573_v26, %v4571_v62 }
 0x1c1   : > { %1869 = vmatmul.mubr.bf16.gmra.mrb[148].mxu1 %v4389_v32  ;;  %2222 = vmatmul.mubr.bf16.gmra.mrb[148].mxu0 %v4389_v32 }
 0x1c2   : > { %2736 = vst [vmem:[%s4587_s15 + $0xa0] sm:$0xff] %v3513_v27  ;;  %2768 = vst [vmem:[%s4587_s15 + $0x1a0] sm:$0xff] %v3545_v28  ;;  %v3514_v33 = vpack.c.bf16 %v1414_v29, %v1412_v24  ;;  %v3546_v35 = vpack.c.bf16 %v1574_v30, %v1572_v25  ;;  %1878 = vmatprep.mubr.bf16.mxu1 %v4395_v37  ;;  %2231 = vmatprep.mubr.bf16.mxu0 %v4395_v37 }
 0x1c4   : > { %2737 = vst [vmem:[%s4587_s15 + $0xa8] sm:$0xff] %v3514_v33  ;;  %2769 = vst [vmem:[%s4587_s15 + $0x1a8] sm:$0xff] %v3546_v35  ;;  %v1417_v39 = vpop.f32.mrb[44].mxu0  ;;  %v1577_v42 = vpop.f32.mrb[44].mxu1 }
 0x1c5   : > { %v1418_v44 = vadd.f32 %v1417_v39, %v4568_v57  ;;  %v1578_v46 = vadd.f32 %v1577_v42, %v4568_v57  ;;  %v1419_v54 = vpop.f32.mrb[45].mxu0  ;;  %v1579_v56 = vpop.f32.mrb[45].mxu1 }
 0x1c6   : > { %v1420_v32 = vadd.f32 %v1419_v54, %v4571_v62  ;;  %v1580_v59 = vadd.f32 %v1579_v56, %v4571_v62  ;;  %v1421_v13 = vpop.f32.mrb[46].mxu0  ;;  %v1581_v53 = vpop.f32.mrb[46].mxu1 }
 0x1c7   : > { %v1422_v37 = vadd.f32 %v1421_v13, %v4568_v57  ;;  %v1582_v40 = vadd.f32 %v1581_v53, %v4568_v57  ;;  %v1423_v50 = vpop.f32.mrb[47].mxu0  ;;  %v1583_v6 = vpop.f32.mrb[47].mxu1 }
 0x1c8   : > { %v3515_v55 = vpack.c.bf16 %v1420_v32, %v1418_v44  ;;  %v3547_v10 = vpack.c.bf16 %v1580_v59, %v1578_v46  ;;  %v1424_v18 = vadd.f32 %v1423_v50, %v4571_v62  ;;  %v1584_v23 = vadd.f32 %v1583_v6, %v4571_v62 }
 0x1c9   : > { %1879 = vmatmul.mubr.bf16.gmra.mrb[152].mxu1 %v4405_v49  ;;  %2232 = vmatmul.mubr.bf16.gmra.mrb[152].mxu0 %v4405_v49 }
 0x1ca   : > { %2738 = vst [vmem:[%s4587_s15 + $0xb0] sm:$0xff] %v3515_v55  ;;  %2770 = vst [vmem:[%s4587_s15 + $0x1b0] sm:$0xff] %v3547_v10  ;;  %v3516_v38 = vpack.c.bf16 %v1424_v18, %v1422_v37  ;;  %v3548_v31 = vpack.c.bf16 %v1584_v23, %v1582_v40  ;;  %1888 = vmatprep.mubr.bf16.mxu1 %v4411_v52  ;;  %2241 = vmatprep.mubr.bf16.mxu0 %v4411_v52 }
 0x1cc   : > { %2739 = vst [vmem:[%s4587_s15 + $0xb8] sm:$0xff] %v3516_v38  ;;  %2771 = vst [vmem:[%s4587_s15 + $0x1b8] sm:$0xff] %v3548_v31  ;;  %v1427_v36 = vpop.f32.mrb[48].mxu0  ;;  %v1587_v48 = vpop.f32.mrb[48].mxu1  ;;  %v3918_v38 = vld [vmem:[%s4311_s11 + $0x190] ss:$8 sps:$4 sm:$0xff]  }
 0x1cd   : > { %v1428_v41 = vadd.f32 %v1427_v36, %v4568_v57  ;;  %v1588_v51 = vadd.f32 %v1587_v48, %v4568_v57  ;;  %v1429_v11 = vpop.f32.mrb[49].mxu0  ;;  %v1589_v60 = vpop.f32.mrb[49].mxu1  ;;  %v3919_v48 = vld [vmem:[%s4311_s11 + $0x1a4] ss:$8 sps:$4 sm:$0xff]  }
 0x1ce   : > { %v1430_v49 = vadd.f32 %v1429_v11, %v4571_v62  ;;  %v1590_v61 = vadd.f32 %v1589_v60, %v4571_v62  ;;  %v1431_v63 = vpop.f32.mrb[50].mxu0  ;;  %v1591_v1 = vpop.f32.mrb[50].mxu1  ;;  %v453_v11 = vsub.s32 2, %v4554_v34 }
 0x1cf   : > { %v1432_v52 = vadd.f32 %v1431_v63, %v4568_v57  ;;  %v1592_v3 = vadd.f32 %v1591_v1, %v4568_v57  ;;  %v1433_v4 = vpop.f32.mrb[51].mxu0  ;;  %v1593_v5 = vpop.f32.mrb[51].mxu1  ;;  %v461_v1 = vsub.s32 4, %v4554_v34 }
 0x1d0   : > { %v3517_v58 = vpack.c.bf16 %v1430_v49, %v1428_v41  ;;  %v3549_v7 = vpack.c.bf16 %v1590_v61, %v1588_v51  ;;  %v1434_v8 = vadd.f32 %v1433_v4, %v4571_v62  ;;  %v1594_v9 = vadd.f32 %v1593_v5, %v4571_v62 }
 0x1d1   : > { %1889 = vmatmul.mubr.bf16.gmra.mrb[156].mxu1 %v4421_v0  ;;  %2242 = vmatmul.mubr.bf16.gmra.mrb[156].mxu0 %v4421_v0 }
 0x1d2   : > { %2740 = vst [vmem:[%s4587_s15 + $0xc0] sm:$0xff] %v3517_v58  ;;  %2772 = vst [vmem:[%s4587_s15 + $0x1c0] sm:$0xff] %v3549_v7  ;;  %v3518_v12 = vpack.c.bf16 %v1434_v8, %v1432_v52  ;;  %v3550_v15 = vpack.c.bf16 %v1594_v9, %v1592_v3  ;;  %1898 = vmatprep.mubr.bf16.mxu1 %v4427_v2  ;;  %2251 = vmatprep.mubr.bf16.mxu0 %v4427_v2  ;;  %v457_v52 = vsub.s32 3, %v4554_v34 }
 0x1d3   : > { %v465_v7 = vsub.s32 5, %v4554_v34  ;;  %v4824_v34 = vrot.slane %v4562_v47, %v453_v11 }
 0x1d4   : > { %2741 = vst [vmem:[%s4587_s15 + $0xc8] sm:$0xff] %v3518_v12  ;;  %2773 = vst [vmem:[%s4587_s15 + $0x1c8] sm:$0xff] %v3550_v15  ;;  %v1437_v17 = vpop.f32.mrb[52].mxu0  ;;  %v1597_v20 = vpop.f32.mrb[52].mxu1 }
 0x1d5   : > { %v1438_v19 = vadd.f32 %v1437_v17, %v4568_v57  ;;  %v1598_v43 = vadd.f32 %v1597_v20, %v4568_v57  ;;  %v1439_v21 = vpop.f32.mrb[53].mxu0  ;;  %v1599_v22 = vpop.f32.mrb[53].mxu1 }
 0x1d6   : > { %v1440_v0 = vadd.f32 %v1439_v21, %v4571_v62  ;;  %v1600_v24 = vadd.f32 %v1599_v22, %v4571_v62  ;;  %v1441_v25 = vpop.f32.mrb[54].mxu0  ;;  %v1601_v45 = vpop.f32.mrb[54].mxu1  ;;  %v3920_v21 = vld [vmem:[%s4311_s11 + $0x1a0] ss:$8 sps:$4 sm:$0xff]   ;;  %v4830_v22 = vrot.slane %v4562_v47, %v457_v52 }
 0x1d7   : > { %v1442_v2 = vadd.f32 %v1441_v25, %v4568_v57  ;;  %v1602_v26 = vadd.f32 %v1601_v45, %v4568_v57  ;;  %v1443_v27 = vpop.f32.mrb[55].mxu0  ;;  %v1603_v28 = vpop.f32.mrb[55].mxu1  ;;  %v3921_v25 = vld [vmem:[%s4311_s11 + $0x1b4] ss:$8 sps:$4 sm:$0xff]  }
 0x1d8   : > { %v3519_v29 = vpack.c.bf16 %v1440_v0, %v1438_v19  ;;  %v3551_v30 = vpack.c.bf16 %v1600_v24, %v1598_v43  ;;  %v1444_v33 = vadd.f32 %v1443_v27, %v4571_v62  ;;  %v1604_v35 = vadd.f32 %v1603_v28, %v4571_v62 }
 0x1d9   : > { %1899 = vmatmul.mubr.bf16.gmra.mrb[160].mxu1 %v4437_v14  ;;  %2252 = vmatmul.mubr.bf16.gmra.mrb[160].mxu0 %v4437_v14 }
 0x1da   : > { %2742 = vst [vmem:[%s4587_s15 + $0xd0] sm:$0xff] %v3519_v29  ;;  %2774 = vst [vmem:[%s4587_s15 + $0x1d0] sm:$0xff] %v3551_v30  ;;  %v3520_v39 = vpack.c.bf16 %v1444_v33, %v1442_v2  ;;  %v3552_v42 = vpack.c.bf16 %v1604_v35, %v1602_v26  ;;  %1908 = vmatprep.mubr.bf16.mxu1 %v4443_v16  ;;  %2261 = vmatprep.mubr.bf16.mxu0 %v4443_v16 }
 0x1dc   : > { %2743 = vst [vmem:[%s4587_s15 + $0xd8] sm:$0xff] %v3520_v39  ;;  %2775 = vst [vmem:[%s4587_s15 + $0x1d8] sm:$0xff] %v3552_v42  ;;  %v1447_v44 = vpop.f32.mrb[56].mxu0  ;;  %v1607_v46 = vpop.f32.mrb[56].mxu1 }
 0x1dd   : > { %v1448_v54 = vadd.f32 %v1447_v44, %v4568_v57  ;;  %v1608_v56 = vadd.f32 %v1607_v46, %v4568_v57  ;;  %v1449_v32 = vpop.f32.mrb[57].mxu0  ;;  %v1609_v59 = vpop.f32.mrb[57].mxu1 }
 0x1de   : > { %v1450_v14 = vadd.f32 %v1449_v32, %v4571_v62  ;;  %v1610_v13 = vadd.f32 %v1609_v59, %v4571_v62  ;;  %v1451_v53 = vpop.f32.mrb[58].mxu0  ;;  %v1611_v37 = vpop.f32.mrb[58].mxu1  ;;  %v3922_v32 = vld [vmem:[%s4311_s11 + $0x1b0] ss:$8 sps:$4 sm:$0xff]   ;;  %v3923_v59 = vld [vmem:[%s4311_s11 + $0x1c4] ss:$8 sps:$4 sm:$0xff]  }
 0x1df   : > { %v1452_v16 = vadd.f32 %v1451_v53, %v4568_v57  ;;  %v1612_v40 = vadd.f32 %v1611_v37, %v4568_v57  ;;  %v1453_v50 = vpop.f32.mrb[59].mxu0  ;;  %v1613_v6 = vpop.f32.mrb[59].mxu1 }
 0x1e0   : > { %v3521_v55 = vpack.c.bf16 %v1450_v14, %v1448_v54  ;;  %v3553_v10 = vpack.c.bf16 %v1610_v13, %v1608_v56  ;;  %v1454_v18 = vadd.f32 %v1453_v50, %v4571_v62  ;;  %v1614_v23 = vadd.f32 %v1613_v6, %v4571_v62 }
 0x1e1   : > { %1909 = vmatmul.mubr.bf16.gmra.mrb[164].mxu1 %v3918_v38  ;;  %2262 = vmatmul.mubr.bf16.gmra.mrb[164].mxu0 %v3918_v38 }
 0x1e2   : > { %2744 = vst [vmem:[%s4587_s15 + $0xe0] sm:$0xff] %v3521_v55  ;;  %2776 = vst [vmem:[%s4587_s15 + $0x1e0] sm:$0xff] %v3553_v10  ;;  %v3522_v31 = vpack.c.bf16 %v1454_v18, %v1452_v16  ;;  %v3554_v36 = vpack.c.bf16 %v1614_v23, %v1612_v40  ;;  %1918 = vmatprep.mubr.bf16.mxu1 %v3919_v48  ;;  %2271 = vmatprep.mubr.bf16.mxu0 %v3919_v48 }
 0x1e4   : > { %2745 = vst [vmem:[%s4587_s15 + $0xe8] sm:$0xff] %v3522_v31  ;;  %2777 = vst [vmem:[%s4587_s15 + $0x1e8] sm:$0xff] %v3554_v36  ;;  %v1457_v41 = vpop.f32.mrb[60].mxu0  ;;  %v1617_v51 = vpop.f32.mrb[60].mxu1 }
 0x1e5   : > { %v1458_v60 = vadd.f32 %v1457_v41, %v4568_v57  ;;  %v1618_v49 = vadd.f32 %v1617_v51, %v4568_v57  ;;  %v1459_v61 = vpop.f32.mrb[61].mxu0  ;;  %v1619_v63 = vpop.f32.mrb[61].mxu1  ;;  %v3924_v41 = vld [vmem:[%s4311_s11 + $0x1c0] ss:$8 sps:$4 sm:$0xff]   ;;  %v3925_v51 = vld [vmem:[%s4311_s11 + $0x1d4] ss:$8 sps:$4 sm:$0xff]  }
 0x1e6   : > { %v1460_v3 = vadd.f32 %v1459_v61, %v4571_v62  ;;  %v1620_v4 = vadd.f32 %v1619_v63, %v4571_v62  ;;  %v1461_v5 = vpop.f32.mrb[62].mxu0  ;;  %v1621_v58 = vpop.f32.mrb[62].mxu1 }
 0x1e7   : > { %v1462_v8 = vadd.f32 %v1461_v5, %v4568_v57  ;;  %v1622_v9 = vadd.f32 %v1621_v58, %v4568_v57  ;;  %v1463_v12 = vpop.f32.mrb[63].mxu0  ;;  %v1623_v15 = vpop.f32.mrb[63].mxu1  ;;  %v4827_v57 = vrot.slane %v4562_v47, %v461_v1 }
 0x1e8   : > { %v3523_v17 = vpack.c.bf16 %v1460_v3, %v1458_v60  ;;  %v3555_v20 = vpack.c.bf16 %v1620_v4, %v1618_v49  ;;  %v1464_v19 = vadd.f32 %v1463_v12, %v4571_v62  ;;  %v1624_v43 = vadd.f32 %v1623_v15, %v4571_v62 }
 0x1e9   : > { %1919 = vmatmul.mubr.bf16.gmra.mrb[168].mxu1 %v3920_v21  ;;  %2272 = vmatmul.mubr.bf16.gmra.mrb[168].mxu0 %v3920_v21  ;;  %v4835_v62 = vrot.slane %v4562_v47, %v465_v7 }
 0x1ea   : > { %2746 = vst [vmem:[%s4587_s15 + $0xf0] sm:$0xff] %v3523_v17  ;;  %2778 = vst [vmem:[%s4587_s15 + $0x1f0] sm:$0xff] %v3555_v20  ;;  %v3524_v0 = vpack.c.bf16 %v1464_v19, %v1462_v8  ;;  %v3556_v24 = vpack.c.bf16 %v1624_v43, %v1622_v9  ;;  %1928 = vmatprep.mubr.bf16.mxu1 %v3921_v25  ;;  %2281 = vmatprep.mubr.bf16.mxu0 %v3921_v25  ;;  %v3926_v17 = vld [vmem:[%s4311_s11 + $0x1d0] ss:$8 sps:$4 sm:$0xff]   ;;  %v3927_v20 = vld [vmem:[%s4311_s11 + $0x1e4] ss:$8 sps:$4 sm:$0xff]  }
 0x1ec   : > { %2747 = vst [vmem:[%s4587_s15 + $0xf8] sm:$0xff] %v3524_v0  ;;  %2779 = vst [vmem:[%s4587_s15 + $0x1f8] sm:$0xff] %v3556_v24  ;;  %v1660_v45 = vpop.f32.mrb[64].mxu1  ;;  %v2013_v2 = vpop.f32.mrb[64].mxu0 }
 0x1ed   : > { %v1661_v26 = vadd.f32 %v1660_v45, %v4824_v34  ;;  %v2014_v27 = vadd.f32 %v2013_v2, %v4827_v57  ;;  %v1662_v28 = vpop.f32.mrb[65].mxu1  ;;  %v2015_v29 = vpop.f32.mrb[65].mxu0 }
 0x1ee   : > { %v1663_v30 = vadd.f32 %v1662_v28, %v4830_v22  ;;  %v2016_v33 = vadd.f32 %v2015_v29, %v4835_v62  ;;  %v1664_v35 = vpop.f32.mrb[66].mxu1  ;;  %v2017_v47 = vpop.f32.mrb[66].mxu0 }
 0x1ef   : > { %2780 = vst [vmem:[%s4844_s7] sm:$0xff] %v1661_v26  ;;  %2908 = vst [vmem:[%s4847_s16] sm:$0xff] %v2014_v27  ;;  %v1665_v39 = vadd.f32 %v1664_v35, %v4824_v34  ;;  %v2018_v42 = vadd.f32 %v2017_v47, %v4827_v57  ;;  %v1666_v44 = vpop.f32.mrb[67].mxu1  ;;  %v2019_v46 = vpop.f32.mrb[67].mxu0 }
 0x1f0   : > { %2781 = vst [vmem:[%s4844_s7 + $0x8] sm:$0xff] %v1663_v30  ;;  %2909 = vst [vmem:[%s4847_s16 + $0x8] sm:$0xff] %v2016_v33  ;;  %v1667_v54 = vadd.f32 %v1666_v44, %v4830_v22  ;;  %v2020_v56 = vadd.f32 %v2019_v46, %v4835_v62 }
 0x1f1   : > { %2782 = vst [vmem:[%s4844_s7 + $0x10] sm:$0xff] %v1665_v39  ;;  %2910 = vst [vmem:[%s4847_s16 + $0x10] sm:$0xff] %v2018_v42  ;;  %1929 = vmatmul.mubr.bf16.gmra.mrb[172].mxu1 %v3922_v32  ;;  %2282 = vmatmul.mubr.bf16.gmra.mrb[172].mxu0 %v3922_v32  ;;  %v3928_v39 = vld [vmem:[%s4311_s11 + $0x1e0] ss:$8 sps:$4 sm:$0xff]   ;;  %v3929_v42 = vld [vmem:[%s4311_s11 + $0x1f4] ss:$8 sps:$4 sm:$0xff]  }
 0x1f2   : > { %2783 = vst [vmem:[%s4844_s7 + $0x18] sm:$0xff] %v1667_v54  ;;  %2911 = vst [vmem:[%s4847_s16 + $0x18] sm:$0xff] %v2020_v56  ;;  %1938 = vmatprep.mubr.bf16.mxu1 %v3923_v59  ;;  %2291 = vmatprep.mubr.bf16.mxu0 %v3923_v59 }
 0x1f4   : > { %v1670_v14 = vpop.f32.mrb[68].mxu1  ;;  %v2023_v13 = vpop.f32.mrb[68].mxu0 }
 0x1f5   : > { %v1671_v53 = vadd.f32 %v1670_v14, %v4824_v34  ;;  %v2024_v37 = vadd.f32 %v2023_v13, %v4827_v57  ;;  %v1672_v16 = vpop.f32.mrb[69].mxu1  ;;  %v2025_v40 = vpop.f32.mrb[69].mxu0 }
 0x1f6   : > { %v1673_v50 = vadd.f32 %v1672_v16, %v4830_v22  ;;  %v2026_v6 = vadd.f32 %v2025_v40, %v4835_v62  ;;  %v1674_v55 = vpop.f32.mrb[70].mxu1  ;;  %v2027_v10 = vpop.f32.mrb[70].mxu0 }
 0x1f7   : > { %2784 = vst [vmem:[%s4844_s7 + $0x20] sm:$0xff] %v1671_v53  ;;  %2912 = vst [vmem:[%s4847_s16 + $0x20] sm:$0xff] %v2024_v37  ;;  %v1675_v18 = vadd.f32 %v1674_v55, %v4824_v34  ;;  %v2028_v23 = vadd.f32 %v2027_v10, %v4827_v57  ;;  %v1676_v38 = vpop.f32.mrb[71].mxu1  ;;  %v2029_v31 = vpop.f32.mrb[71].mxu0 }
 0x1f8   : > { %2785 = vst [vmem:[%s4844_s7 + $0x28] sm:$0xff] %v1673_v50  ;;  %2913 = vst [vmem:[%s4847_s16 + $0x28] sm:$0xff] %v2026_v6  ;;  %v1677_v36 = vadd.f32 %v1676_v38, %v4830_v22  ;;  %v2030_v48 = vadd.f32 %v2029_v31, %v4835_v62 }
 0x1f9   : > { %2786 = vst [vmem:[%s4844_s7 + $0x30] sm:$0xff] %v1675_v18  ;;  %2914 = vst [vmem:[%s4847_s16 + $0x30] sm:$0xff] %v2028_v23  ;;  %1939 = vmatmul.mubr.bf16.gmra.mrb[176].mxu1 %v3924_v41  ;;  %2292 = vmatmul.mubr.bf16.gmra.mrb[176].mxu0 %v3924_v41  ;;  %v3930_v18 = vld [vmem:[%s4311_s11 + $0x1f0] ss:$8 sps:$4 sm:$0xff]   ;;  %s4127_s11 = smov [#allocation7]  }
 0x1fa   : > { %2787 = vst [vmem:[%s4844_s7 + $0x38] sm:$0xff] %v1677_v36  ;;  %2915 = vst [vmem:[%s4847_s16 + $0x38] sm:$0xff] %v2030_v48  ;;  %1948 = vmatprep.mubr.bf16.mxu1 %v3925_v51  ;;  %2301 = vmatprep.mubr.bf16.mxu0 %v3925_v51  ;;  %s3993_s24 = sshll.u32 %s4127_s11, 4  ;;  %s3994_s24 = int_to_ptr.vmem [resolvable:$false] %s3993_s24 }
 0x1fb   : > { %s3995_s26 = scalar_lea.vmem %s3994_s24, 16384  ;;  %p3996_p10 = scmp.lt.s32.totalorder %s5124_s28, %s3994_s24 }
 0x1fc   : > { %v1680_v11 = vpop.f32.mrb[72].mxu1  ;;  %v2033_v60 = vpop.f32.mrb[72].mxu0  ;;  %p3997_p13 = scmp.lt.s32.totalorder %s3995_s26, %s3989_s29 }
 0x1fd   : > { %v1681_v49 = vadd.f32 %v1680_v11, %v4824_v34  ;;  %v2034_v61 = vadd.f32 %v2033_v60, %v4827_v57  ;;  %v1682_v63 = vpop.f32.mrb[73].mxu1  ;;  %v2035_v1 = vpop.f32.mrb[73].mxu0 }
 0x1fe   : > { %v1683_v52 = vadd.f32 %v1682_v63, %v4830_v22  ;;  %v2036_v3 = vadd.f32 %v2035_v1, %v4835_v62  ;;  %v1684_v4 = vpop.f32.mrb[74].mxu1  ;;  %v2037_v5 = vpop.f32.mrb[74].mxu0  ;;  %p3998_p3 = por %p3997_p13, %p3996_p10 }
 0x1ff   : > { %2788 = vst [vmem:[%s4844_s7 + $0x40] sm:$0xff] %v1681_v49  ;;  %2916 = vst [vmem:[%s4847_s16 + $0x40] sm:$0xff] %v2034_v61  ;;  %v1685_v58 = vadd.f32 %v1684_v4, %v4824_v34  ;;  %v2038_v7 = vadd.f32 %v2037_v5, %v4827_v57  ;;  %v1686_v8 = vpop.f32.mrb[75].mxu1  ;;  %v2039_v9 = vpop.f32.mrb[75].mxu0 }
 0x200   : > { %2789 = vst [vmem:[%s4844_s7 + $0x48] sm:$0xff] %v1683_v52  ;;  %2917 = vst [vmem:[%s4847_s16 + $0x48] sm:$0xff] %v2036_v3  ;;  %v1687_v12 = vadd.f32 %v1686_v8, %v4830_v22  ;;  %v2040_v15 = vadd.f32 %v2039_v9, %v4835_v62  ;;  %p3999_p7 = pnand %p3998_p3, %p3992_p8 }
 0x201   : > { %2790 = vst [vmem:[%s4844_s7 + $0x50] sm:$0xff] %v1685_v58  ;;  %2918 = vst [vmem:[%s4847_s16 + $0x50] sm:$0xff] %v2038_v7  ;;  %1949 = vmatmul.mubr.bf16.gmra.mrb[180].mxu1 %v3926_v17  ;;  %2302 = vmatmul.mubr.bf16.gmra.mrb[180].mxu0 %v3926_v17 }
 0x202   : > { %2791 = vst [vmem:[%s4844_s7 + $0x58] sm:$0xff] %v1687_v12  ;;  %2919 = vst [vmem:[%s4847_s16 + $0x58] sm:$0xff] %v2040_v15  ;;  %1958 = vmatprep.mubr.bf16.mxu1 %v3927_v20  ;;  %2311 = vmatprep.mubr.bf16.mxu0 %v3927_v20 }
 0x204   : > { %v1690_v19 = vpop.f32.mrb[76].mxu1  ;;  %v2043_v43 = vpop.f32.mrb[76].mxu0 }
 0x205   : > { %v1691_v21 = vadd.f32 %v1690_v19, %v4824_v34  ;;  %v2044_v0 = vadd.f32 %v2043_v43, %v4827_v57  ;;  %v1692_v24 = vpop.f32.mrb[77].mxu1  ;;  %v2045_v25 = vpop.f32.mrb[77].mxu0 }
 0x206   : > { %v1693_v45 = vadd.f32 %v1692_v24, %v4830_v22  ;;  %v2046_v2 = vadd.f32 %v2045_v25, %v4835_v62  ;;  %v1694_v26 = vpop.f32.mrb[78].mxu1  ;;  %v2047_v27 = vpop.f32.mrb[78].mxu0 }
 0x207   : > { %2792 = vst [vmem:[%s4844_s7 + $0x60] sm:$0xff] %v1691_v21  ;;  %2920 = vst [vmem:[%s4847_s16 + $0x60] sm:$0xff] %v2044_v0  ;;  %v1695_v28 = vadd.f32 %v1694_v26, %v4824_v34  ;;  %v2048_v29 = vadd.f32 %v2047_v27, %v4827_v57  ;;  %v1696_v30 = vpop.f32.mrb[79].mxu1  ;;  %v2049_v33 = vpop.f32.mrb[79].mxu0 }
 0x208   : > { %2793 = vst [vmem:[%s4844_s7 + $0x68] sm:$0xff] %v1693_v45  ;;  %2921 = vst [vmem:[%s4847_s16 + $0x68] sm:$0xff] %v2046_v2  ;;  %v1697_v35 = vadd.f32 %v1696_v30, %v4830_v22  ;;  %v2050_v47 = vadd.f32 %v2049_v33, %v4835_v62 }
 0x209   : > { %2794 = vst [vmem:[%s4844_s7 + $0x70] sm:$0xff] %v1695_v28  ;;  %2922 = vst [vmem:[%s4847_s16 + $0x70] sm:$0xff] %v2048_v29  ;;  %1959 = vmatmul.mubr.bf16.gmra.mrb[184].mxu1 %v3928_v39  ;;  %2312 = vmatmul.mubr.bf16.gmra.mrb[184].mxu0 %v3928_v39 }
 0x20a   : > { %2795 = vst [vmem:[%s4844_s7 + $0x78] sm:$0xff] %v1697_v35  ;;  %2923 = vst [vmem:[%s4847_s16 + $0x78] sm:$0xff] %v2050_v47  ;;  %1968 = vmatprep.mubr.bf16.mxu1 %v3929_v42  ;;  %2321 = vmatprep.mubr.bf16.mxu0 %v3929_v42 }
 0x20c   : > { %v1700_v44 = vpop.f32.mrb[80].mxu1  ;;  %v2053_v46 = vpop.f32.mrb[80].mxu0 }
 0x20d   : > { %v1701_v54 = vadd.f32 %v1700_v44, %v4824_v34  ;;  %v2054_v56 = vadd.f32 %v2053_v46, %v4827_v57  ;;  %v1702_v32 = vpop.f32.mrb[81].mxu1  ;;  %v2055_v59 = vpop.f32.mrb[81].mxu0 }
 0x20e   : > { %v1703_v14 = vadd.f32 %v1702_v32, %v4830_v22  ;;  %v2056_v13 = vadd.f32 %v2055_v59, %v4835_v62  ;;  %v1704_v53 = vpop.f32.mrb[82].mxu1  ;;  %v2057_v37 = vpop.f32.mrb[82].mxu0 }
 0x20f   : > { %2796 = vst [vmem:[%s4844_s7 + $0x80] sm:$0xff] %v1701_v54  ;;  %2924 = vst [vmem:[%s4847_s16 + $0x80] sm:$0xff] %v2054_v56  ;;  %v1705_v16 = vadd.f32 %v1704_v53, %v4824_v34  ;;  %v2058_v40 = vadd.f32 %v2057_v37, %v4827_v57  ;;  %v1706_v50 = vpop.f32.mrb[83].mxu1  ;;  %v2059_v6 = vpop.f32.mrb[83].mxu0 }
 0x210   : > { %2797 = vst [vmem:[%s4844_s7 + $0x88] sm:$0xff] %v1703_v14  ;;  %2925 = vst [vmem:[%s4847_s16 + $0x88] sm:$0xff] %v2056_v13  ;;  %v1707_v55 = vadd.f32 %v1706_v50, %v4830_v22  ;;  %v2060_v10 = vadd.f32 %v2059_v6, %v4835_v62 }
 0x211   : > { %2798 = vst [vmem:[%s4844_s7 + $0x90] sm:$0xff] %v1705_v16  ;;  %2926 = vst [vmem:[%s4847_s16 + $0x90] sm:$0xff] %v2058_v40  ;;  %1969 = vmatmul.mubr.bf16.gmra.mrb[188].mxu1 %v3930_v18  ;;  %2322 = vmatmul.mubr.bf16.gmra.mrb[188].mxu0 %v3930_v18 }
 0x212   : > { %2799 = vst [vmem:[%s4844_s7 + $0x98] sm:$0xff] %v1707_v55  ;;  %2927 = vst [vmem:[%s4847_s16 + $0x98] sm:$0xff] %v2060_v10 }
 0x214   : > { %v1710_v23 = vpop.f32.mrb[84].mxu1  ;;  %v2063_v38 = vpop.f32.mrb[84].mxu0 }
 0x215   : > { %v1711_v31 = vadd.f32 %v1710_v23, %v4824_v34  ;;  %v2064_v36 = vadd.f32 %v2063_v38, %v4827_v57  ;;  %v1712_v48 = vpop.f32.mrb[85].mxu1  ;;  %v2065_v41 = vpop.f32.mrb[85].mxu0 }
 0x216   : > { %v1713_v51 = vadd.f32 %v1712_v48, %v4830_v22  ;;  %v2066_v11 = vadd.f32 %v2065_v41, %v4835_v62  ;;  %v1714_v60 = vpop.f32.mrb[86].mxu1  ;;  %v2067_v49 = vpop.f32.mrb[86].mxu0 }
 0x217   : > { %2800 = vst [vmem:[%s4844_s7 + $0xa0] sm:$0xff] %v1711_v31  ;;  %2928 = vst [vmem:[%s4847_s16 + $0xa0] sm:$0xff] %v2064_v36  ;;  %v1715_v61 = vadd.f32 %v1714_v60, %v4824_v34  ;;  %v2068_v63 = vadd.f32 %v2067_v49, %v4827_v57  ;;  %v1716_v1 = vpop.f32.mrb[87].mxu1  ;;  %v2069_v52 = vpop.f32.mrb[87].mxu0 }
 0x218   : > { %2801 = vst [vmem:[%s4844_s7 + $0xa8] sm:$0xff] %v1713_v51  ;;  %2929 = vst [vmem:[%s4847_s16 + $0xa8] sm:$0xff] %v2066_v11  ;;  %v1717_v3 = vadd.f32 %v1716_v1, %v4830_v22  ;;  %v2070_v4 = vadd.f32 %v2069_v52, %v4835_v62 }
 0x219   : > { %2802 = vst [vmem:[%s4844_s7 + $0xb0] sm:$0xff] %v1715_v61  ;;  %2930 = vst [vmem:[%s4847_s16 + $0xb0] sm:$0xff] %v2068_v63 }
 0x21a   : > { %2803 = vst [vmem:[%s4844_s7 + $0xb8] sm:$0xff] %v1717_v3  ;;  %2931 = vst [vmem:[%s4847_s16 + $0xb8] sm:$0xff] %v2070_v4 }
 0x21c   : > { %v1720_v5 = vpop.f32.mrb[88].mxu1  ;;  %v2073_v58 = vpop.f32.mrb[88].mxu0 }
 0x21d   : > { %v1721_v7 = vadd.f32 %v1720_v5, %v4824_v34  ;;  %v2074_v8 = vadd.f32 %v2073_v58, %v4827_v57  ;;  %v1722_v9 = vpop.f32.mrb[89].mxu1  ;;  %v2075_v12 = vpop.f32.mrb[89].mxu0 }
 0x21e   : > { %v1723_v15 = vadd.f32 %v1722_v9, %v4830_v22  ;;  %v2076_v17 = vadd.f32 %v2075_v12, %v4835_v62  ;;  %v1724_v20 = vpop.f32.mrb[90].mxu1  ;;  %v2077_v19 = vpop.f32.mrb[90].mxu0 }
 0x21f   : > { %2804 = vst [vmem:[%s4844_s7 + $0xc0] sm:$0xff] %v1721_v7  ;;  %2932 = vst [vmem:[%s4847_s16 + $0xc0] sm:$0xff] %v2074_v8  ;;  %v1725_v43 = vadd.f32 %v1724_v20, %v4824_v34  ;;  %v2078_v21 = vadd.f32 %v2077_v19, %v4827_v57  ;;  %v1726_v0 = vpop.f32.mrb[91].mxu1  ;;  %v2079_v24 = vpop.f32.mrb[91].mxu0 }
 0x220   : > { %2805 = vst [vmem:[%s4844_s7 + $0xc8] sm:$0xff] %v1723_v15  ;;  %2933 = vst [vmem:[%s4847_s16 + $0xc8] sm:$0xff] %v2076_v17  ;;  %v1727_v25 = vadd.f32 %v1726_v0, %v4830_v22  ;;  %v2080_v45 = vadd.f32 %v2079_v24, %v4835_v62 }
 0x221   : > { %2806 = vst [vmem:[%s4844_s7 + $0xd0] sm:$0xff] %v1725_v43  ;;  %2934 = vst [vmem:[%s4847_s16 + $0xd0] sm:$0xff] %v2078_v21 }
 0x222   : > { %2807 = vst [vmem:[%s4844_s7 + $0xd8] sm:$0xff] %v1727_v25  ;;  %2935 = vst [vmem:[%s4847_s16 + $0xd8] sm:$0xff] %v2080_v45 }
 0x224   : > { %v1730_v2 = vpop.f32.mrb[92].mxu1  ;;  %v2083_v26 = vpop.f32.mrb[92].mxu0 }
 0x225   : > { %v1731_v27 = vadd.f32 %v1730_v2, %v4824_v34  ;;  %v2084_v28 = vadd.f32 %v2083_v26, %v4827_v57  ;;  %v1732_v29 = vpop.f32.mrb[93].mxu1  ;;  %v2085_v30 = vpop.f32.mrb[93].mxu0 }
 0x226   : > { %v1733_v33 = vadd.f32 %v1732_v29, %v4830_v22  ;;  %v2086_v35 = vadd.f32 %v2085_v30, %v4835_v62  ;;  %v1734_v47 = vpop.f32.mrb[94].mxu1  ;;  %v2087_v39 = vpop.f32.mrb[94].mxu0 }
 0x227   : > { %2808 = vst [vmem:[%s4844_s7 + $0xe0] sm:$0xff] %v1731_v27  ;;  %2936 = vst [vmem:[%s4847_s16 + $0xe0] sm:$0xff] %v2084_v28  ;;  %v1735_v42 = vadd.f32 %v1734_v47, %v4824_v34  ;;  %v2088_v44 = vadd.f32 %v2087_v39, %v4827_v57  ;;  %v1736_v46 = vpop.f32.mrb[95].mxu1  ;;  %v2089_v54 = vpop.f32.mrb[95].mxu0 }
 0x228   : > { %2809 = vst [vmem:[%s4844_s7 + $0xe8] sm:$0xff] %v1733_v33  ;;  %2937 = vst [vmem:[%s4847_s16 + $0xe8] sm:$0xff] %v2086_v35  ;;  %v1737_v56 = vadd.f32 %v1736_v46, %v4830_v22  ;;  %v2090_v32 = vadd.f32 %v2089_v54, %v4835_v62 }
 0x229   : > { %2810 = vst [vmem:[%s4844_s7 + $0xf0] sm:$0xff] %v1735_v42  ;;  %2938 = vst [vmem:[%s4847_s16 + $0xf0] sm:$0xff] %v2088_v44 }
 0x22a   : > { %2811 = vst [vmem:[%s4844_s7 + $0xf8] sm:$0xff] %v1737_v56  ;;  %2939 = vst [vmem:[%s4847_s16 + $0xf8] sm:$0xff] %v2090_v32 }
 0x22c   : > { %v1740_v59 = vpop.f32.mrb[96].mxu1  ;;  %v2093_v14 = vpop.f32.mrb[96].mxu0 }
 0x22d   : > { %v1741_v13 = vadd.f32 %v1740_v59, %v4824_v34  ;;  %v2094_v53 = vadd.f32 %v2093_v14, %v4827_v57  ;;  %v1742_v37 = vpop.f32.mrb[97].mxu1  ;;  %v2095_v16 = vpop.f32.mrb[97].mxu0 }
 0x22e   : > { %v1743_v40 = vadd.f32 %v1742_v37, %v4830_v22  ;;  %v2096_v50 = vadd.f32 %v2095_v16, %v4835_v62  ;;  %v1744_v6 = vpop.f32.mrb[98].mxu1  ;;  %v2097_v55 = vpop.f32.mrb[98].mxu0 }
 0x22f   : > { %2812 = vst [vmem:[%s4844_s7 + $0x100] sm:$0xff] %v1741_v13  ;;  %2940 = vst [vmem:[%s4847_s16 + $0x100] sm:$0xff] %v2094_v53  ;;  %v1745_v10 = vadd.f32 %v1744_v6, %v4824_v34  ;;  %v2098_v18 = vadd.f32 %v2097_v55, %v4827_v57  ;;  %v1746_v23 = vpop.f32.mrb[99].mxu1  ;;  %v2099_v38 = vpop.f32.mrb[99].mxu0 }
 0x230   : > { %2813 = vst [vmem:[%s4844_s7 + $0x108] sm:$0xff] %v1743_v40  ;;  %2941 = vst [vmem:[%s4847_s16 + $0x108] sm:$0xff] %v2096_v50  ;;  %v1747_v31 = vadd.f32 %v1746_v23, %v4830_v22  ;;  %v2100_v36 = vadd.f32 %v2099_v38, %v4835_v62 }
 0x231   : > { %2814 = vst [vmem:[%s4844_s7 + $0x110] sm:$0xff] %v1745_v10  ;;  %2942 = vst [vmem:[%s4847_s16 + $0x110] sm:$0xff] %v2098_v18 }
 0x232   : > { %2815 = vst [vmem:[%s4844_s7 + $0x118] sm:$0xff] %v1747_v31  ;;  %2943 = vst [vmem:[%s4847_s16 + $0x118] sm:$0xff] %v2100_v36 }
 0x234   : > { %v1750_v48 = vpop.f32.mrb[100].mxu1  ;;  %v2103_v41 = vpop.f32.mrb[100].mxu0 }
 0x235   : > { %v1751_v51 = vadd.f32 %v1750_v48, %v4824_v34  ;;  %v2104_v11 = vadd.f32 %v2103_v41, %v4827_v57  ;;  %v1752_v60 = vpop.f32.mrb[101].mxu1  ;;  %v2105_v49 = vpop.f32.mrb[101].mxu0 }
 0x236   : > { %v1753_v61 = vadd.f32 %v1752_v60, %v4830_v22  ;;  %v2106_v63 = vadd.f32 %v2105_v49, %v4835_v62  ;;  %v1754_v1 = vpop.f32.mrb[102].mxu1  ;;  %v2107_v52 = vpop.f32.mrb[102].mxu0 }
 0x237   : > { %2816 = vst [vmem:[%s4844_s7 + $0x120] sm:$0xff] %v1751_v51  ;;  %2944 = vst [vmem:[%s4847_s16 + $0x120] sm:$0xff] %v2104_v11  ;;  %v1755_v3 = vadd.f32 %v1754_v1, %v4824_v34  ;;  %v2108_v4 = vadd.f32 %v2107_v52, %v4827_v57  ;;  %v1756_v5 = vpop.f32.mrb[103].mxu1  ;;  %v2109_v58 = vpop.f32.mrb[103].mxu0 }
 0x238   : > { %2817 = vst [vmem:[%s4844_s7 + $0x128] sm:$0xff] %v1753_v61  ;;  %2945 = vst [vmem:[%s4847_s16 + $0x128] sm:$0xff] %v2106_v63  ;;  %v1757_v7 = vadd.f32 %v1756_v5, %v4830_v22  ;;  %v2110_v8 = vadd.f32 %v2109_v58, %v4835_v62 }
 0x239   : > { %2818 = vst [vmem:[%s4844_s7 + $0x130] sm:$0xff] %v1755_v3  ;;  %2946 = vst [vmem:[%s4847_s16 + $0x130] sm:$0xff] %v2108_v4 }
 0x23a   : > { %2819 = vst [vmem:[%s4844_s7 + $0x138] sm:$0xff] %v1757_v7  ;;  %2947 = vst [vmem:[%s4847_s16 + $0x138] sm:$0xff] %v2110_v8 }
 0x23c   : > { %v1760_v9 = vpop.f32.mrb[104].mxu1  ;;  %v2113_v12 = vpop.f32.mrb[104].mxu0 }
 0x23d   : > { %v1761_v15 = vadd.f32 %v1760_v9, %v4824_v34  ;;  %v2114_v17 = vadd.f32 %v2113_v12, %v4827_v57  ;;  %v1762_v20 = vpop.f32.mrb[105].mxu1  ;;  %v2115_v19 = vpop.f32.mrb[105].mxu0 }
 0x23e   : > { %v1763_v43 = vadd.f32 %v1762_v20, %v4830_v22  ;;  %v2116_v21 = vadd.f32 %v2115_v19, %v4835_v62  ;;  %v1764_v0 = vpop.f32.mrb[106].mxu1  ;;  %v2117_v24 = vpop.f32.mrb[106].mxu0 }
 0x23f   : > { %2820 = vst [vmem:[%s4844_s7 + $0x140] sm:$0xff] %v1761_v15  ;;  %2948 = vst [vmem:[%s4847_s16 + $0x140] sm:$0xff] %v2114_v17  ;;  %v1765_v25 = vadd.f32 %v1764_v0, %v4824_v34  ;;  %v2118_v45 = vadd.f32 %v2117_v24, %v4827_v57  ;;  %v1766_v2 = vpop.f32.mrb[107].mxu1  ;;  %v2119_v26 = vpop.f32.mrb[107].mxu0 }
 0x240   : > { %2821 = vst [vmem:[%s4844_s7 + $0x148] sm:$0xff] %v1763_v43  ;;  %2949 = vst [vmem:[%s4847_s16 + $0x148] sm:$0xff] %v2116_v21  ;;  %v1767_v27 = vadd.f32 %v1766_v2, %v4830_v22  ;;  %v2120_v28 = vadd.f32 %v2119_v26, %v4835_v62 }
 0x241   : > { %2822 = vst [vmem:[%s4844_s7 + $0x150] sm:$0xff] %v1765_v25  ;;  %2950 = vst [vmem:[%s4847_s16 + $0x150] sm:$0xff] %v2118_v45 }
 0x242   : > { %2823 = vst [vmem:[%s4844_s7 + $0x158] sm:$0xff] %v1767_v27  ;;  %2951 = vst [vmem:[%s4847_s16 + $0x158] sm:$0xff] %v2120_v28 }
 0x244   : > { %v1770_v29 = vpop.f32.mrb[108].mxu1  ;;  %v2123_v30 = vpop.f32.mrb[108].mxu0 }
 0x245   : > { %v1771_v33 = vadd.f32 %v1770_v29, %v4824_v34  ;;  %v2124_v35 = vadd.f32 %v2123_v30, %v4827_v57  ;;  %v1772_v47 = vpop.f32.mrb[109].mxu1  ;;  %v2125_v39 = vpop.f32.mrb[109].mxu0 }
 0x246   : > { %v1773_v42 = vadd.f32 %v1772_v47, %v4830_v22  ;;  %v2126_v44 = vadd.f32 %v2125_v39, %v4835_v62  ;;  %v1774_v46 = vpop.f32.mrb[110].mxu1  ;;  %v2127_v54 = vpop.f32.mrb[110].mxu0 }
 0x247   : > { %2824 = vst [vmem:[%s4844_s7 + $0x160] sm:$0xff] %v1771_v33  ;;  %2952 = vst [vmem:[%s4847_s16 + $0x160] sm:$0xff] %v2124_v35  ;;  %v1775_v56 = vadd.f32 %v1774_v46, %v4824_v34  ;;  %v2128_v32 = vadd.f32 %v2127_v54, %v4827_v57  ;;  %v1776_v59 = vpop.f32.mrb[111].mxu1  ;;  %v2129_v14 = vpop.f32.mrb[111].mxu0 }
 0x248   : > { %2825 = vst [vmem:[%s4844_s7 + $0x168] sm:$0xff] %v1773_v42  ;;  %2953 = vst [vmem:[%s4847_s16 + $0x168] sm:$0xff] %v2126_v44  ;;  %v1777_v13 = vadd.f32 %v1776_v59, %v4830_v22  ;;  %v2130_v53 = vadd.f32 %v2129_v14, %v4835_v62 }
 0x249   : > { %2826 = vst [vmem:[%s4844_s7 + $0x170] sm:$0xff] %v1775_v56  ;;  %2954 = vst [vmem:[%s4847_s16 + $0x170] sm:$0xff] %v2128_v32 }
 0x24a   : > { %2827 = vst [vmem:[%s4844_s7 + $0x178] sm:$0xff] %v1777_v13  ;;  %2955 = vst [vmem:[%s4847_s16 + $0x178] sm:$0xff] %v2130_v53 }
 0x24c   : > { %v1780_v37 = vpop.f32.mrb[112].mxu1  ;;  %v2133_v16 = vpop.f32.mrb[112].mxu0 }
 0x24d   : > { %v1781_v40 = vadd.f32 %v1780_v37, %v4824_v34  ;;  %v2134_v50 = vadd.f32 %v2133_v16, %v4827_v57  ;;  %v1782_v6 = vpop.f32.mrb[113].mxu1  ;;  %v2135_v55 = vpop.f32.mrb[113].mxu0 }
 0x24e   : > { %v1783_v10 = vadd.f32 %v1782_v6, %v4830_v22  ;;  %v2136_v18 = vadd.f32 %v2135_v55, %v4835_v62  ;;  %v1784_v23 = vpop.f32.mrb[114].mxu1  ;;  %v2137_v38 = vpop.f32.mrb[114].mxu0 }
 0x24f   : > { %2828 = vst [vmem:[%s4844_s7 + $0x180] sm:$0xff] %v1781_v40  ;;  %2956 = vst [vmem:[%s4847_s16 + $0x180] sm:$0xff] %v2134_v50  ;;  %v1785_v31 = vadd.f32 %v1784_v23, %v4824_v34  ;;  %v2138_v36 = vadd.f32 %v2137_v38, %v4827_v57  ;;  %v1786_v48 = vpop.f32.mrb[115].mxu1  ;;  %v2139_v41 = vpop.f32.mrb[115].mxu0 }
 0x250   : > { %2829 = vst [vmem:[%s4844_s7 + $0x188] sm:$0xff] %v1783_v10  ;;  %2957 = vst [vmem:[%s4847_s16 + $0x188] sm:$0xff] %v2136_v18  ;;  %v1787_v51 = vadd.f32 %v1786_v48, %v4830_v22  ;;  %v2140_v11 = vadd.f32 %v2139_v41, %v4835_v62 }
 0x251   : > { %2830 = vst [vmem:[%s4844_s7 + $0x190] sm:$0xff] %v1785_v31  ;;  %2958 = vst [vmem:[%s4847_s16 + $0x190] sm:$0xff] %v2138_v36 }
 0x252   : > { %2831 = vst [vmem:[%s4844_s7 + $0x198] sm:$0xff] %v1787_v51  ;;  %2959 = vst [vmem:[%s4847_s16 + $0x198] sm:$0xff] %v2140_v11 }
 0x254   : > { %v1790_v60 = vpop.f32.mrb[116].mxu1  ;;  %v2143_v49 = vpop.f32.mrb[116].mxu0 }
 0x255   : > { %v1791_v61 = vadd.f32 %v1790_v60, %v4824_v34  ;;  %v2144_v63 = vadd.f32 %v2143_v49, %v4827_v57  ;;  %v1792_v1 = vpop.f32.mrb[117].mxu1  ;;  %v2145_v52 = vpop.f32.mrb[117].mxu0 }
 0x256   : > { %v1793_v3 = vadd.f32 %v1792_v1, %v4830_v22  ;;  %v2146_v4 = vadd.f32 %v2145_v52, %v4835_v62  ;;  %v1794_v5 = vpop.f32.mrb[118].mxu1  ;;  %v2147_v58 = vpop.f32.mrb[118].mxu0 }
 0x257   : > { %2832 = vst [vmem:[%s4844_s7 + $0x1a0] sm:$0xff] %v1791_v61  ;;  %2960 = vst [vmem:[%s4847_s16 + $0x1a0] sm:$0xff] %v2144_v63  ;;  %v1795_v7 = vadd.f32 %v1794_v5, %v4824_v34  ;;  %v2148_v8 = vadd.f32 %v2147_v58, %v4827_v57  ;;  %v1796_v9 = vpop.f32.mrb[119].mxu1  ;;  %v2149_v12 = vpop.f32.mrb[119].mxu0 }
 0x258   : > { %2833 = vst [vmem:[%s4844_s7 + $0x1a8] sm:$0xff] %v1793_v3  ;;  %2961 = vst [vmem:[%s4847_s16 + $0x1a8] sm:$0xff] %v2146_v4  ;;  %v1797_v15 = vadd.f32 %v1796_v9, %v4830_v22  ;;  %v2150_v17 = vadd.f32 %v2149_v12, %v4835_v62 }
 0x259   : > { %2834 = vst [vmem:[%s4844_s7 + $0x1b0] sm:$0xff] %v1795_v7  ;;  %2962 = vst [vmem:[%s4847_s16 + $0x1b0] sm:$0xff] %v2148_v8 }
 0x25a   : > { %2835 = vst [vmem:[%s4844_s7 + $0x1b8] sm:$0xff] %v1797_v15  ;;  %2963 = vst [vmem:[%s4847_s16 + $0x1b8] sm:$0xff] %v2150_v17 }
 0x25c   : > { %v1800_v20 = vpop.f32.mrb[120].mxu1  ;;  %v2153_v19 = vpop.f32.mrb[120].mxu0 }
 0x25d   : > { %v1801_v43 = vadd.f32 %v1800_v20, %v4824_v34  ;;  %v2154_v21 = vadd.f32 %v2153_v19, %v4827_v57  ;;  %v1802_v0 = vpop.f32.mrb[121].mxu1  ;;  %v2155_v24 = vpop.f32.mrb[121].mxu0 }
 0x25e   : > { %v1803_v25 = vadd.f32 %v1802_v0, %v4830_v22  ;;  %v2156_v45 = vadd.f32 %v2155_v24, %v4835_v62  ;;  %v1804_v2 = vpop.f32.mrb[122].mxu1  ;;  %v2157_v26 = vpop.f32.mrb[122].mxu0 }
 0x25f   : > { %2836 = vst [vmem:[%s4844_s7 + $0x1c0] sm:$0xff] %v1801_v43  ;;  %2964 = vst [vmem:[%s4847_s16 + $0x1c0] sm:$0xff] %v2154_v21  ;;  %v1805_v27 = vadd.f32 %v1804_v2, %v4824_v34  ;;  %v2158_v28 = vadd.f32 %v2157_v26, %v4827_v57  ;;  %v1806_v29 = vpop.f32.mrb[123].mxu1  ;;  %v2159_v30 = vpop.f32.mrb[123].mxu0 }
 0x260   : > { %2837 = vst [vmem:[%s4844_s7 + $0x1c8] sm:$0xff] %v1803_v25  ;;  %2965 = vst [vmem:[%s4847_s16 + $0x1c8] sm:$0xff] %v2156_v45  ;;  %v1807_v33 = vadd.f32 %v1806_v29, %v4830_v22  ;;  %v2160_v35 = vadd.f32 %v2159_v30, %v4835_v62 }
 0x261   : > { %2838 = vst [vmem:[%s4844_s7 + $0x1d0] sm:$0xff] %v1805_v27  ;;  %2966 = vst [vmem:[%s4847_s16 + $0x1d0] sm:$0xff] %v2158_v28 }
 0x262   : > { %2839 = vst [vmem:[%s4844_s7 + $0x1d8] sm:$0xff] %v1807_v33  ;;  %2967 = vst [vmem:[%s4847_s16 + $0x1d8] sm:$0xff] %v2160_v35 }
 0x264   : > { %v1810_v47 = vpop.f32.mrb[124].mxu1  ;;  %v2163_v39 = vpop.f32.mrb[124].mxu0 }
 0x265   : > { %v1811_v42 = vadd.f32 %v1810_v47, %v4824_v34  ;;  %v2164_v44 = vadd.f32 %v2163_v39, %v4827_v57  ;;  %v1812_v46 = vpop.f32.mrb[125].mxu1  ;;  %v2165_v54 = vpop.f32.mrb[125].mxu0 }
 0x266   : > { %v1813_v56 = vadd.f32 %v1812_v46, %v4830_v22  ;;  %v2166_v32 = vadd.f32 %v2165_v54, %v4835_v62  ;;  %v1814_v59 = vpop.f32.mrb[126].mxu1  ;;  %v2167_v14 = vpop.f32.mrb[126].mxu0 }
 0x267   : > { %2840 = vst [vmem:[%s4844_s7 + $0x1e0] sm:$0xff] %v1811_v42  ;;  %2968 = vst [vmem:[%s4847_s16 + $0x1e0] sm:$0xff] %v2164_v44  ;;  %v1815_v13 = vadd.f32 %v1814_v59, %v4824_v34  ;;  %v2168_v53 = vadd.f32 %v2167_v14, %v4827_v57  ;;  %v1816_v37 = vpop.f32.mrb[127].mxu1  ;;  %v2169_v16 = vpop.f32.mrb[127].mxu0 }
 0x268   : > { %2841 = vst [vmem:[%s4844_s7 + $0x1e8] sm:$0xff] %v1813_v56  ;;  %2969 = vst [vmem:[%s4847_s16 + $0x1e8] sm:$0xff] %v2166_v32  ;;  %v1817_v40 = vadd.f32 %v1816_v37, %v4830_v22  ;;  %v2170_v50 = vadd.f32 %v2169_v16, %v4835_v62 }
 0x269   : > { %2842 = vst [vmem:[%s4844_s7 + $0x1f0] sm:$0xff] %v1815_v13  ;;  %2970 = vst [vmem:[%s4847_s16 + $0x1f0] sm:$0xff] %v2168_v53 }
 0x26a   : > { %2843 = vst [vmem:[%s4844_s7 + $0x1f8] sm:$0xff] %v1817_v40  ;;  %2971 = vst [vmem:[%s4847_s16 + $0x1f8] sm:$0xff] %v2170_v50 }
 0x26c   : > { %v1820_v6 = vpop.f32.mrb[128].mxu1  ;;  %v2173_v55 = vpop.f32.mrb[128].mxu0 }
 0x26d   : > { %v1821_v10 = vadd.f32 %v1820_v6, %v4824_v34  ;;  %v2174_v18 = vadd.f32 %v2173_v55, %v4827_v57  ;;  %v1822_v23 = vpop.f32.mrb[129].mxu1  ;;  %v2175_v38 = vpop.f32.mrb[129].mxu0 }
 0x26e   : > { %v1823_v31 = vadd.f32 %v1822_v23, %v4830_v22  ;;  %v2176_v36 = vadd.f32 %v2175_v38, %v4835_v62  ;;  %v1824_v48 = vpop.f32.mrb[130].mxu1  ;;  %v2177_v41 = vpop.f32.mrb[130].mxu0 }
 0x26f   : > { %2844 = vst [vmem:[%s4844_s7 + $0x200] sm:$0xff] %v1821_v10  ;;  %2972 = vst [vmem:[%s4847_s16 + $0x200] sm:$0xff] %v2174_v18  ;;  %v1825_v51 = vadd.f32 %v1824_v48, %v4824_v34  ;;  %v2178_v11 = vadd.f32 %v2177_v41, %v4827_v57  ;;  %v1826_v60 = vpop.f32.mrb[131].mxu1  ;;  %v2179_v49 = vpop.f32.mrb[131].mxu0 }
 0x270   : > { %2845 = vst [vmem:[%s4844_s7 + $0x208] sm:$0xff] %v1823_v31  ;;  %2973 = vst [vmem:[%s4847_s16 + $0x208] sm:$0xff] %v2176_v36  ;;  %v1827_v61 = vadd.f32 %v1826_v60, %v4830_v22  ;;  %v2180_v63 = vadd.f32 %v2179_v49, %v4835_v62 }
 0x271   : > { %2846 = vst [vmem:[%s4844_s7 + $0x210] sm:$0xff] %v1825_v51  ;;  %2974 = vst [vmem:[%s4847_s16 + $0x210] sm:$0xff] %v2178_v11 }
 0x272   : > { %4002 = shalt.err (!%p3999_p7)
}
 0x273   : > { %s4003_s15 = scalar_lea.hbm %s5122_s8, 8192  ;;  %s4007_s27 = scalar_lea.hbm %s5493_s3, 16384 }
 0x274   : > { %p4004_p9 = scmp.ne.s32.totalorder %s5122_s8, %s4003_s15  ;;  %p4008_p5 = scmp.lt.u32.totalorder %s5122_s8, %s5493_s3 }
 0x275   : > { %p4009_p11 = scmp.lt.u32.totalorder %s4007_s27, %s4003_s15  ;;  %p4011_p4 = scmp.lt.u32.totalorder %s4003_s15, %s5122_s8 }
 0x276   : > { %p4005_p2 = pnand %p4004_p9, %p4257_p12 }
 0x277   : > { %p4010_p1 = por %p4009_p11, %p4008_p5 }
 0x278   : > { %p4006_p0 = pneg %p4005_p2 }
 0x279   : > { %p4012_p6 = por %p4011_p4, %p4010_p1 }
 0x27b   : > { %p4013_p8 = pnand %p4012_p6, %p4006_p0 }
 0x27d   : > { %4016 = shalt.err (!%p4013_p8)
}
 0x27e   : > { %s4128_s29 = smov 128   ;;  %s4129_s24 = smov 8   ;;  %2847 = vst [vmem:[%s4844_s7 + $0x218] sm:$0xff] %v1827_v61  ;;  %2975 = vst [vmem:[%s4847_s16 + $0x218] sm:$0xff] %v2180_v63  ;;  %v1830_v1 = vpop.f32.mrb[132].mxu1  ;;  %v2183_v52 = vpop.f32.mrb[132].mxu0 }
 0x27f   : > { %3601 = dma.vmem_to_hbm [thread:$0]  (%p4257_p12), %s5124_s28, 8192, %s5122_s8, %s3037_s13, %s4128_s29, %s4128_s29, %s4129_s24   ;;  %v1831_v3 = vadd.f32 %v1830_v1, %v4824_v34  ;;  %v2184_v4 = vadd.f32 %v2183_v52, %v4827_v57  ;;  %v1832_v5 = vpop.f32.mrb[133].mxu1  ;;  %v2185_v58 = vpop.f32.mrb[133].mxu0 }
 0x280   : > { %v1833_v7 = vadd.f32 %v1832_v5, %v4830_v22  ;;  %v2186_v8 = vadd.f32 %v2185_v58, %v4835_v62  ;;  %v1834_v9 = vpop.f32.mrb[134].mxu1  ;;  %v2187_v12 = vpop.f32.mrb[134].mxu0  ;;  %s3041_s12 = sand.u32 1, %s4185_s22   ;;  %s3560_s28 = sshll.u32 %s4185_s22, 14 }
 0x281   : > { %2848 = vst [vmem:[%s4844_s7 + $0x220] sm:$0xff] %v1831_v3  ;;  %2976 = vst [vmem:[%s4847_s16 + $0x220] sm:$0xff] %v2184_v4  ;;  %v1835_v15 = vadd.f32 %v1834_v9, %v4824_v34  ;;  %v2188_v17 = vadd.f32 %v2187_v12, %v4827_v57  ;;  %v1836_v20 = vpop.f32.mrb[135].mxu1  ;;  %v2189_v19 = vpop.f32.mrb[135].mxu0  ;;  %s3078_s8 = sshll.u32 %s4844_s7, 4  ;;  %s3095_s13 = sshll.u32 %s4847_s16, 4  ;;  %s5403_s8 = int_to_ptr.vmem [resolvable:$true] %s3078_s8  ;;  %s5412_s13 = int_to_ptr.vmem [resolvable:$true] %s3095_s13 }
 0x282   : > { %2849 = vst [vmem:[%s4844_s7 + $0x228] sm:$0xff] %v1833_v7  ;;  %2977 = vst [vmem:[%s4847_s16 + $0x228] sm:$0xff] %v2186_v8  ;;  %v1837_v43 = vadd.f32 %v1836_v20, %v4830_v22  ;;  %v2190_v21 = vadd.f32 %v2189_v19, %v4835_v62  ;;  %v1840_v0 = vpop.f32.mrb[136].mxu1  ;;  %v2193_v24 = vpop.f32.mrb[136].mxu0  ;;  %s5397_s6 = scalar_lea.hbm %s5494_s4, %s3560_s28  ;;  %s5410_s17 = scalar_lea.hbm %s5495_s5, %s3560_s28 }
 0x283   : > { %2850 = vst [vmem:[%s4844_s7 + $0x230] sm:$0xff] %v1835_v15  ;;  %2978 = vst [vmem:[%s4847_s16 + $0x230] sm:$0xff] %v2188_v17  ;;  %v1841_v25 = vadd.f32 %v1840_v0, %v4824_v34  ;;  %v2194_v45 = vadd.f32 %v2193_v24, %v4827_v57  ;;  %v1842_v2 = vpop.f32.mrb[137].mxu1  ;;  %v2195_v26 = vpop.f32.mrb[137].mxu0  ;;  %s5418_s11 = scalar_lea.sflag [#allocation9], %s3041_s12  ;;  %s4017_s29 = scalar_lea.vmem %s5403_s8, 16384 }
 0x284   : > { %2851 = vst [vmem:[%s4844_s7 + $0x238] sm:$0xff] %v1837_v43  ;;  %2979 = vst [vmem:[%s4847_s16 + $0x238] sm:$0xff] %v2190_v21  ;;  %v1843_v27 = vadd.f32 %v1842_v2, %v4830_v22  ;;  %v2196_v28 = vadd.f32 %v2195_v26, %v4835_v62  ;;  %v1844_v29 = vpop.f32.mrb[138].mxu1  ;;  %v2197_v30 = vpop.f32.mrb[138].mxu0  ;;  %p4018_p10 = scmp.ne.s32.totalorder %s5403_s8, %s4017_s29  ;;  %s4130_s24 = smov [#allocation8]  }
 0x285   : > { %2852 = vst [vmem:[%s4844_s7 + $0x240] sm:$0xff] %v1841_v25  ;;  %2980 = vst [vmem:[%s4847_s16 + $0x240] sm:$0xff] %v2194_v45  ;;  %v1845_v33 = vadd.f32 %v1844_v29, %v4824_v34  ;;  %v2198_v35 = vadd.f32 %v2197_v30, %v4827_v57  ;;  %v1846_v47 = vpop.f32.mrb[139].mxu1  ;;  %v2199_v39 = vpop.f32.mrb[139].mxu0  ;;  %s4021_s26 = sshll.u32 %s4130_s24, 4  ;;  %s4022_s26 = int_to_ptr.vmem [resolvable:$false] %s4021_s26 }
 0x286   : > { %2853 = vst [vmem:[%s4844_s7 + $0x248] sm:$0xff] %v1843_v27  ;;  %2981 = vst [vmem:[%s4847_s16 + $0x248] sm:$0xff] %v2196_v28  ;;  %v1847_v42 = vadd.f32 %v1846_v47, %v4830_v22  ;;  %v2200_v44 = vadd.f32 %v2199_v39, %v4835_v62  ;;  %v1850_v46 = vpop.f32.mrb[140].mxu1  ;;  %v2203_v54 = vpop.f32.mrb[140].mxu0  ;;  %p4019_p13 = pnand %p4018_p10, %p4257_p12  ;;  %s4023_s15 = scalar_lea.vmem %s4022_s26, 32768 }
 0x287   : > { %2854 = vst [vmem:[%s4844_s7 + $0x250] sm:$0xff] %v1845_v33  ;;  %2982 = vst [vmem:[%s4847_s16 + $0x250] sm:$0xff] %v2198_v35  ;;  %v1851_v56 = vadd.f32 %v1850_v46, %v4824_v34  ;;  %v2204_v32 = vadd.f32 %v2203_v54, %v4827_v57  ;;  %v1852_v59 = vpop.f32.mrb[141].mxu1  ;;  %v2205_v14 = vpop.f32.mrb[141].mxu0  ;;  %p4024_p7 = scmp.lt.s32.totalorder %s5403_s8, %s4022_s26  ;;  %p4025_p9 = scmp.lt.s32.totalorder %s4023_s15, %s4017_s29 }
 0x288   : > { %2855 = vst [vmem:[%s4844_s7 + $0x258] sm:$0xff] %v1847_v42  ;;  %2983 = vst [vmem:[%s4847_s16 + $0x258] sm:$0xff] %v2200_v44  ;;  %v1853_v13 = vadd.f32 %v1852_v59, %v4830_v22  ;;  %v2206_v53 = vadd.f32 %v2205_v14, %v4835_v62  ;;  %v1854_v37 = vpop.f32.mrb[142].mxu1  ;;  %v2207_v16 = vpop.f32.mrb[142].mxu0  ;;  %p4020_p3 = pneg %p4019_p13 }
 0x289   : > { %2856 = vst [vmem:[%s4844_s7 + $0x260] sm:$0xff] %v1851_v56  ;;  %2984 = vst [vmem:[%s4847_s16 + $0x260] sm:$0xff] %v2204_v32  ;;  %v1855_v40 = vadd.f32 %v1854_v37, %v4824_v34  ;;  %v2208_v50 = vadd.f32 %v2207_v16, %v4827_v57  ;;  %v1856_v6 = vpop.f32.mrb[143].mxu1  ;;  %v2209_v55 = vpop.f32.mrb[143].mxu0  ;;  %p4026_p2 = por %p4025_p9, %p4024_p7 }
 0x28a   : > { %2857 = vst [vmem:[%s4844_s7 + $0x268] sm:$0xff] %v1853_v13  ;;  %2985 = vst [vmem:[%s4847_s16 + $0x268] sm:$0xff] %v2206_v53  ;;  %v1857_v10 = vadd.f32 %v1856_v6, %v4830_v22  ;;  %v2210_v18 = vadd.f32 %v2209_v55, %v4835_v62 }
 0x28b   : > { %2858 = vst [vmem:[%s4844_s7 + $0x270] sm:$0xff] %v1855_v40  ;;  %2986 = vst [vmem:[%s4847_s16 + $0x270] sm:$0xff] %v2208_v50  ;;  %p4027_p0 = pnand %p4026_p2, %p4020_p3 }
 0x28c   : > { %2859 = vst [vmem:[%s4844_s7 + $0x278] sm:$0xff] %v1857_v10  ;;  %2987 = vst [vmem:[%s4847_s16 + $0x278] sm:$0xff] %v2210_v18  ;;  %v1860_v23 = vpop.f32.mrb[144].mxu1  ;;  %v2213_v38 = vpop.f32.mrb[144].mxu0 }
 0x28d   : > { %v1861_v31 = vadd.f32 %v1860_v23, %v4824_v34  ;;  %v2214_v36 = vadd.f32 %v2213_v38, %v4827_v57  ;;  %v1862_v48 = vpop.f32.mrb[145].mxu1  ;;  %v2215_v41 = vpop.f32.mrb[145].mxu0 }
 0x28e   : > { %v1863_v51 = vadd.f32 %v1862_v48, %v4830_v22  ;;  %v2216_v11 = vadd.f32 %v2215_v41, %v4835_v62  ;;  %v1864_v60 = vpop.f32.mrb[146].mxu1  ;;  %v2217_v49 = vpop.f32.mrb[146].mxu0 }
 0x28f   : > { %2860 = vst [vmem:[%s4844_s7 + $0x280] sm:$0xff] %v1861_v31  ;;  %2988 = vst [vmem:[%s4847_s16 + $0x280] sm:$0xff] %v2214_v36  ;;  %v1865_v61 = vadd.f32 %v1864_v60, %v4824_v34  ;;  %v2218_v63 = vadd.f32 %v2217_v49, %v4827_v57  ;;  %v1866_v1 = vpop.f32.mrb[147].mxu1  ;;  %v2219_v52 = vpop.f32.mrb[147].mxu0 }
 0x290   : > { %2861 = vst [vmem:[%s4844_s7 + $0x288] sm:$0xff] %v1863_v51  ;;  %2989 = vst [vmem:[%s4847_s16 + $0x288] sm:$0xff] %v2216_v11  ;;  %v1867_v3 = vadd.f32 %v1866_v1, %v4830_v22  ;;  %v2220_v4 = vadd.f32 %v2219_v52, %v4835_v62 }
 0x291   : > { %2862 = vst [vmem:[%s4844_s7 + $0x290] sm:$0xff] %v1865_v61  ;;  %2990 = vst [vmem:[%s4847_s16 + $0x290] sm:$0xff] %v2218_v63 }
 0x292   : > { %2863 = vst [vmem:[%s4844_s7 + $0x298] sm:$0xff] %v1867_v3  ;;  %2991 = vst [vmem:[%s4847_s16 + $0x298] sm:$0xff] %v2220_v4 }
 0x294   : > { %v1870_v5 = vpop.f32.mrb[148].mxu1  ;;  %v2223_v58 = vpop.f32.mrb[148].mxu0 }
 0x295   : > { %v1871_v7 = vadd.f32 %v1870_v5, %v4824_v34  ;;  %v2224_v8 = vadd.f32 %v2223_v58, %v4827_v57  ;;  %v1872_v9 = vpop.f32.mrb[149].mxu1  ;;  %v2225_v12 = vpop.f32.mrb[149].mxu0 }
 0x296   : > { %v1873_v15 = vadd.f32 %v1872_v9, %v4830_v22  ;;  %v2226_v17 = vadd.f32 %v2225_v12, %v4835_v62  ;;  %v1874_v20 = vpop.f32.mrb[150].mxu1  ;;  %v2227_v19 = vpop.f32.mrb[150].mxu0 }
 0x297   : > { %2864 = vst [vmem:[%s4844_s7 + $0x2a0] sm:$0xff] %v1871_v7  ;;  %2992 = vst [vmem:[%s4847_s16 + $0x2a0] sm:$0xff] %v2224_v8  ;;  %v1875_v43 = vadd.f32 %v1874_v20, %v4824_v34  ;;  %v2228_v21 = vadd.f32 %v2227_v19, %v4827_v57  ;;  %v1876_v0 = vpop.f32.mrb[151].mxu1  ;;  %v2229_v24 = vpop.f32.mrb[151].mxu0 }
 0x298   : > { %2865 = vst [vmem:[%s4844_s7 + $0x2a8] sm:$0xff] %v1873_v15  ;;  %2993 = vst [vmem:[%s4847_s16 + $0x2a8] sm:$0xff] %v2226_v17  ;;  %v1877_v25 = vadd.f32 %v1876_v0, %v4830_v22  ;;  %v2230_v45 = vadd.f32 %v2229_v24, %v4835_v62 }
 0x299   : > { %2866 = vst [vmem:[%s4844_s7 + $0x2b0] sm:$0xff] %v1875_v43  ;;  %2994 = vst [vmem:[%s4847_s16 + $0x2b0] sm:$0xff] %v2228_v21 }
 0x29a   : > { %2867 = vst [vmem:[%s4844_s7 + $0x2b8] sm:$0xff] %v1877_v25  ;;  %2995 = vst [vmem:[%s4847_s16 + $0x2b8] sm:$0xff] %v2230_v45 }
 0x29c   : > { %v1880_v2 = vpop.f32.mrb[152].mxu1  ;;  %v2233_v26 = vpop.f32.mrb[152].mxu0 }
 0x29d   : > { %v1881_v27 = vadd.f32 %v1880_v2, %v4824_v34  ;;  %v2234_v28 = vadd.f32 %v2233_v26, %v4827_v57  ;;  %v1882_v29 = vpop.f32.mrb[153].mxu1  ;;  %v2235_v30 = vpop.f32.mrb[153].mxu0 }
 0x29e   : > { %v1883_v33 = vadd.f32 %v1882_v29, %v4830_v22  ;;  %v2236_v35 = vadd.f32 %v2235_v30, %v4835_v62  ;;  %v1884_v47 = vpop.f32.mrb[154].mxu1  ;;  %v2237_v39 = vpop.f32.mrb[154].mxu0 }
 0x29f   : > { %2868 = vst [vmem:[%s4844_s7 + $0x2c0] sm:$0xff] %v1881_v27  ;;  %2996 = vst [vmem:[%s4847_s16 + $0x2c0] sm:$0xff] %v2234_v28  ;;  %v1885_v42 = vadd.f32 %v1884_v47, %v4824_v34  ;;  %v2238_v44 = vadd.f32 %v2237_v39, %v4827_v57  ;;  %v1886_v46 = vpop.f32.mrb[155].mxu1  ;;  %v2239_v54 = vpop.f32.mrb[155].mxu0 }
 0x2a0   : > { %2869 = vst [vmem:[%s4844_s7 + $0x2c8] sm:$0xff] %v1883_v33  ;;  %2997 = vst [vmem:[%s4847_s16 + $0x2c8] sm:$0xff] %v2236_v35  ;;  %v1887_v56 = vadd.f32 %v1886_v46, %v4830_v22  ;;  %v2240_v32 = vadd.f32 %v2239_v54, %v4835_v62 }
 0x2a1   : > { %2870 = vst [vmem:[%s4844_s7 + $0x2d0] sm:$0xff] %v1885_v42  ;;  %2998 = vst [vmem:[%s4847_s16 + $0x2d0] sm:$0xff] %v2238_v44 }
 0x2a2   : > { %2871 = vst [vmem:[%s4844_s7 + $0x2d8] sm:$0xff] %v1887_v56  ;;  %2999 = vst [vmem:[%s4847_s16 + $0x2d8] sm:$0xff] %v2240_v32 }
 0x2a4   : > { %v1890_v59 = vpop.f32.mrb[156].mxu1  ;;  %v2243_v14 = vpop.f32.mrb[156].mxu0 }
 0x2a5   : > { %v1891_v13 = vadd.f32 %v1890_v59, %v4824_v34  ;;  %v2244_v53 = vadd.f32 %v2243_v14, %v4827_v57  ;;  %v1892_v37 = vpop.f32.mrb[157].mxu1  ;;  %v2245_v16 = vpop.f32.mrb[157].mxu0 }
 0x2a6   : > { %v1893_v40 = vadd.f32 %v1892_v37, %v4830_v22  ;;  %v2246_v50 = vadd.f32 %v2245_v16, %v4835_v62  ;;  %v1894_v6 = vpop.f32.mrb[158].mxu1  ;;  %v2247_v55 = vpop.f32.mrb[158].mxu0 }
 0x2a7   : > { %2872 = vst [vmem:[%s4844_s7 + $0x2e0] sm:$0xff] %v1891_v13  ;;  %3000 = vst [vmem:[%s4847_s16 + $0x2e0] sm:$0xff] %v2244_v53  ;;  %v1895_v10 = vadd.f32 %v1894_v6, %v4824_v34  ;;  %v2248_v18 = vadd.f32 %v2247_v55, %v4827_v57  ;;  %v1896_v23 = vpop.f32.mrb[159].mxu1  ;;  %v2249_v38 = vpop.f32.mrb[159].mxu0 }
 0x2a8   : > { %2873 = vst [vmem:[%s4844_s7 + $0x2e8] sm:$0xff] %v1893_v40  ;;  %3001 = vst [vmem:[%s4847_s16 + $0x2e8] sm:$0xff] %v2246_v50  ;;  %v1897_v31 = vadd.f32 %v1896_v23, %v4830_v22  ;;  %v2250_v36 = vadd.f32 %v2249_v38, %v4835_v62 }
 0x2a9   : > { %2874 = vst [vmem:[%s4844_s7 + $0x2f0] sm:$0xff] %v1895_v10  ;;  %3002 = vst [vmem:[%s4847_s16 + $0x2f0] sm:$0xff] %v2248_v18 }
 0x2aa   : > { %2875 = vst [vmem:[%s4844_s7 + $0x2f8] sm:$0xff] %v1897_v31  ;;  %3003 = vst [vmem:[%s4847_s16 + $0x2f8] sm:$0xff] %v2250_v36 }
 0x2ac   : > { %v1900_v48 = vpop.f32.mrb[160].mxu1  ;;  %v2253_v41 = vpop.f32.mrb[160].mxu0 }
 0x2ad   : > { %v1901_v51 = vadd.f32 %v1900_v48, %v4824_v34  ;;  %v2254_v11 = vadd.f32 %v2253_v41, %v4827_v57  ;;  %v1902_v60 = vpop.f32.mrb[161].mxu1  ;;  %v2255_v49 = vpop.f32.mrb[161].mxu0 }
 0x2ae   : > { %v1903_v61 = vadd.f32 %v1902_v60, %v4830_v22  ;;  %v2256_v63 = vadd.f32 %v2255_v49, %v4835_v62  ;;  %v1904_v1 = vpop.f32.mrb[162].mxu1  ;;  %v2257_v52 = vpop.f32.mrb[162].mxu0 }
 0x2af   : > { %2876 = vst [vmem:[%s4844_s7 + $0x300] sm:$0xff] %v1901_v51  ;;  %3004 = vst [vmem:[%s4847_s16 + $0x300] sm:$0xff] %v2254_v11  ;;  %v1905_v3 = vadd.f32 %v1904_v1, %v4824_v34  ;;  %v2258_v4 = vadd.f32 %v2257_v52, %v4827_v57  ;;  %v1906_v5 = vpop.f32.mrb[163].mxu1  ;;  %v2259_v58 = vpop.f32.mrb[163].mxu0 }
 0x2b0   : > { %2877 = vst [vmem:[%s4844_s7 + $0x308] sm:$0xff] %v1903_v61  ;;  %3005 = vst [vmem:[%s4847_s16 + $0x308] sm:$0xff] %v2256_v63  ;;  %v1907_v7 = vadd.f32 %v1906_v5, %v4830_v22  ;;  %v2260_v8 = vadd.f32 %v2259_v58, %v4835_v62 }
 0x2b1   : > { %2878 = vst [vmem:[%s4844_s7 + $0x310] sm:$0xff] %v1905_v3  ;;  %3006 = vst [vmem:[%s4847_s16 + $0x310] sm:$0xff] %v2258_v4 }
 0x2b2   : > { %2879 = vst [vmem:[%s4844_s7 + $0x318] sm:$0xff] %v1907_v7  ;;  %3007 = vst [vmem:[%s4847_s16 + $0x318] sm:$0xff] %v2260_v8 }
 0x2b4   : > { %v1910_v9 = vpop.f32.mrb[164].mxu1  ;;  %v2263_v12 = vpop.f32.mrb[164].mxu0 }
 0x2b5   : > { %v1911_v15 = vadd.f32 %v1910_v9, %v4824_v34  ;;  %v2264_v17 = vadd.f32 %v2263_v12, %v4827_v57  ;;  %v1912_v20 = vpop.f32.mrb[165].mxu1  ;;  %v2265_v19 = vpop.f32.mrb[165].mxu0 }
 0x2b6   : > { %v1913_v43 = vadd.f32 %v1912_v20, %v4830_v22  ;;  %v2266_v21 = vadd.f32 %v2265_v19, %v4835_v62  ;;  %v1914_v0 = vpop.f32.mrb[166].mxu1  ;;  %v2267_v24 = vpop.f32.mrb[166].mxu0 }
 0x2b7   : > { %2880 = vst [vmem:[%s4844_s7 + $0x320] sm:$0xff] %v1911_v15  ;;  %3008 = vst [vmem:[%s4847_s16 + $0x320] sm:$0xff] %v2264_v17  ;;  %v1915_v25 = vadd.f32 %v1914_v0, %v4824_v34  ;;  %v2268_v45 = vadd.f32 %v2267_v24, %v4827_v57  ;;  %v1916_v2 = vpop.f32.mrb[167].mxu1  ;;  %v2269_v26 = vpop.f32.mrb[167].mxu0 }
 0x2b8   : > { %2881 = vst [vmem:[%s4844_s7 + $0x328] sm:$0xff] %v1913_v43  ;;  %3009 = vst [vmem:[%s4847_s16 + $0x328] sm:$0xff] %v2266_v21  ;;  %v1917_v27 = vadd.f32 %v1916_v2, %v4830_v22  ;;  %v2270_v28 = vadd.f32 %v2269_v26, %v4835_v62 }
 0x2b9   : > { %2882 = vst [vmem:[%s4844_s7 + $0x330] sm:$0xff] %v1915_v25  ;;  %3010 = vst [vmem:[%s4847_s16 + $0x330] sm:$0xff] %v2268_v45 }
 0x2ba   : > { %2883 = vst [vmem:[%s4844_s7 + $0x338] sm:$0xff] %v1917_v27  ;;  %3011 = vst [vmem:[%s4847_s16 + $0x338] sm:$0xff] %v2270_v28 }
 0x2bc   : > { %v1920_v29 = vpop.f32.mrb[168].mxu1  ;;  %v2273_v30 = vpop.f32.mrb[168].mxu0 }
 0x2bd   : > { %v1921_v33 = vadd.f32 %v1920_v29, %v4824_v34  ;;  %v2274_v35 = vadd.f32 %v2273_v30, %v4827_v57  ;;  %v1922_v47 = vpop.f32.mrb[169].mxu1  ;;  %v2275_v39 = vpop.f32.mrb[169].mxu0 }
 0x2be   : > { %v1923_v42 = vadd.f32 %v1922_v47, %v4830_v22  ;;  %v2276_v44 = vadd.f32 %v2275_v39, %v4835_v62  ;;  %v1924_v46 = vpop.f32.mrb[170].mxu1  ;;  %v2277_v54 = vpop.f32.mrb[170].mxu0 }
 0x2bf   : > { %2884 = vst [vmem:[%s4844_s7 + $0x340] sm:$0xff] %v1921_v33  ;;  %3012 = vst [vmem:[%s4847_s16 + $0x340] sm:$0xff] %v2274_v35  ;;  %v1925_v56 = vadd.f32 %v1924_v46, %v4824_v34  ;;  %v2278_v32 = vadd.f32 %v2277_v54, %v4827_v57  ;;  %v1926_v59 = vpop.f32.mrb[171].mxu1  ;;  %v2279_v14 = vpop.f32.mrb[171].mxu0 }
 0x2c0   : > { %2885 = vst [vmem:[%s4844_s7 + $0x348] sm:$0xff] %v1923_v42  ;;  %3013 = vst [vmem:[%s4847_s16 + $0x348] sm:$0xff] %v2276_v44  ;;  %v1927_v13 = vadd.f32 %v1926_v59, %v4830_v22  ;;  %v2280_v53 = vadd.f32 %v2279_v14, %v4835_v62 }
 0x2c1   : > { %2886 = vst [vmem:[%s4844_s7 + $0x350] sm:$0xff] %v1925_v56  ;;  %3014 = vst [vmem:[%s4847_s16 + $0x350] sm:$0xff] %v2278_v32 }
 0x2c2   : > { %2887 = vst [vmem:[%s4844_s7 + $0x358] sm:$0xff] %v1927_v13  ;;  %3015 = vst [vmem:[%s4847_s16 + $0x358] sm:$0xff] %v2280_v53 }
 0x2c4   : > { %v1930_v37 = vpop.f32.mrb[172].mxu1  ;;  %v2283_v16 = vpop.f32.mrb[172].mxu0 }
 0x2c5   : > { %v1931_v40 = vadd.f32 %v1930_v37, %v4824_v34  ;;  %v2284_v50 = vadd.f32 %v2283_v16, %v4827_v57  ;;  %v1932_v6 = vpop.f32.mrb[173].mxu1  ;;  %v2285_v55 = vpop.f32.mrb[173].mxu0 }
 0x2c6   : > { %v1933_v10 = vadd.f32 %v1932_v6, %v4830_v22  ;;  %v2286_v18 = vadd.f32 %v2285_v55, %v4835_v62  ;;  %v1934_v23 = vpop.f32.mrb[174].mxu1  ;;  %v2287_v38 = vpop.f32.mrb[174].mxu0 }
 0x2c7   : > { %2888 = vst [vmem:[%s4844_s7 + $0x360] sm:$0xff] %v1931_v40  ;;  %3016 = vst [vmem:[%s4847_s16 + $0x360] sm:$0xff] %v2284_v50  ;;  %v1935_v31 = vadd.f32 %v1934_v23, %v4824_v34  ;;  %v2288_v36 = vadd.f32 %v2287_v38, %v4827_v57  ;;  %v1936_v48 = vpop.f32.mrb[175].mxu1  ;;  %v2289_v41 = vpop.f32.mrb[175].mxu0 }
 0x2c8   : > { %2889 = vst [vmem:[%s4844_s7 + $0x368] sm:$0xff] %v1933_v10  ;;  %3017 = vst [vmem:[%s4847_s16 + $0x368] sm:$0xff] %v2286_v18  ;;  %v1937_v51 = vadd.f32 %v1936_v48, %v4830_v22  ;;  %v2290_v11 = vadd.f32 %v2289_v41, %v4835_v62 }
 0x2c9   : > { %2890 = vst [vmem:[%s4844_s7 + $0x370] sm:$0xff] %v1935_v31  ;;  %3018 = vst [vmem:[%s4847_s16 + $0x370] sm:$0xff] %v2288_v36 }
 0x2ca   : > { %2891 = vst [vmem:[%s4844_s7 + $0x378] sm:$0xff] %v1937_v51  ;;  %3019 = vst [vmem:[%s4847_s16 + $0x378] sm:$0xff] %v2290_v11 }
 0x2cc   : > { %v1940_v60 = vpop.f32.mrb[176].mxu1  ;;  %v2293_v49 = vpop.f32.mrb[176].mxu0 }
 0x2cd   : > { %v1941_v61 = vadd.f32 %v1940_v60, %v4824_v34  ;;  %v2294_v63 = vadd.f32 %v2293_v49, %v4827_v57  ;;  %v1942_v1 = vpop.f32.mrb[177].mxu1  ;;  %v2295_v52 = vpop.f32.mrb[177].mxu0 }
 0x2ce   : > { %v1943_v3 = vadd.f32 %v1942_v1, %v4830_v22  ;;  %v2296_v4 = vadd.f32 %v2295_v52, %v4835_v62  ;;  %v1944_v5 = vpop.f32.mrb[178].mxu1  ;;  %v2297_v58 = vpop.f32.mrb[178].mxu0 }
 0x2cf   : > { %2892 = vst [vmem:[%s4844_s7 + $0x380] sm:$0xff] %v1941_v61  ;;  %3020 = vst [vmem:[%s4847_s16 + $0x380] sm:$0xff] %v2294_v63  ;;  %v1945_v7 = vadd.f32 %v1944_v5, %v4824_v34  ;;  %v2298_v8 = vadd.f32 %v2297_v58, %v4827_v57  ;;  %v1946_v9 = vpop.f32.mrb[179].mxu1  ;;  %v2299_v12 = vpop.f32.mrb[179].mxu0 }
 0x2d0   : > { %2893 = vst [vmem:[%s4844_s7 + $0x388] sm:$0xff] %v1943_v3  ;;  %3021 = vst [vmem:[%s4847_s16 + $0x388] sm:$0xff] %v2296_v4  ;;  %v1947_v15 = vadd.f32 %v1946_v9, %v4830_v22  ;;  %v2300_v17 = vadd.f32 %v2299_v12, %v4835_v62 }
 0x2d1   : > { %2894 = vst [vmem:[%s4844_s7 + $0x390] sm:$0xff] %v1945_v7  ;;  %3022 = vst [vmem:[%s4847_s16 + $0x390] sm:$0xff] %v2298_v8 }
 0x2d2   : > { %2895 = vst [vmem:[%s4844_s7 + $0x398] sm:$0xff] %v1947_v15  ;;  %3023 = vst [vmem:[%s4847_s16 + $0x398] sm:$0xff] %v2300_v17 }
 0x2d4   : > { %v1950_v20 = vpop.f32.mrb[180].mxu1  ;;  %v2303_v19 = vpop.f32.mrb[180].mxu0 }
 0x2d5   : > { %v1951_v43 = vadd.f32 %v1950_v20, %v4824_v34  ;;  %v2304_v21 = vadd.f32 %v2303_v19, %v4827_v57  ;;  %v1952_v0 = vpop.f32.mrb[181].mxu1  ;;  %v2305_v24 = vpop.f32.mrb[181].mxu0 }
 0x2d6   : > { %v1953_v25 = vadd.f32 %v1952_v0, %v4830_v22  ;;  %v2306_v45 = vadd.f32 %v2305_v24, %v4835_v62  ;;  %v1954_v2 = vpop.f32.mrb[182].mxu1  ;;  %v2307_v26 = vpop.f32.mrb[182].mxu0 }
 0x2d7   : > { %2896 = vst [vmem:[%s4844_s7 + $0x3a0] sm:$0xff] %v1951_v43  ;;  %3024 = vst [vmem:[%s4847_s16 + $0x3a0] sm:$0xff] %v2304_v21  ;;  %v1955_v27 = vadd.f32 %v1954_v2, %v4824_v34  ;;  %v2308_v28 = vadd.f32 %v2307_v26, %v4827_v57  ;;  %v1956_v29 = vpop.f32.mrb[183].mxu1  ;;  %v2309_v30 = vpop.f32.mrb[183].mxu0 }
 0x2d8   : > { %2897 = vst [vmem:[%s4844_s7 + $0x3a8] sm:$0xff] %v1953_v25  ;;  %3025 = vst [vmem:[%s4847_s16 + $0x3a8] sm:$0xff] %v2306_v45  ;;  %v1957_v33 = vadd.f32 %v1956_v29, %v4830_v22  ;;  %v2310_v35 = vadd.f32 %v2309_v30, %v4835_v62 }
 0x2d9   : > { %2898 = vst [vmem:[%s4844_s7 + $0x3b0] sm:$0xff] %v1955_v27  ;;  %3026 = vst [vmem:[%s4847_s16 + $0x3b0] sm:$0xff] %v2308_v28 }
 0x2da   : > { %2899 = vst [vmem:[%s4844_s7 + $0x3b8] sm:$0xff] %v1957_v33  ;;  %3027 = vst [vmem:[%s4847_s16 + $0x3b8] sm:$0xff] %v2310_v35 }
 0x2dc   : > { %v1960_v47 = vpop.f32.mrb[184].mxu1  ;;  %v2313_v39 = vpop.f32.mrb[184].mxu0 }
 0x2dd   : > { %v1961_v42 = vadd.f32 %v1960_v47, %v4824_v34  ;;  %v2314_v44 = vadd.f32 %v2313_v39, %v4827_v57  ;;  %v1962_v46 = vpop.f32.mrb[185].mxu1  ;;  %v2315_v54 = vpop.f32.mrb[185].mxu0 }
 0x2de   : > { %v1963_v56 = vadd.f32 %v1962_v46, %v4830_v22  ;;  %v2316_v32 = vadd.f32 %v2315_v54, %v4835_v62  ;;  %v1964_v59 = vpop.f32.mrb[186].mxu1  ;;  %v2317_v14 = vpop.f32.mrb[186].mxu0 }
 0x2df   : > { %2900 = vst [vmem:[%s4844_s7 + $0x3c0] sm:$0xff] %v1961_v42  ;;  %3028 = vst [vmem:[%s4847_s16 + $0x3c0] sm:$0xff] %v2314_v44  ;;  %v1965_v13 = vadd.f32 %v1964_v59, %v4824_v34  ;;  %v2318_v53 = vadd.f32 %v2317_v14, %v4827_v57  ;;  %v1966_v37 = vpop.f32.mrb[187].mxu1  ;;  %v2319_v16 = vpop.f32.mrb[187].mxu0 }
 0x2e0   : > { %2901 = vst [vmem:[%s4844_s7 + $0x3c8] sm:$0xff] %v1963_v56  ;;  %3029 = vst [vmem:[%s4847_s16 + $0x3c8] sm:$0xff] %v2316_v32  ;;  %v1967_v40 = vadd.f32 %v1966_v37, %v4830_v22  ;;  %v2320_v50 = vadd.f32 %v2319_v16, %v4835_v62 }
 0x2e1   : > { %2902 = vst [vmem:[%s4844_s7 + $0x3d0] sm:$0xff] %v1965_v13  ;;  %3030 = vst [vmem:[%s4847_s16 + $0x3d0] sm:$0xff] %v2318_v53 }
 0x2e2   : > { %2903 = vst [vmem:[%s4844_s7 + $0x3d8] sm:$0xff] %v1967_v40  ;;  %3031 = vst [vmem:[%s4847_s16 + $0x3d8] sm:$0xff] %v2320_v50 }
 0x2e4   : > { %v1970_v6 = vpop.f32.mrb[188].mxu1  ;;  %v2323_v55 = vpop.f32.mrb[188].mxu0 }
 0x2e5   : > { %v1971_v10 = vadd.f32 %v1970_v6, %v4824_v34  ;;  %v2324_v18 = vadd.f32 %v2323_v55, %v4827_v57  ;;  %v1972_v23 = vpop.f32.mrb[189].mxu1  ;;  %v2325_v38 = vpop.f32.mrb[189].mxu0 }
 0x2e6   : > { %v1973_v31 = vadd.f32 %v1972_v23, %v4830_v22  ;;  %v2326_v36 = vadd.f32 %v2325_v38, %v4835_v62  ;;  %v1974_v48 = vpop.f32.mrb[190].mxu1  ;;  %v2327_v41 = vpop.f32.mrb[190].mxu0 }
 0x2e7   : > { %2904 = vst [vmem:[%s4844_s7 + $0x3e0] sm:$0xff] %v1971_v10  ;;  %3032 = vst [vmem:[%s4847_s16 + $0x3e0] sm:$0xff] %v2324_v18  ;;  %v1975_v51 = vadd.f32 %v1974_v48, %v4824_v34  ;;  %v2328_v11 = vadd.f32 %v2327_v41, %v4827_v57  ;;  %v1976_v60 = vpop.f32.mrb[191].mxu1  ;;  %v2329_v49 = vpop.f32.mrb[191].mxu0 }
 0x2e8   : > { %2905 = vst [vmem:[%s4844_s7 + $0x3e8] sm:$0xff] %v1973_v31  ;;  %3033 = vst [vmem:[%s4847_s16 + $0x3e8] sm:$0xff] %v2326_v36  ;;  %v1977_v61 = vadd.f32 %v1976_v60, %v4830_v22  ;;  %v2330_v63 = vadd.f32 %v2329_v49, %v4835_v62 }
 0x2e9   : > { %2906 = vst [vmem:[%s4844_s7 + $0x3f0] sm:$0xff] %v1975_v51  ;;  %3034 = vst [vmem:[%s4847_s16 + $0x3f0] sm:$0xff] %v2328_v11 }
 0x2ea   : > { %2907 = vst [vmem:[%s4844_s7 + $0x3f8] sm:$0xff] %v1977_v61  ;;  %3035 = vst [vmem:[%s4847_s16 + $0x3f8] sm:$0xff] %v2330_v63 }
 0x2eb   : > { %4030 = shalt.err (!%p4027_p0)
}
 0x2ec   : > { %s4031_s22 = scalar_lea.hbm %s5397_s6, 16384  ;;  %s4035_s12 = scalar_lea.hbm %s5494_s4, 32768 }
 0x2ed   : > { %p4032_p5 = scmp.ne.s32.totalorder %s5397_s6, %s4031_s22  ;;  %p4036_p4 = scmp.lt.u32.totalorder %s5397_s6, %s5494_s4 }
 0x2ee   : > { %p4037_p6 = scmp.lt.u32.totalorder %s4035_s12, %s4031_s22  ;;  %p4039_p10 = scmp.lt.u32.totalorder %s4031_s22, %s5397_s6 }
 0x2ef   : > { %p4033_p11 = pnand %p4032_p5, %p4257_p12 }
 0x2f0   : > { %p4038_p8 = por %p4037_p6, %p4036_p4 }
 0x2f1   : > { %p4034_p1 = pneg %p4033_p11 }
 0x2f2   : > { %p4040_p13 = por %p4039_p10, %p4038_p8 }
 0x2f4   : > { %p4041_p3 = pnand %p4040_p13, %p4034_p1 }
 0x2f6   : > { %4044 = shalt.err (!%p4041_p3)
}
 0x2f7   : > { %s4131_s27 = smov 256   ;;  %s4132_s29 = smov 16  }
 0x2f8   : > { %3602 = dma.vmem_to_hbm [thread:$0]  (%p4257_p12), %s5403_s8, 16384, %s5397_s6, %s5418_s11, %s4131_s27, %s4131_s27, %s4132_s29  }
 0x2f9   : > { %s4045_s24 = scalar_lea.vmem %s5412_s13, 16384  ;;  %s4133_s26 = smov [#allocation10]  }
 0x2fa   : > { %p4046_p7 = scmp.ne.s32.totalorder %s5412_s13, %s4045_s24  ;;  %s4049_s15 = sshll.u32 %s4133_s26, 4  ;;  %s4050_s15 = int_to_ptr.vmem [resolvable:$false] %s4049_s15 }
 0x2fb   : > { %s4051_s22 = scalar_lea.vmem %s4050_s15, 32768  ;;  %p4052_p0 = scmp.lt.s32.totalorder %s5412_s13, %s4050_s15 }
 0x2fc   : > { %p4047_p9 = pnand %p4046_p7, %p4257_p12  ;;  %p4053_p5 = scmp.lt.s32.totalorder %s4051_s22, %s4045_s24 }
 0x2fe   : > { %p4048_p2 = pneg %p4047_p9  ;;  %p4054_p11 = por %p4053_p5, %p4052_p0 }
 0x300   : > { %p4055_p1 = pnand %p4054_p11, %p4048_p2 }
 0x302   : > { %4058 = shalt.err (!%p4055_p1)
}
 0x303   : > { %s4059_s8 = scalar_lea.hbm %s5410_s17, 16384  ;;  %s4063_s16 = scalar_lea.hbm %s5495_s5, 32768 }
 0x304   : > { %p4060_p4 = scmp.ne.s32.totalorder %s5410_s17, %s4059_s8  ;;  %p4064_p10 = scmp.lt.u32.totalorder %s5410_s17, %s5495_s5 }
 0x305   : > { %p4065_p13 = scmp.lt.u32.totalorder %s4063_s16, %s4059_s8  ;;  %p4067_p7 = scmp.lt.u32.totalorder %s4059_s8, %s5410_s17 }
 0x306   : > { %p4061_p6 = pnand %p4060_p4, %p4257_p12 }
 0x307   : > { %p4066_p3 = por %p4065_p13, %p4064_p10 }
 0x308   : > { %p4062_p8 = pneg %p4061_p6 }
 0x309   : > { %p4068_p9 = por %p4067_p7, %p4066_p3 }
 0x30b   : > { %p4069_p2 = pnand %p4068_p9, %p4062_p8 }
 0x30d   : > { %4072 = shalt.err (!%p4069_p2)
}
 0x30e   : > { %3603 = dma.vmem_to_hbm [thread:$0]  (%p4257_p12), %s5412_s13, 16384, %s5410_s17, %s5418_s11, %s4131_s27, %s4131_s27, %s4132_s29  }
 0x30f PF: > { %s3110_s14 = sand.u32 1, %s4107_s18   ;;  %p5510_p0 = scmp.ne.s32.totalorder %s5500_s25, 0 }
 0x310   : > { %p5511_p5 = scmp.ge.s32.totalorder %s4119_s21, 2  ;;  %s3111_s24 = scalar_lea.sflag [#allocation4], %s3110_s14 }
 0x312   : > { %p3616_p11 = pnand %p5511_p5, %p5510_p0 }
 0x314   : > { %4098 = dma.done.wait (!%p3616_p11), %s3111_s24, 8192  }
 0x315   : > { %4100 = vsyncadd (!%p3616_p11), %s3111_s24, 4294959104  ;;  %s3119_s10 = sand.u32 1, %s3239_s23  }
 0x316   : > { %s3120_s26 = scalar_lea.sflag [#allocation9], %s3119_s10 }
 0x317   : > { %4102 = dma.done.wait (!%p3616_p11), %s3120_s26, 32768  }
 0x318   : > { %4104 = vsyncadd (!%p3616_p11), %s3120_s26, 4294934528  ;;  %p23_p12 = scmp.ge.s32.totalorder %s4222_s30, 4   ;;  %s5512_s18 = smov %s4111_s19 }
 0x319   : > { %s5513_s19 = smov %s4115_s20  ;;  %s5514_s20 = smov %s4253_s9 }
 0x31a   : > { %s5515_s21 = smov %s4222_s30  ;;  %25 = sbr.rel (!%p23_p12) target bundleno = 8 (0x8), region = 113 }
 0x321   :  { %3134 = vsyncpa [#allocation3], 1 }
 0x322   :  { %3136 = vsyncpa [#allocation3 + $0x1], 1 }
 0x323   :  { %3137 = vsyncpa [#allocation6], 1 }
 0x324   :  { %3138 = vsyncpa [#allocation4], 1 }
 0x325   :  { %3140 = vsyncpa [#allocation4 + $0x1], 1 }
 0x326   :  { %3141 = vsyncpa [#allocation9], 1 }
 0x327   :  { %3143 = vsyncpa [#allocation9 + $0x1], 1 }

</bundles_post_ra>
